<compile_context>
chip_gen: v7x
topology: tpu7x:2x2x1
jax: 0.10.0
libtpu: 0.0.40
codegen_flags: <defaults>
</compile_context>

<pallas_src>
import numpy as np

import jax
import jax.numpy as jnp
from jax.experimental import pallas as pl
from jax.experimental.pallas import tpu as pltpu


# ----------------------------------------------------------------------------
# Fused kernel
# ----------------------------------------------------------------------------
def _make_fused_kernel(H, W, chans, positive_eng, positive_pos):
    """Builds the fused forward kernel (one batch element per grid step)."""
    L = len(chans) - 1
    Ho, Wo = H // 2, W // 2
    C = chans[-1]

    def kernel(*refs):
        x_ref = refs[0]
        conv_refs = refs[1:1 + 2 * L]
        w1_ref, b1_ref, w2_ref, b2_ref = refs[1 + 2 * L:5 + 2 * L]
        o_ref = refs[5 + 2 * L]
        pad_refs = refs[6 + 2 * L:6 + 3 * L]
        flat_ref = refs[6 + 3 * L]

        # ---- conv stack (NHWC inside the kernel: channels on the lane dim) ----
        cur = x_ref[...]                                        # (H, W, 1)
        for l in range(L):
            cin, cout = chans[l], chans[l + 1]
            pad = pad_refs[l]                                   # (H+2, W+2, cin)
            w_ref = conv_refs[2 * l]                            # (9, cin, cout)
            b_ref = conv_refs[2 * l + 1]                        # (1, cout)
            pad[...] = jnp.zeros_like(pad)                      # zero halo
            pad[1:H + 1, 1:W + 1, :] = cur
            acc = jnp.zeros((H * W, cout), jnp.float32)
            for kh in range(3):                                 # 9 tap matmuls:
                for kw in range(3):                             # (H*W,cin)x(cin,cout)
                    slab = pad[kh:kh + H, kw:kw + W, :]         # (H, W, cin)
                    acc = acc + jnp.dot(slab.reshape(H * W, cin),
                                        w_ref[kh * 3 + kw],
                                        preferred_element_type=jnp.float32)
            cur = jnp.maximum(acc + b_ref[...], 0.0).reshape(H, W, cout)

        # ---- 2x2/2 max pool fused with the flatten -------------------------
        # flat[(ho*Wo + wo)*C + c] == pooled[ho, wo, c]; fc1 rows were permuted
        # at init so this matches torch's NCHW flatten exactly.
        for ho in range(Ho):
            rm = jnp.maximum(cur[2 * ho], cur[2 * ho + 1])      # (W, C)
            for wo in range(Wo):
                win = jnp.maximum(rm[2 * wo:2 * wo + 1, :],
                                  rm[2 * wo + 1:2 * wo + 2, :])  # (1, C)
                flat_ref[0:1, pl.ds((ho * Wo + wo) * C, C)] = win

        # ---- fully connected head ------------------------------------------
        flat = flat_ref[...]                                    # (1, Ho*Wo*C)
        h = jnp.dot(flat, w1_ref[...],
                    preferred_element_type=jnp.float32) + b1_ref[...]
        h = jnp.maximum(h, 0.0)
        y = jnp.dot(h, w2_ref[...],
                    preferred_element_type=jnp.float32) + b2_ref[...]

        def _softplus(t):
            return jnp.maximum(t, 0.0) + jnp.log1p(jnp.exp(-jnp.abs(t)))

        # CustomSoftplusFunction.forward (column-masked softplus).
        # TODO(synk): only the forward is implemented (no custom VJP / backward).
        if positive_eng and positive_pos:
            y = _softplus(y)                 # mask covers every column -> no iota
        elif positive_eng or positive_pos:
            col = jax.lax.broadcasted_iota(jnp.int32, y.shape, 1)
            mask = (col == 0) if positive_eng else (col > 0)
            y = jnp.where(mask, _softplus(y), y)

        o_ref[...] = y.astype(o_ref.dtype)

    return kernel


# ----------------------------------------------------------------------------
# Wrapper
# ----------------------------------------------------------------------------
def cnn_forward(kparams, x, *, H, W, chans, hidden,
                positive_eng=True, positive_pos=True):
    """Fused forward pass. x: (B, 1, H, W) float32."""
    del hidden  # shapes carried by the params themselves
    B = x.shape[0]
    L = len(chans) - 1
    Ho, Wo = H // 2, W // 2
    C = chans[-1]

    # channel dim is 1, so this transpose-to-NHWC is a free reshape
    x_nhwc = x.reshape(B, H, W, 1).astype(jnp.float32)

    kernel = _make_fused_kernel(H, W, chans, positive_eng, positive_pos)

    inputs = [x_nhwc]
    in_specs = [pl.BlockSpec((None, H, W, 1), lambda b: (b, 0, 0, 0))]
    for w_k, b_k in kparams["conv"]:
        inputs += [w_k, b_k]
        in_specs += [pl.BlockSpec(w_k.shape, lambda b: (0, 0, 0)),
                     pl.BlockSpec(b_k.shape, lambda b: (0, 0))]
    w1, b1 = kparams["fc1"]
    w2, b2 = kparams["fc2"]
    inputs += [w1, b1, w2, b2]
    in_specs += [pl.BlockSpec(w1.shape, lambda b: (0, 0)),
                 pl.BlockSpec(b1.shape, lambda b: (0, 0)),
                 pl.BlockSpec(w2.shape, lambda b: (0, 0)),
                 pl.BlockSpec(b2.shape, lambda b: (0, 0))]

    scratch_shapes = [pltpu.VMEM((H + 2, W + 2, chans[l]), jnp.float32)
                      for l in range(L)]
    scratch_shapes.append(pltpu.VMEM((1, Ho * Wo * C), jnp.float32))

    out = pl.pallas_call(
        kernel,
        out_shape=jax.ShapeDtypeStruct((B, 1, 3), jnp.float32),
        grid=(B,),
        in_specs=in_specs,
        out_specs=pl.BlockSpec((None, 1, 3), lambda b: (b, 0, 0)),
        scratch_shapes=scratch_shapes,
        compiler_params=pltpu.CompilerParams(
            dimension_semantics=("parallel",)),
    )(*inputs)
    return out.reshape(B, 3)


# ----------------------------------------------------------------------------
# Parameters (torch layout) + conversion to kernel layout
# ----------------------------------------------------------------------------
def init_cnn_params(key, H, W, hidden, num_layers, scale_mult):
    """Deterministic params in torch layout: conv (Cout,Cin,3,3), linear (out,in)."""
    chans = [1]
    for _ in range(num_layers):
        chans.append(chans[-1] * scale_mult)
    raw = {"conv": []}
    for l in range(num_layers):
        cin, cout = chans[l], chans[l + 1]
        key, kw_, kb_ = jax.random.split(key, 3)
        w = jax.random.normal(kw_, (cout, cin, 3, 3), jnp.float32) / jnp.sqrt(9.0 * cin)
        b = jax.random.normal(kb_, (cout,), jnp.float32) * 0.01
        raw["conv"].append((w, b))
    to_linear = chans[-1] * (H // 2) * (W // 2)
    key, k1, k2, k3, k4 = jax.random.split(key, 5)
    raw["fc1"] = (
        jax.random.normal(k1, (hidden, to_linear), jnp.float32) / jnp.sqrt(to_linear),
        jax.random.normal(k2, (hidden,), jnp.float32) * 0.01)
    raw["fc2"] = (
        jax.random.normal(k3, (3, hidden), jnp.float32) / jnp.sqrt(hidden),
        jax.random.normal(k4, (3,), jnp.float32) * 0.01)
    return raw, chans


def prepare_kernel_params(raw, H, W, chans, hidden):
    """Convert torch-layout params into the layouts the fused kernel expects."""
    Ho, Wo = H // 2, W // 2
    S, C = Ho * Wo, chans[-1]
    kp = {"conv": []}
    for l, (w, b) in enumerate(raw["conv"]):
        cin, cout = chans[l], chans[l + 1]
        # (Cout, Cin, kh, kw) -> (kh*3+kw, Cin, Cout)
        w_k = jnp.transpose(w, (2, 3, 1, 0)).reshape(9, cin, cout)
        kp["conv"].append((w_k, b.reshape(1, cout)))
    w1, b1 = raw["fc1"]
    w2, b2 = raw["fc2"]
    # torch flatten index = c*S + s ; kernel flat index = s*C + c
    w1_p = w1.T.reshape(C, S, hidden).transpose(1, 0, 2).reshape(S * C, hidden)
    kp["fc1"] = (w1_p, b1.reshape(1, hidden))
    kp["fc2"] = (w2.T, b2.reshape(1, 3))
    return kp


# ----------------------------------------------------------------------------
# Pure numpy (float64) reference of the torch forward, for self-check
# ----------------------------------------------------------------------------
def reference_forward(raw, x, H, W, positive_eng, positive_pos):
    a = np.asarray(x, np.float64).reshape(-1, 1, H, W)
    for w, b in raw["conv"]:
        w = np.asarray(w, np.float64)
        b = np.asarray(b, np.float64)
        ap = np.pad(a, ((0, 0), (0, 0), (1, 1), (1, 1)))
        out = np.zeros((a.shape[0], w.shape[0], H, W))
        for kh in range(3):
            for kw in range(3):
                out += np.einsum('bchw,oc->bohw',
                                 ap[:, :, kh:kh + H, kw:kw + W], w[:, :, kh, kw])
        a = np.maximum(out + b[None, :, None, None], 0.0)
    Ho, Wo = H // 2, W // 2
    a = a.reshape(a.shape[0], a.shape[1], Ho, 2, Wo, 2).max(axis=(3, 5))
    flat = a.reshape(a.shape[0], -1)
    w1, b1 = raw["fc1"]
    w2, b2 = raw["fc2"]
    h = np.maximum(flat @ np.asarray(w1, np.float64).T + np.asarray(b1, np.float64), 0.0)
    y = h @ np.asarray(w2, np.float64).T + np.asarray(b2, np.float64)

    def sp(t):
        return np.maximum(t, 0.0) + np.log1p(np.exp(-np.abs(t)))

    if positive_eng:
        y[:, 0] = sp(y[:, 0])
    if positive_pos:
        y[:, 1:] = sp(y[:, 1:])
    return y


# ----------------------------------------------------------------------------
if __name__ == "__main__":
    HEIGHT, WIDTH = 8, 8
    HIDDEN_DIM, NUM_LAYERS, SCALE_MULT = 32, 3, 4
    BATCH = 2

    key = jax.random.PRNGKey(0)
    key, pkey, xkey = jax.random.split(key, 3)
    raw_params, chans = init_cnn_params(pkey, HEIGHT, WIDTH,
                                        HIDDEN_DIM, NUM_LAYERS, SCALE_MULT)
    kparams = prepare_kernel_params(raw_params, HEIGHT, WIDTH, chans, HIDDEN_DIM)

    x = jax.random.normal(xkey, (BATCH, 1, HEIGHT, WIDTH), jnp.float32)

    out = cnn_forward(kparams, x, H=HEIGHT, W=WIDTH, chans=chans,
                      hidden=HIDDEN_DIM, positive_eng=True, positive_pos=True)
    out = jax.block_until_ready(out)
    assert out.shape == (BATCH, 3)

    ref = reference_forward(raw_params, np.asarray(x), HEIGHT, WIDTH, True, True)
    np.testing.assert_allclose(np.asarray(out), ref, rtol=1e-2, atol=1e-2)
    print("KERNEL_OK")
</pallas_src>

<mosaic_0001>
module attributes {stable_mosaic.version = 11 : i64} {
  func.func @kernel(%arg0: i32, %arg1: memref<1x8x8x1xf32, #tpu.memory_space<vmem>>, %arg2: memref<9x1x4xf32, #tpu.memory_space<vmem>>, %arg3: memref<1x4xf32, #tpu.memory_space<vmem>>, %arg4: memref<9x4x16xf32, #tpu.memory_space<vmem>>, %arg5: memref<1x16xf32, #tpu.memory_space<vmem>>, %arg6: memref<9x16x64xf32, #tpu.memory_space<vmem>>, %arg7: memref<1x64xf32, #tpu.memory_space<vmem>>, %arg8: memref<1024x32xf32, #tpu.memory_space<vmem>>, %arg9: memref<1x32xf32, #tpu.memory_space<vmem>>, %arg10: memref<32x3xf32, #tpu.memory_space<vmem>>, %arg11: memref<1x3xf32, #tpu.memory_space<vmem>>, %arg12: memref<1x1x3xf32, #tpu.memory_space<vmem>>, %arg13: memref<10x10x1xf32, #tpu.memory_space<vmem>>, %arg14: memref<10x10x4xf32, #tpu.memory_space<vmem>>, %arg15: memref<10x10x16xf32, #tpu.memory_space<vmem>>, %arg16: memref<1x1024xf32, #tpu.memory_space<vmem>>) attributes {dimension_semantics = [#tpu.dimension_semantics<parallel>], iteration_bounds = array<i64: 2>, scalar_prefetch = 0 : i64, scratch_operands = 4 : i64, tpu.core_type = #tpu.core_type<tc>, window_params = [{transform_indices = @transform_0, window_bounds = array<i64: 1, 8, 8, 1>}, {pipeline_mode = #tpu.pipeline_mode<synchronous>, transform_indices = @transform_1, window_bounds = array<i64: 9, 1, 4>}, {pipeline_mode = #tpu.pipeline_mode<synchronous>, transform_indices = @transform_2, window_bounds = array<i64: 1, 4>}, {pipeline_mode = #tpu.pipeline_mode<synchronous>, transform_indices = @transform_3, window_bounds = array<i64: 9, 4, 16>}, {pipeline_mode = #tpu.pipeline_mode<synchronous>, transform_indices = @transform_4, window_bounds = array<i64: 1, 16>}, {pipeline_mode = #tpu.pipeline_mode<synchronous>, transform_indices = @transform_5, window_bounds = array<i64: 9, 16, 64>}, {pipeline_mode = #tpu.pipeline_mode<synchronous>, transform_indices = @transform_6, window_bounds = array<i64: 1, 64>}, {pipeline_mode = #tpu.pipeline_mode<synchronous>, transform_indices = @transform_7, window_bounds = array<i64: 1024, 32>}, {pipeline_mode = #tpu.pipeline_mode<synchronous>, transform_indices = @transform_8, window_bounds = array<i64: 1, 32>}, {pipeline_mode = #tpu.pipeline_mode<synchronous>, transform_indices = @transform_9, window_bounds = array<i64: 32, 3>}, {pipeline_mode = #tpu.pipeline_mode<synchronous>, transform_indices = @transform_10, window_bounds = array<i64: 1, 3>}, {transform_indices = @transform_11, window_bounds = array<i64: 1, 1, 3>}]} {
    %c0 = arith.constant 0 : index
    %c0_0 = arith.constant 0 : index
    %c0_1 = arith.constant 0 : index
    %c0_2 = arith.constant 0 : index
    %0 = vector.load %arg1[%c0, %c0_0, %c0_1, %c0_2] : memref<1x8x8x1xf32, #tpu.memory_space<vmem>>, vector<1x8x8x1xf32>
    %1 = vector.shape_cast %0 : vector<1x8x8x1xf32> to vector<8x8x1xf32>
    %cst = arith.constant 0.000000e+00 : f32
    %2 = vector.broadcast %cst : f32 to vector<10x10x1xf32>
    %c0_3 = arith.constant 0 : index
    %c0_4 = arith.constant 0 : index
    %c0_5 = arith.constant 0 : index
    %3 = vector.load %arg13[%c0_3, %c0_4, %c0_5] : memref<10x10x1xf32, #tpu.memory_space<vmem>>, vector<10x10x1xf32>
    tpu.vector_store %arg13[%c0_3, %c0_4, %c0_5], %2 {strides = array<i32>} : memref<10x10x1xf32, #tpu.memory_space<vmem>>, vector<10x10x1xf32>,
    %c1 = arith.constant 1 : index
    %c1_6 = arith.constant 1 : index
    %c0_7 = arith.constant 0 : index
    %4 = vector.load %arg13[%c1, %c1_6, %c0_7] : memref<10x10x1xf32, #tpu.memory_space<vmem>>, vector<8x8x1xf32>
    tpu.vector_store %arg13[%c1, %c1_6, %c0_7], %1 {strides = array<i32>} : memref<10x10x1xf32, #tpu.memory_space<vmem>>, vector<8x8x1xf32>,
    %cst_8 = arith.constant 0.000000e+00 : f32
    %5 = vector.broadcast %cst_8 : f32 to vector<64x4xf32>
    %c0_9 = arith.constant 0 : index
    %c0_10 = arith.constant 0 : index
    %c0_11 = arith.constant 0 : index
    %6 = vector.load %arg13[%c0_9, %c0_10, %c0_11] : memref<10x10x1xf32, #tpu.memory_space<vmem>>, vector<8x8x1xf32>
    %7 = vector.shape_cast %6 : vector<8x8x1xf32> to vector<64x1xf32>
    %c0_12 = arith.constant 0 : index
    %c0_13 = arith.constant 0 : index
    %c0_14 = arith.constant 0 : index
    %8 = vector.load %arg2[%c0_12, %c0_13, %c0_14] : memref<9x1x4xf32, #tpu.memory_space<vmem>>, vector<1x1x4xf32>
    %9 = vector.shape_cast %8 : vector<1x1x4xf32> to vector<1x4xf32>
    %cst_15 = arith.constant dense<0.000000e+00> : vector<64x4xf32>
    %10 = tpu.matmul %7, %9, %cst_15 {dimension_numbers = #tpu.dot_dimension_numbers<[1], [0], [0], [1], [0, 0, 1, 1], [], []>} : vector<64x1xf32>, vector<1x4xf32>, vector<64x4xf32> -> vector<64x4xf32>
    %11 = arith.addf %5, %10 : vector<64x4xf32>
    %c0_16 = arith.constant 0 : index
    %c1_17 = arith.constant 1 : index
    %c0_18 = arith.constant 0 : index
    %12 = vector.load %arg13[%c0_16, %c1_17, %c0_18] : memref<10x10x1xf32, #tpu.memory_space<vmem>>, vector<8x8x1xf32>
    %13 = vector.shape_cast %12 : vector<8x8x1xf32> to vector<64x1xf32>
    %c1_19 = arith.constant 1 : index
    %c0_20 = arith.constant 0 : index
    %c0_21 = arith.constant 0 : index
    %14 = vector.load %arg2[%c1_19, %c0_20, %c0_21] : memref<9x1x4xf32, #tpu.memory_space<vmem>>, vector<1x1x4xf32>
    %15 = vector.shape_cast %14 : vector<1x1x4xf32> to vector<1x4xf32>
    %cst_22 = arith.constant dense<0.000000e+00> : vector<64x4xf32>
    %16 = tpu.matmul %13, %15, %cst_22 {dimension_numbers = #tpu.dot_dimension_numbers<[1], [0], [0], [1], [0, 0, 1, 1], [], []>} : vector<64x1xf32>, vector<1x4xf32>, vector<64x4xf32> -> vector<64x4xf32>
    %17 = arith.addf %11, %16 : vector<64x4xf32>
    %c0_23 = arith.constant 0 : index
    %c2 = arith.constant 2 : index
    %c0_24 = arith.constant 0 : index
    %18 = vector.load %arg13[%c0_23, %c2, %c0_24] : memref<10x10x1xf32, #tpu.memory_space<vmem>>, vector<8x8x1xf32>
    %19 = vector.shape_cast %18 : vector<8x8x1xf32> to vector<64x1xf32>
    %c2_25 = arith.constant 2 : index
    %c0_26 = arith.constant 0 : index
    %c0_27 = arith.constant 0 : index
    %20 = vector.load %arg2[%c2_25, %c0_26, %c0_27] : memref<9x1x4xf32, #tpu.memory_space<vmem>>, vector<1x1x4xf32>
    %21 = vector.shape_cast %20 : vector<1x1x4xf32> to vector<1x4xf32>
    %cst_28 = arith.constant dense<0.000000e+00> : vector<64x4xf32>
    %22 = tpu.matmul %19, %21, %cst_28 {dimension_numbers = #tpu.dot_dimension_numbers<[1], [0], [0], [1], [0, 0, 1, 1], [], []>} : vector<64x1xf32>, vector<1x4xf32>, vector<64x4xf32> -> vector<64x4xf32>
    %23 = arith.addf %17, %22 : vector<64x4xf32>
    %c1_29 = arith.constant 1 : index
    %c0_30 = arith.constant 0 : index
    %c0_31 = arith.constant 0 : index
    %24 = vector.load %arg13[%c1_29, %c0_30, %c0_31] : memref<10x10x1xf32, #tpu.memory_space<vmem>>, vector<8x8x1xf32>
    %25 = vector.shape_cast %24 : vector<8x8x1xf32> to vector<64x1xf32>
    %c3 = arith.constant 3 : index
    %c0_32 = arith.constant 0 : index
    %c0_33 = arith.constant 0 : index
    %26 = vector.load %arg2[%c3, %c0_32, %c0_33] : memref<9x1x4xf32, #tpu.memory_space<vmem>>, vector<1x1x4xf32>
    %27 = vector.shape_cast %26 : vector<1x1x4xf32> to vector<1x4xf32>
    %cst_34 = arith.constant dense<0.000000e+00> : vector<64x4xf32>
    %28 = tpu.matmul %25, %27, %cst_34 {dimension_numbers = #tpu.dot_dimension_numbers<[1], [0], [0], [1], [0, 0, 1, 1], [], []>} : vector<64x1xf32>, vector<1x4xf32>, vector<64x4xf32> -> vector<64x4xf32>
    %29 = arith.addf %23, %28 : vector<64x4xf32>
    %c1_35 = arith.constant 1 : index
    %c1_36 = arith.constant 1 : index
    %c0_37 = arith.constant 0 : index
    %30 = vector.load %arg13[%c1_35, %c1_36, %c0_37] : memref<10x10x1xf32, #tpu.memory_space<vmem>>, vector<8x8x1xf32>
    %31 = vector.shape_cast %30 : vector<8x8x1xf32> to vector<64x1xf32>
    %c4 = arith.constant 4 : index
    %c0_38 = arith.constant 0 : index
    %c0_39 = arith.constant 0 : index
    %32 = vector.load %arg2[%c4, %c0_38, %c0_39] : memref<9x1x4xf32, #tpu.memory_space<vmem>>, vector<1x1x4xf32>
    %33 = vector.shape_cast %32 : vector<1x1x4xf32> to vector<1x4xf32>
    %cst_40 = arith.constant dense<0.000000e+00> : vector<64x4xf32>
    %34 = tpu.matmul %31, %33, %cst_40 {dimension_numbers = #tpu.dot_dimension_numbers<[1], [0], [0], [1], [0, 0, 1, 1], [], []>} : vector<64x1xf32>, vector<1x4xf32>, vector<64x4xf32> -> vector<64x4xf32>
    %35 = arith.addf %29, %34 : vector<64x4xf32>
    %c1_41 = arith.constant 1 : index
    %c2_42 = arith.constant 2 : index
    %c0_43 = arith.constant 0 : index
    %36 = vector.load %arg13[%c1_41, %c2_42, %c0_43] : memref<10x10x1xf32, #tpu.memory_space<vmem>>, vector<8x8x1xf32>
    %37 = vector.shape_cast %36 : vector<8x8x1xf32> to vector<64x1xf32>
    %c5 = arith.constant 5 : index
    %c0_44 = arith.constant 0 : index
    %c0_45 = arith.constant 0 : index
    %38 = vector.load %arg2[%c5, %c0_44, %c0_45] : memref<9x1x4xf32, #tpu.memory_space<vmem>>, vector<1x1x4xf32>
    %39 = vector.shape_cast %38 : vector<1x1x4xf32> to vector<1x4xf32>
    %cst_46 = arith.constant dense<0.000000e+00> : vector<64x4xf32>
    %40 = tpu.matmul %37, %39, %cst_46 {dimension_numbers = #tpu.dot_dimension_numbers<[1], [0], [0], [1], [0, 0, 1, 1], [], []>} : vector<64x1xf32>, vector<1x4xf32>, vector<64x4xf32> -> vector<64x4xf32>
    %41 = arith.addf %35, %40 : vector<64x4xf32>
    %c2_47 = arith.constant 2 : index
    %c0_48 = arith.constant 0 : index
    %c0_49 = arith.constant 0 : index
    %42 = vector.load %arg13[%c2_47, %c0_48, %c0_49] : memref<10x10x1xf32, #tpu.memory_space<vmem>>, vector<8x8x1xf32>
    %43 = vector.shape_cast %42 : vector<8x8x1xf32> to vector<64x1xf32>
    %c6 = arith.constant 6 : index
    %c0_50 = arith.constant 0 : index
    %c0_51 = arith.constant 0 : index
    %44 = vector.load %arg2[%c6, %c0_50, %c0_51] : memref<9x1x4xf32, #tpu.memory_space<vmem>>, vector<1x1x4xf32>
    %45 = vector.shape_cast %44 : vector<1x1x4xf32> to vector<1x4xf32>
    %cst_52 = arith.constant dense<0.000000e+00> : vector<64x4xf32>
    %46 = tpu.matmul %43, %45, %cst_52 {dimension_numbers = #tpu.dot_dimension_numbers<[1], [0], [0], [1], [0, 0, 1, 1], [], []>} : vector<64x1xf32>, vector<1x4xf32>, vector<64x4xf32> -> vector<64x4xf32>
    %47 = arith.addf %41, %46 : vector<64x4xf32>
    %c2_53 = arith.constant 2 : index
    %c1_54 = arith.constant 1 : index
    %c0_55 = arith.constant 0 : index
    %48 = vector.load %arg13[%c2_53, %c1_54, %c0_55] : memref<10x10x1xf32, #tpu.memory_space<vmem>>, vector<8x8x1xf32>
    %49 = vector.shape_cast %48 : vector<8x8x1xf32> to vector<64x1xf32>
    %c7 = arith.constant 7 : index
    %c0_56 = arith.constant 0 : index
    %c0_57 = arith.constant 0 : index
    %50 = vector.load %arg2[%c7, %c0_56, %c0_57] : memref<9x1x4xf32, #tpu.memory_space<vmem>>, vector<1x1x4xf32>
    %51 = vector.shape_cast %50 : vector<1x1x4xf32> to vector<1x4xf32>
    %cst_58 = arith.constant dense<0.000000e+00> : vector<64x4xf32>
    %52 = tpu.matmul %49, %51, %cst_58 {dimension_numbers = #tpu.dot_dimension_numbers<[1], [0], [0], [1], [0, 0, 1, 1], [], []>} : vector<64x1xf32>, vector<1x4xf32>, vector<64x4xf32> -> vector<64x4xf32>
    %53 = arith.addf %47, %52 : vector<64x4xf32>
    %c2_59 = arith.constant 2 : index
    %c2_60 = arith.constant 2 : index
    %c0_61 = arith.constant 0 : index
    %54 = vector.load %arg13[%c2_59, %c2_60, %c0_61] : memref<10x10x1xf32, #tpu.memory_space<vmem>>, vector<8x8x1xf32>
    %55 = vector.shape_cast %54 : vector<8x8x1xf32> to vector<64x1xf32>
    %c8 = arith.constant 8 : index
    %c0_62 = arith.constant 0 : index
    %c0_63 = arith.constant 0 : index
    %56 = vector.load %arg2[%c8, %c0_62, %c0_63] : memref<9x1x4xf32, #tpu.memory_space<vmem>>, vector<1x1x4xf32>
    %57 = vector.shape_cast %56 : vector<1x1x4xf32> to vector<1x4xf32>
    %cst_64 = arith.constant dense<0.000000e+00> : vector<64x4xf32>
    %58 = tpu.matmul %55, %57, %cst_64 {dimension_numbers = #tpu.dot_dimension_numbers<[1], [0], [0], [1], [0, 0, 1, 1], [], []>} : vector<64x1xf32>, vector<1x4xf32>, vector<64x4xf32> -> vector<64x4xf32>
    %59 = arith.addf %53, %58 : vector<64x4xf32>
    %c0_65 = arith.constant 0 : index
    %c0_66 = arith.constant 0 : index
    %60 = vector.load %arg3[%c0_65, %c0_66] : memref<1x4xf32, #tpu.memory_space<vmem>>, vector<1x4xf32>
    %61 = vector.broadcast %60 : vector<1x4xf32> to vector<64x4xf32>
    %62 = arith.addf %59, %61 : vector<64x4xf32>
    %cst_67 = arith.constant 0.000000e+00 : f32
    %63 = vector.broadcast %cst_67 : f32 to vector<64x4xf32>
    %64 = arith.maximumf %62, %63 : vector<64x4xf32>
    %65 = vector.shape_cast %64 : vector<64x4xf32> to vector<8x8x4xf32>
    %cst_68 = arith.constant 0.000000e+00 : f32
    %66 = vector.broadcast %cst_68 : f32 to vector<10x10x4xf32>
    %c0_69 = arith.constant 0 : index
    %c0_70 = arith.constant 0 : index
    %c0_71 = arith.constant 0 : index
    %67 = vector.load %arg14[%c0_69, %c0_70, %c0_71] : memref<10x10x4xf32, #tpu.memory_space<vmem>>, vector<10x10x4xf32>
    tpu.vector_store %arg14[%c0_69, %c0_70, %c0_71], %66 {strides = array<i32>} : memref<10x10x4xf32, #tpu.memory_space<vmem>>, vector<10x10x4xf32>,
    %c1_72 = arith.constant 1 : index
    %c1_73 = arith.constant 1 : index
    %c0_74 = arith.constant 0 : index
    %68 = vector.load %arg14[%c1_72, %c1_73, %c0_74] : memref<10x10x4xf32, #tpu.memory_space<vmem>>, vector<8x8x4xf32>
    tpu.vector_store %arg14[%c1_72, %c1_73, %c0_74], %65 {strides = array<i32>} : memref<10x10x4xf32, #tpu.memory_space<vmem>>, vector<8x8x4xf32>,
    %cst_75 = arith.constant 0.000000e+00 : f32
    %69 = vector.broadcast %cst_75 : f32 to vector<64x16xf32>
    %c0_76 = arith.constant 0 : index
    %c0_77 = arith.constant 0 : index
    %c0_78 = arith.constant 0 : index
    %70 = vector.load %arg14[%c0_76, %c0_77, %c0_78] : memref<10x10x4xf32, #tpu.memory_space<vmem>>, vector<8x8x4xf32>
    %71 = vector.shape_cast %70 : vector<8x8x4xf32> to vector<64x4xf32>
    %c0_79 = arith.constant 0 : index
    %c0_80 = arith.constant 0 : index
    %c0_81 = arith.constant 0 : index
    %72 = vector.load %arg4[%c0_79, %c0_80, %c0_81] : memref<9x4x16xf32, #tpu.memory_space<vmem>>, vector<1x4x16xf32>
    %73 = vector.shape_cast %72 : vector<1x4x16xf32> to vector<4x16xf32>
    %cst_82 = arith.constant dense<0.000000e+00> : vector<64x16xf32>
    %74 = tpu.matmul %71, %73, %cst_82 {dimension_numbers = #tpu.dot_dimension_numbers<[1], [0], [0], [1], [0, 0, 1, 1], [], []>} : vector<64x4xf32>, vector<4x16xf32>, vector<64x16xf32> -> vector<64x16xf32>
    %75 = arith.addf %69, %74 : vector<64x16xf32>
    %c0_83 = arith.constant 0 : index
    %c1_84 = arith.constant 1 : index
    %c0_85 = arith.constant 0 : index
    %76 = vector.load %arg14[%c0_83, %c1_84, %c0_85] : memref<10x10x4xf32, #tpu.memory_space<vmem>>, vector<8x8x4xf32>
    %77 = vector.shape_cast %76 : vector<8x8x4xf32> to vector<64x4xf32>
    %c1_86 = arith.constant 1 : index
    %c0_87 = arith.constant 0 : index
    %c0_88 = arith.constant 0 : index
    %78 = vector.load %arg4[%c1_86, %c0_87, %c0_88] : memref<9x4x16xf32, #tpu.memory_space<vmem>>, vector<1x4x16xf32>
    %79 = vector.shape_cast %78 : vector<1x4x16xf32> to vector<4x16xf32>
    %cst_89 = arith.constant dense<0.000000e+00> : vector<64x16xf32>
    %80 = tpu.matmul %77, %79, %cst_89 {dimension_numbers = #tpu.dot_dimension_numbers<[1], [0], [0], [1], [0, 0, 1, 1], [], []>} : vector<64x4xf32>, vector<4x16xf32>, vector<64x16xf32> -> vector<64x16xf32>
    %81 = arith.addf %75, %80 : vector<64x16xf32>
    %c0_90 = arith.constant 0 : index
    %c2_91 = arith.constant 2 : index
    %c0_92 = arith.constant 0 : index
    %82 = vector.load %arg14[%c0_90, %c2_91, %c0_92] : memref<10x10x4xf32, #tpu.memory_space<vmem>>, vector<8x8x4xf32>
    %83 = vector.shape_cast %82 : vector<8x8x4xf32> to vector<64x4xf32>
    %c2_93 = arith.constant 2 : index
    %c0_94 = arith.constant 0 : index
    %c0_95 = arith.constant 0 : index
    %84 = vector.load %arg4[%c2_93, %c0_94, %c0_95] : memref<9x4x16xf32, #tpu.memory_space<vmem>>, vector<1x4x16xf32>
    %85 = vector.shape_cast %84 : vector<1x4x16xf32> to vector<4x16xf32>
    %cst_96 = arith.constant dense<0.000000e+00> : vector<64x16xf32>
    %86 = tpu.matmul %83, %85, %cst_96 {dimension_numbers = #tpu.dot_dimension_numbers<[1], [0], [0], [1], [0, 0, 1, 1], [], []>} : vector<64x4xf32>, vector<4x16xf32>, vector<64x16xf32> -> vector<64x16xf32>
    %87 = arith.addf %81, %86 : vector<64x16xf32>
    %c1_97 = arith.constant 1 : index
    %c0_98 = arith.constant 0 : index
    %c0_99 = arith.constant 0 : index
    %88 = vector.load %arg14[%c1_97, %c0_98, %c0_99] : memref<10x10x4xf32, #tpu.memory_space<vmem>>, vector<8x8x4xf32>
    %89 = vector.shape_cast %88 : vector<8x8x4xf32> to vector<64x4xf32>
    %c3_100 = arith.constant 3 : index
    %c0_101 = arith.constant 0 : index
    %c0_102 = arith.constant 0 : index
    %90 = vector.load %arg4[%c3_100, %c0_101, %c0_102] : memref<9x4x16xf32, #tpu.memory_space<vmem>>, vector<1x4x16xf32>
    %91 = vector.shape_cast %90 : vector<1x4x16xf32> to vector<4x16xf32>
    %cst_103 = arith.constant dense<0.000000e+00> : vector<64x16xf32>
    %92 = tpu.matmul %89, %91, %cst_103 {dimension_numbers = #tpu.dot_dimension_numbers<[1], [0], [0], [1], [0, 0, 1, 1], [], []>} : vector<64x4xf32>, vector<4x16xf32>, vector<64x16xf32> -> vector<64x16xf32>
    %93 = arith.addf %87, %92 : vector<64x16xf32>
    %c1_104 = arith.constant 1 : index
    %c1_105 = arith.constant 1 : index
    %c0_106 = arith.constant 0 : index
    %94 = vector.load %arg14[%c1_104, %c1_105, %c0_106] : memref<10x10x4xf32, #tpu.memory_space<vmem>>, vector<8x8x4xf32>
    %95 = vector.shape_cast %94 : vector<8x8x4xf32> to vector<64x4xf32>
    %c4_107 = arith.constant 4 : index
    %c0_108 = arith.constant 0 : index
    %c0_109 = arith.constant 0 : index
    %96 = vector.load %arg4[%c4_107, %c0_108, %c0_109] : memref<9x4x16xf32, #tpu.memory_space<vmem>>, vector<1x4x16xf32>
    %97 = vector.shape_cast %96 : vector<1x4x16xf32> to vector<4x16xf32>
    %cst_110 = arith.constant dense<0.000000e+00> : vector<64x16xf32>
    %98 = tpu.matmul %95, %97, %cst_110 {dimension_numbers = #tpu.dot_dimension_numbers<[1], [0], [0], [1], [0, 0, 1, 1], [], []>} : vector<64x4xf32>, vector<4x16xf32>, vector<64x16xf32> -> vector<64x16xf32>
    %99 = arith.addf %93, %98 : vector<64x16xf32>
    %c1_111 = arith.constant 1 : index
    %c2_112 = arith.constant 2 : index
    %c0_113 = arith.constant 0 : index
    %100 = vector.load %arg14[%c1_111, %c2_112, %c0_113] : memref<10x10x4xf32, #tpu.memory_space<vmem>>, vector<8x8x4xf32>
    %101 = vector.shape_cast %100 : vector<8x8x4xf32> to vector<64x4xf32>
    %c5_114 = arith.constant 5 : index
    %c0_115 = arith.constant 0 : index
    %c0_116 = arith.constant 0 : index
    %102 = vector.load %arg4[%c5_114, %c0_115, %c0_116] : memref<9x4x16xf32, #tpu.memory_space<vmem>>, vector<1x4x16xf32>
    %103 = vector.shape_cast %102 : vector<1x4x16xf32> to vector<4x16xf32>
    %cst_117 = arith.constant dense<0.000000e+00> : vector<64x16xf32>
    %104 = tpu.matmul %101, %103, %cst_117 {dimension_numbers = #tpu.dot_dimension_numbers<[1], [0], [0], [1], [0, 0, 1, 1], [], []>} : vector<64x4xf32>, vector<4x16xf32>, vector<64x16xf32> -> vector<64x16xf32>
    %105 = arith.addf %99, %104 : vector<64x16xf32>
    %c2_118 = arith.constant 2 : index
    %c0_119 = arith.constant 0 : index
    %c0_120 = arith.constant 0 : index
    %106 = vector.load %arg14[%c2_118, %c0_119, %c0_120] : memref<10x10x4xf32, #tpu.memory_space<vmem>>, vector<8x8x4xf32>
    %107 = vector.shape_cast %106 : vector<8x8x4xf32> to vector<64x4xf32>
    %c6_121 = arith.constant 6 : index
    %c0_122 = arith.constant 0 : index
    %c0_123 = arith.constant 0 : index
    %108 = vector.load %arg4[%c6_121, %c0_122, %c0_123] : memref<9x4x16xf32, #tpu.memory_space<vmem>>, vector<1x4x16xf32>
    %109 = vector.shape_cast %108 : vector<1x4x16xf32> to vector<4x16xf32>
    %cst_124 = arith.constant dense<0.000000e+00> : vector<64x16xf32>
    %110 = tpu.matmul %107, %109, %cst_124 {dimension_numbers = #tpu.dot_dimension_numbers<[1], [0], [0], [1], [0, 0, 1, 1], [], []>} : vector<64x4xf32>, vector<4x16xf32>, vector<64x16xf32> -> vector<64x16xf32>
    %111 = arith.addf %105, %110 : vector<64x16xf32>
    %c2_125 = arith.constant 2 : index
    %c1_126 = arith.constant 1 : index
    %c0_127 = arith.constant 0 : index
    %112 = vector.load %arg14[%c2_125, %c1_126, %c0_127] : memref<10x10x4xf32, #tpu.memory_space<vmem>>, vector<8x8x4xf32>
    %113 = vector.shape_cast %112 : vector<8x8x4xf32> to vector<64x4xf32>
    %c7_128 = arith.constant 7 : index
    %c0_129 = arith.constant 0 : index
    %c0_130 = arith.constant 0 : index
    %114 = vector.load %arg4[%c7_128, %c0_129, %c0_130] : memref<9x4x16xf32, #tpu.memory_space<vmem>>, vector<1x4x16xf32>
    %115 = vector.shape_cast %114 : vector<1x4x16xf32> to vector<4x16xf32>
    %cst_131 = arith.constant dense<0.000000e+00> : vector<64x16xf32>
    %116 = tpu.matmul %113, %115, %cst_131 {dimension_numbers = #tpu.dot_dimension_numbers<[1], [0], [0], [1], [0, 0, 1, 1], [], []>} : vector<64x4xf32>, vector<4x16xf32>, vector<64x16xf32> -> vector<64x16xf32>
    %117 = arith.addf %111, %116 : vector<64x16xf32>
    %c2_132 = arith.constant 2 : index
    %c2_133 = arith.constant 2 : index
    %c0_134 = arith.constant 0 : index
    %118 = vector.load %arg14[%c2_132, %c2_133, %c0_134] : memref<10x10x4xf32, #tpu.memory_space<vmem>>, vector<8x8x4xf32>
    %119 = vector.shape_cast %118 : vector<8x8x4xf32> to vector<64x4xf32>
    %c8_135 = arith.constant 8 : index
    %c0_136 = arith.constant 0 : index
    %c0_137 = arith.constant 0 : index
    %120 = vector.load %arg4[%c8_135, %c0_136, %c0_137] : memref<9x4x16xf32, #tpu.memory_space<vmem>>, vector<1x4x16xf32>
    %121 = vector.shape_cast %120 : vector<1x4x16xf32> to vector<4x16xf32>
    %cst_138 = arith.constant dense<0.000000e+00> : vector<64x16xf32>
    %122 = tpu.matmul %119, %121, %cst_138 {dimension_numbers = #tpu.dot_dimension_numbers<[1], [0], [0], [1], [0, 0, 1, 1], [], []>} : vector<64x4xf32>, vector<4x16xf32>, vector<64x16xf32> -> vector<64x16xf32>
    %123 = arith.addf %117, %122 : vector<64x16xf32>
    %c0_139 = arith.constant 0 : index
    %c0_140 = arith.constant 0 : index
    %124 = vector.load %arg5[%c0_139, %c0_140] : memref<1x16xf32, #tpu.memory_space<vmem>>, vector<1x16xf32>
    %125 = vector.broadcast %124 : vector<1x16xf32> to vector<64x16xf32>
    %126 = arith.addf %123, %125 : vector<64x16xf32>
    %cst_141 = arith.constant 0.000000e+00 : f32
    %127 = vector.broadcast %cst_141 : f32 to vector<64x16xf32>
    %128 = arith.maximumf %126, %127 : vector<64x16xf32>
    %129 = vector.shape_cast %128 : vector<64x16xf32> to vector<8x8x16xf32>
    %cst_142 = arith.constant 0.000000e+00 : f32
    %130 = vector.broadcast %cst_142 : f32 to vector<10x10x16xf32>
    %c0_143 = arith.constant 0 : index
    %c0_144 = arith.constant 0 : index
    %c0_145 = arith.constant 0 : index
    %131 = vector.load %arg15[%c0_143, %c0_144, %c0_145] : memref<10x10x16xf32, #tpu.memory_space<vmem>>, vector<10x10x16xf32>
    tpu.vector_store %arg15[%c0_143, %c0_144, %c0_145], %130 {strides = array<i32>} : memref<10x10x16xf32, #tpu.memory_space<vmem>>, vector<10x10x16xf32>,
    %c1_146 = arith.constant 1 : index
    %c1_147 = arith.constant 1 : index
    %c0_148 = arith.constant 0 : index
    %132 = vector.load %arg15[%c1_146, %c1_147, %c0_148] : memref<10x10x16xf32, #tpu.memory_space<vmem>>, vector<8x8x16xf32>
    tpu.vector_store %arg15[%c1_146, %c1_147, %c0_148], %129 {strides = array<i32>} : memref<10x10x16xf32, #tpu.memory_space<vmem>>, vector<8x8x16xf32>,
    %cst_149 = arith.constant 0.000000e+00 : f32
    %133 = vector.broadcast %cst_149 : f32 to vector<64x64xf32>
    %c0_150 = arith.constant 0 : index
    %c0_151 = arith.constant 0 : index
    %c0_152 = arith.constant 0 : index
    %134 = vector.load %arg15[%c0_150, %c0_151, %c0_152] : memref<10x10x16xf32, #tpu.memory_space<vmem>>, vector<8x8x16xf32>
    %135 = vector.shape_cast %134 : vector<8x8x16xf32> to vector<64x16xf32>
    %c0_153 = arith.constant 0 : index
    %c0_154 = arith.constant 0 : index
    %c0_155 = arith.constant 0 : index
    %136 = vector.load %arg6[%c0_153, %c0_154, %c0_155] : memref<9x16x64xf32, #tpu.memory_space<vmem>>, vector<1x16x64xf32>
    %137 = vector.shape_cast %136 : vector<1x16x64xf32> to vector<16x64xf32>
    %cst_156 = arith.constant dense<0.000000e+00> : vector<64x64xf32>
    %138 = tpu.matmul %135, %137, %cst_156 {dimension_numbers = #tpu.dot_dimension_numbers<[1], [0], [0], [1], [0, 0, 1, 1], [], []>} : vector<64x16xf32>, vector<16x64xf32>, vector<64x64xf32> -> vector<64x64xf32>
    %139 = arith.addf %133, %138 : vector<64x64xf32>
    %c0_157 = arith.constant 0 : index
    %c1_158 = arith.constant 1 : index
    %c0_159 = arith.constant 0 : index
    %140 = vector.load %arg15[%c0_157, %c1_158, %c0_159] : memref<10x10x16xf32, #tpu.memory_space<vmem>>, vector<8x8x16xf32>
    %141 = vector.shape_cast %140 : vector<8x8x16xf32> to vector<64x16xf32>
    %c1_160 = arith.constant 1 : index
    %c0_161 = arith.constant 0 : index
    %c0_162 = arith.constant 0 : index
    %142 = vector.load %arg6[%c1_160, %c0_161, %c0_162] : memref<9x16x64xf32, #tpu.memory_space<vmem>>, vector<1x16x64xf32>
    %143 = vector.shape_cast %142 : vector<1x16x64xf32> to vector<16x64xf32>
    %cst_163 = arith.constant dense<0.000000e+00> : vector<64x64xf32>
    %144 = tpu.matmul %141, %143, %cst_163 {dimension_numbers = #tpu.dot_dimension_numbers<[1], [0], [0], [1], [0, 0, 1, 1], [], []>} : vector<64x16xf32>, vector<16x64xf32>, vector<64x64xf32> -> vector<64x64xf32>
    %145 = arith.addf %139, %144 : vector<64x64xf32>
    %c0_164 = arith.constant 0 : index
    %c2_165 = arith.constant 2 : index
    %c0_166 = arith.constant 0 : index
    %146 = vector.load %arg15[%c0_164, %c2_165, %c0_166] : memref<10x10x16xf32, #tpu.memory_space<vmem>>, vector<8x8x16xf32>
    %147 = vector.shape_cast %146 : vector<8x8x16xf32> to vector<64x16xf32>
    %c2_167 = arith.constant 2 : index
    %c0_168 = arith.constant 0 : index
    %c0_169 = arith.constant 0 : index
    %148 = vector.load %arg6[%c2_167, %c0_168, %c0_169] : memref<9x16x64xf32, #tpu.memory_space<vmem>>, vector<1x16x64xf32>
    %149 = vector.shape_cast %148 : vector<1x16x64xf32> to vector<16x64xf32>
    %cst_170 = arith.constant dense<0.000000e+00> : vector<64x64xf32>
    %150 = tpu.matmul %147, %149, %cst_170 {dimension_numbers = #tpu.dot_dimension_numbers<[1], [0], [0], [1], [0, 0, 1, 1], [], []>} : vector<64x16xf32>, vector<16x64xf32>, vector<64x64xf32> -> vector<64x64xf32>
    %151 = arith.addf %145, %150 : vector<64x64xf32>
    %c1_171 = arith.constant 1 : index
    %c0_172 = arith.constant 0 : index
    %c0_173 = arith.constant 0 : index
    %152 = vector.load %arg15[%c1_171, %c0_172, %c0_173] : memref<10x10x16xf32, #tpu.memory_space<vmem>>, vector<8x8x16xf32>
    %153 = vector.shape_cast %152 : vector<8x8x16xf32> to vector<64x16xf32>
    %c3_174 = arith.constant 3 : index
    %c0_175 = arith.constant 0 : index
    %c0_176 = arith.constant 0 : index
    %154 = vector.load %arg6[%c3_174, %c0_175, %c0_176] : memref<9x16x64xf32, #tpu.memory_space<vmem>>, vector<1x16x64xf32>
    %155 = vector.shape_cast %154 : vector<1x16x64xf32> to vector<16x64xf32>
    %cst_177 = arith.constant dense<0.000000e+00> : vector<64x64xf32>
    %156 = tpu.matmul %153, %155, %cst_177 {dimension_numbers = #tpu.dot_dimension_numbers<[1], [0], [0], [1], [0, 0, 1, 1], [], []>} : vector<64x16xf32>, vector<16x64xf32>, vector<64x64xf32> -> vector<64x64xf32>
    %157 = arith.addf %151, %156 : vector<64x64xf32>
    %c1_178 = arith.constant 1 : index
    %c1_179 = arith.constant 1 : index
    %c0_180 = arith.constant 0 : index
    %158 = vector.load %arg15[%c1_178, %c1_179, %c0_180] : memref<10x10x16xf32, #tpu.memory_space<vmem>>, vector<8x8x16xf32>
    %159 = vector.shape_cast %158 : vector<8x8x16xf32> to vector<64x16xf32>
    %c4_181 = arith.constant 4 : index
    %c0_182 = arith.constant 0 : index
    %c0_183 = arith.constant 0 : index
    %160 = vector.load %arg6[%c4_181, %c0_182, %c0_183] : memref<9x16x64xf32, #tpu.memory_space<vmem>>, vector<1x16x64xf32>
    %161 = vector.shape_cast %160 : vector<1x16x64xf32> to vector<16x64xf32>
    %cst_184 = arith.constant dense<0.000000e+00> : vector<64x64xf32>
    %162 = tpu.matmul %159, %161, %cst_184 {dimension_numbers = #tpu.dot_dimension_numbers<[1], [0], [0], [1], [0, 0, 1, 1], [], []>} : vector<64x16xf32>, vector<16x64xf32>, vector<64x64xf32> -> vector<64x64xf32>
    %163 = arith.addf %157, %162 : vector<64x64xf32>
    %c1_185 = arith.constant 1 : index
    %c2_186 = arith.constant 2 : index
    %c0_187 = arith.constant 0 : index
    %164 = vector.load %arg15[%c1_185, %c2_186, %c0_187] : memref<10x10x16xf32, #tpu.memory_space<vmem>>, vector<8x8x16xf32>
    %165 = vector.shape_cast %164 : vector<8x8x16xf32> to vector<64x16xf32>
    %c5_188 = arith.constant 5 : index
    %c0_189 = arith.constant 0 : index
    %c0_190 = arith.constant 0 : index
    %166 = vector.load %arg6[%c5_188, %c0_189, %c0_190] : memref<9x16x64xf32, #tpu.memory_space<vmem>>, vector<1x16x64xf32>
    %167 = vector.shape_cast %166 : vector<1x16x64xf32> to vector<16x64xf32>
    %cst_191 = arith.constant dense<0.000000e+00> : vector<64x64xf32>
    %168 = tpu.matmul %165, %167, %cst_191 {dimension_numbers = #tpu.dot_dimension_numbers<[1], [0], [0], [1], [0, 0, 1, 1], [], []>} : vector<64x16xf32>, vector<16x64xf32>, vector<64x64xf32> -> vector<64x64xf32>
    %169 = arith.addf %163, %168 : vector<64x64xf32>
    %c2_192 = arith.constant 2 : index
    %c0_193 = arith.constant 0 : index
    %c0_194 = arith.constant 0 : index
    %170 = vector.load %arg15[%c2_192, %c0_193, %c0_194] : memref<10x10x16xf32, #tpu.memory_space<vmem>>, vector<8x8x16xf32>
    %171 = vector.shape_cast %170 : vector<8x8x16xf32> to vector<64x16xf32>
    %c6_195 = arith.constant 6 : index
    %c0_196 = arith.constant 0 : index
    %c0_197 = arith.constant 0 : index
    %172 = vector.load %arg6[%c6_195, %c0_196, %c0_197] : memref<9x16x64xf32, #tpu.memory_space<vmem>>, vector<1x16x64xf32>
    %173 = vector.shape_cast %172 : vector<1x16x64xf32> to vector<16x64xf32>
    %cst_198 = arith.constant dense<0.000000e+00> : vector<64x64xf32>
    %174 = tpu.matmul %171, %173, %cst_198 {dimension_numbers = #tpu.dot_dimension_numbers<[1], [0], [0], [1], [0, 0, 1, 1], [], []>} : vector<64x16xf32>, vector<16x64xf32>, vector<64x64xf32> -> vector<64x64xf32>
    %175 = arith.addf %169, %174 : vector<64x64xf32>
    %c2_199 = arith.constant 2 : index
    %c1_200 = arith.constant 1 : index
    %c0_201 = arith.constant 0 : index
    %176 = vector.load %arg15[%c2_199, %c1_200, %c0_201] : memref<10x10x16xf32, #tpu.memory_space<vmem>>, vector<8x8x16xf32>
    %177 = vector.shape_cast %176 : vector<8x8x16xf32> to vector<64x16xf32>
    %c7_202 = arith.constant 7 : index
    %c0_203 = arith.constant 0 : index
    %c0_204 = arith.constant 0 : index
    %178 = vector.load %arg6[%c7_202, %c0_203, %c0_204] : memref<9x16x64xf32, #tpu.memory_space<vmem>>, vector<1x16x64xf32>
    %179 = vector.shape_cast %178 : vector<1x16x64xf32> to vector<16x64xf32>
    %cst_205 = arith.constant dense<0.000000e+00> : vector<64x64xf32>
    %180 = tpu.matmul %177, %179, %cst_205 {dimension_numbers = #tpu.dot_dimension_numbers<[1], [0], [0], [1], [0, 0, 1, 1], [], []>} : vector<64x16xf32>, vector<16x64xf32>, vector<64x64xf32> -> vector<64x64xf32>
    %181 = arith.addf %175, %180 : vector<64x64xf32>
    %c2_206 = arith.constant 2 : index
    %c2_207 = arith.constant 2 : index
    %c0_208 = arith.constant 0 : index
    %182 = vector.load %arg15[%c2_206, %c2_207, %c0_208] : memref<10x10x16xf32, #tpu.memory_space<vmem>>, vector<8x8x16xf32>
    %183 = vector.shape_cast %182 : vector<8x8x16xf32> to vector<64x16xf32>
    %c8_209 = arith.constant 8 : index
    %c0_210 = arith.constant 0 : index
    %c0_211 = arith.constant 0 : index
    %184 = vector.load %arg6[%c8_209, %c0_210, %c0_211] : memref<9x16x64xf32, #tpu.memory_space<vmem>>, vector<1x16x64xf32>
    %185 = vector.shape_cast %184 : vector<1x16x64xf32> to vector<16x64xf32>
    %cst_212 = arith.constant dense<0.000000e+00> : vector<64x64xf32>
    %186 = tpu.matmul %183, %185, %cst_212 {dimension_numbers = #tpu.dot_dimension_numbers<[1], [0], [0], [1], [0, 0, 1, 1], [], []>} : vector<64x16xf32>, vector<16x64xf32>, vector<64x64xf32> -> vector<64x64xf32>
    %187 = arith.addf %181, %186 : vector<64x64xf32>
    %c0_213 = arith.constant 0 : index
    %c0_214 = arith.constant 0 : index
    %188 = vector.load %arg7[%c0_213, %c0_214] : memref<1x64xf32, #tpu.memory_space<vmem>>, vector<1x64xf32>
    %189 = vector.broadcast %188 : vector<1x64xf32> to vector<64x64xf32>
    %190 = arith.addf %187, %189 : vector<64x64xf32>
    %cst_215 = arith.constant 0.000000e+00 : f32
    %191 = vector.broadcast %cst_215 : f32 to vector<64x64xf32>
    %192 = arith.maximumf %190, %191 : vector<64x64xf32>
    %193 = vector.shape_cast %192 : vector<64x64xf32> to vector<8x8x64xf32>
    %194 = vector.extract_strided_slice %193 {offsets = [0, 0, 0], sizes = [1, 8, 64], strides = [1, 1, 1]} : vector<8x8x64xf32> to vector<1x8x64xf32>
    %195 = vector.shape_cast %194 : vector<1x8x64xf32> to vector<8x64xf32>
    %196 = vector.extract_strided_slice %193 {offsets = [1, 0, 0], sizes = [1, 8, 64], strides = [1, 1, 1]} : vector<8x8x64xf32> to vector<1x8x64xf32>
    %197 = vector.shape_cast %196 : vector<1x8x64xf32> to vector<8x64xf32>
    %198 = arith.maximumf %195, %197 : vector<8x64xf32>
    %199 = vector.extract_strided_slice %198 {offsets = [0, 0], sizes = [1, 64], strides = [1, 1]} : vector<8x64xf32> to vector<1x64xf32>
    %200 = vector.extract_strided_slice %198 {offsets = [1, 0], sizes = [1, 64], strides = [1, 1]} : vector<8x64xf32> to vector<1x64xf32>
    %201 = arith.maximumf %199, %200 : vector<1x64xf32>
    %c0_216 = arith.constant 0 : index
    %c0_217 = arith.constant 0 : index
    %202 = vector.load %arg16[%c0_216, %c0_217] : memref<1x1024xf32, #tpu.memory_space<vmem>>, vector<1x64xf32>
    tpu.vector_store %arg16[%c0_216, %c0_217], %201 {strides = array<i32>} : memref<1x1024xf32, #tpu.memory_space<vmem>>, vector<1x64xf32>,
    %203 = vector.extract_strided_slice %198 {offsets = [2, 0], sizes = [1, 64], strides = [1, 1]} : vector<8x64xf32> to vector<1x64xf32>
    %204 = vector.extract_strided_slice %198 {offsets = [3, 0], sizes = [1, 64], strides = [1, 1]} : vector<8x64xf32> to vector<1x64xf32>
    %205 = arith.maximumf %203, %204 : vector<1x64xf32>
    %c0_218 = arith.constant 0 : index
    %c64 = arith.constant 64 : index
    %206 = vector.load %arg16[%c0_218, %c64] : memref<1x1024xf32, #tpu.memory_space<vmem>>, vector<1x64xf32>
    tpu.vector_store %arg16[%c0_218, %c64], %205 {strides = array<i32>} : memref<1x1024xf32, #tpu.memory_space<vmem>>, vector<1x64xf32>,
    %207 = vector.extract_strided_slice %198 {offsets = [4, 0], sizes = [1, 64], strides = [1, 1]} : vector<8x64xf32> to vector<1x64xf32>
    %208 = vector.extract_strided_slice %198 {offsets = [5, 0], sizes = [1, 64], strides = [1, 1]} : vector<8x64xf32> to vector<1x64xf32>
    %209 = arith.maximumf %207, %208 : vector<1x64xf32>
    %c0_219 = arith.constant 0 : index
    %c128 = arith.constant 128 : index
    %210 = vector.load %arg16[%c0_219, %c128] : memref<1x1024xf32, #tpu.memory_space<vmem>>, vector<1x64xf32>
    tpu.vector_store %arg16[%c0_219, %c128], %209 {strides = array<i32>} : memref<1x1024xf32, #tpu.memory_space<vmem>>, vector<1x64xf32>,
    %211 = vector.extract_strided_slice %198 {offsets = [6, 0], sizes = [1, 64], strides = [1, 1]} : vector<8x64xf32> to vector<1x64xf32>
    %212 = vector.extract_strided_slice %198 {offsets = [7, 0], sizes = [1, 64], strides = [1, 1]} : vector<8x64xf32> to vector<1x64xf32>
    %213 = arith.maximumf %211, %212 : vector<1x64xf32>
    %c0_220 = arith.constant 0 : index
    %c192 = arith.constant 192 : index
    %214 = vector.load %arg16[%c0_220, %c192] : memref<1x1024xf32, #tpu.memory_space<vmem>>, vector<1x64xf32>
    tpu.vector_store %arg16[%c0_220, %c192], %213 {strides = array<i32>} : memref<1x1024xf32, #tpu.memory_space<vmem>>, vector<1x64xf32>,
    %215 = vector.extract_strided_slice %193 {offsets = [2, 0, 0], sizes = [1, 8, 64], strides = [1, 1, 1]} : vector<8x8x64xf32> to vector<1x8x64xf32>
    %216 = vector.shape_cast %215 : vector<1x8x64xf32> to vector<8x64xf32>
    %217 = vector.extract_strided_slice %193 {offsets = [3, 0, 0], sizes = [1, 8, 64], strides = [1, 1, 1]} : vector<8x8x64xf32> to vector<1x8x64xf32>
    %218 = vector.shape_cast %217 : vector<1x8x64xf32> to vector<8x64xf32>
    %219 = arith.maximumf %216, %218 : vector<8x64xf32>
    %220 = vector.extract_strided_slice %219 {offsets = [0, 0], sizes = [1, 64], strides = [1, 1]} : vector<8x64xf32> to vector<1x64xf32>
    %221 = vector.extract_strided_slice %219 {offsets = [1, 0], sizes = [1, 64], strides = [1, 1]} : vector<8x64xf32> to vector<1x64xf32>
    %222 = arith.maximumf %220, %221 : vector<1x64xf32>
    %c0_221 = arith.constant 0 : index
    %c256 = arith.constant 256 : index
    %223 = vector.load %arg16[%c0_221, %c256] : memref<1x1024xf32, #tpu.memory_space<vmem>>, vector<1x64xf32>
    tpu.vector_store %arg16[%c0_221, %c256], %222 {strides = array<i32>} : memref<1x1024xf32, #tpu.memory_space<vmem>>, vector<1x64xf32>,
    %224 = vector.extract_strided_slice %219 {offsets = [2, 0], sizes = [1, 64], strides = [1, 1]} : vector<8x64xf32> to vector<1x64xf32>
    %225 = vector.extract_strided_slice %219 {offsets = [3, 0], sizes = [1, 64], strides = [1, 1]} : vector<8x64xf32> to vector<1x64xf32>
    %226 = arith.maximumf %224, %225 : vector<1x64xf32>
    %c0_222 = arith.constant 0 : index
    %c320 = arith.constant 320 : index
    %227 = vector.load %arg16[%c0_222, %c320] : memref<1x1024xf32, #tpu.memory_space<vmem>>, vector<1x64xf32>
    tpu.vector_store %arg16[%c0_222, %c320], %226 {strides = array<i32>} : memref<1x1024xf32, #tpu.memory_space<vmem>>, vector<1x64xf32>,
    %228 = vector.extract_strided_slice %219 {offsets = [4, 0], sizes = [1, 64], strides = [1, 1]} : vector<8x64xf32> to vector<1x64xf32>
    %229 = vector.extract_strided_slice %219 {offsets = [5, 0], sizes = [1, 64], strides = [1, 1]} : vector<8x64xf32> to vector<1x64xf32>
    %230 = arith.maximumf %228, %229 : vector<1x64xf32>
    %c0_223 = arith.constant 0 : index
    %c384 = arith.constant 384 : index
    %231 = vector.load %arg16[%c0_223, %c384] : memref<1x1024xf32, #tpu.memory_space<vmem>>, vector<1x64xf32>
    tpu.vector_store %arg16[%c0_223, %c384], %230 {strides = array<i32>} : memref<1x1024xf32, #tpu.memory_space<vmem>>, vector<1x64xf32>,
    %232 = vector.extract_strided_slice %219 {offsets = [6, 0], sizes = [1, 64], strides = [1, 1]} : vector<8x64xf32> to vector<1x64xf32>
    %233 = vector.extract_strided_slice %219 {offsets = [7, 0], sizes = [1, 64], strides = [1, 1]} : vector<8x64xf32> to vector<1x64xf32>
    %234 = arith.maximumf %232, %233 : vector<1x64xf32>
    %c0_224 = arith.constant 0 : index
    %c448 = arith.constant 448 : index
    %235 = vector.load %arg16[%c0_224, %c448] : memref<1x1024xf32, #tpu.memory_space<vmem>>, vector<1x64xf32>
    tpu.vector_store %arg16[%c0_224, %c448], %234 {strides = array<i32>} : memref<1x1024xf32, #tpu.memory_space<vmem>>, vector<1x64xf32>,
    %236 = vector.extract_strided_slice %193 {offsets = [4, 0, 0], sizes = [1, 8, 64], strides = [1, 1, 1]} : vector<8x8x64xf32> to vector<1x8x64xf32>
    %237 = vector.shape_cast %236 : vector<1x8x64xf32> to vector<8x64xf32>
    %238 = vector.extract_strided_slice %193 {offsets = [5, 0, 0], sizes = [1, 8, 64], strides = [1, 1, 1]} : vector<8x8x64xf32> to vector<1x8x64xf32>
    %239 = vector.shape_cast %238 : vector<1x8x64xf32> to vector<8x64xf32>
    %240 = arith.maximumf %237, %239 : vector<8x64xf32>
    %241 = vector.extract_strided_slice %240 {offsets = [0, 0], sizes = [1, 64], strides = [1, 1]} : vector<8x64xf32> to vector<1x64xf32>
    %242 = vector.extract_strided_slice %240 {offsets = [1, 0], sizes = [1, 64], strides = [1, 1]} : vector<8x64xf32> to vector<1x64xf32>
    %243 = arith.maximumf %241, %242 : vector<1x64xf32>
    %c0_225 = arith.constant 0 : index
    %c512 = arith.constant 512 : index
    %244 = vector.load %arg16[%c0_225, %c512] : memref<1x1024xf32, #tpu.memory_space<vmem>>, vector<1x64xf32>
    tpu.vector_store %arg16[%c0_225, %c512], %243 {strides = array<i32>} : memref<1x1024xf32, #tpu.memory_space<vmem>>, vector<1x64xf32>,
    %245 = vector.extract_strided_slice %240 {offsets = [2, 0], sizes = [1, 64], strides = [1, 1]} : vector<8x64xf32> to vector<1x64xf32>
    %246 = vector.extract_strided_slice %240 {offsets = [3, 0], sizes = [1, 64], strides = [1, 1]} : vector<8x64xf32> to vector<1x64xf32>
    %247 = arith.maximumf %245, %246 : vector<1x64xf32>
    %c0_226 = arith.constant 0 : index
    %c576 = arith.constant 576 : index
    %248 = vector.load %arg16[%c0_226, %c576] : memref<1x1024xf32, #tpu.memory_space<vmem>>, vector<1x64xf32>
    tpu.vector_store %arg16[%c0_226, %c576], %247 {strides = array<i32>} : memref<1x1024xf32, #tpu.memory_space<vmem>>, vector<1x64xf32>,
    %249 = vector.extract_strided_slice %240 {offsets = [4, 0], sizes = [1, 64], strides = [1, 1]} : vector<8x64xf32> to vector<1x64xf32>
    %250 = vector.extract_strided_slice %240 {offsets = [5, 0], sizes = [1, 64], strides = [1, 1]} : vector<8x64xf32> to vector<1x64xf32>
    %251 = arith.maximumf %249, %250 : vector<1x64xf32>
    %c0_227 = arith.constant 0 : index
    %c640 = arith.constant 640 : index
    %252 = vector.load %arg16[%c0_227, %c640] : memref<1x1024xf32, #tpu.memory_space<vmem>>, vector<1x64xf32>
    tpu.vector_store %arg16[%c0_227, %c640], %251 {strides = array<i32>} : memref<1x1024xf32, #tpu.memory_space<vmem>>, vector<1x64xf32>,
    %253 = vector.extract_strided_slice %240 {offsets = [6, 0], sizes = [1, 64], strides = [1, 1]} : vector<8x64xf32> to vector<1x64xf32>
    %254 = vector.extract_strided_slice %240 {offsets = [7, 0], sizes = [1, 64], strides = [1, 1]} : vector<8x64xf32> to vector<1x64xf32>
    %255 = arith.maximumf %253, %254 : vector<1x64xf32>
    %c0_228 = arith.constant 0 : index
    %c704 = arith.constant 704 : index
    %256 = vector.load %arg16[%c0_228, %c704] : memref<1x1024xf32, #tpu.memory_space<vmem>>, vector<1x64xf32>
    tpu.vector_store %arg16[%c0_228, %c704], %255 {strides = array<i32>} : memref<1x1024xf32, #tpu.memory_space<vmem>>, vector<1x64xf32>,
    %257 = vector.extract_strided_slice %193 {offsets = [6, 0, 0], sizes = [1, 8, 64], strides = [1, 1, 1]} : vector<8x8x64xf32> to vector<1x8x64xf32>
    %258 = vector.shape_cast %257 : vector<1x8x64xf32> to vector<8x64xf32>
    %259 = vector.extract_strided_slice %193 {offsets = [7, 0, 0], sizes = [1, 8, 64], strides = [1, 1, 1]} : vector<8x8x64xf32> to vector<1x8x64xf32>
    %260 = vector.shape_cast %259 : vector<1x8x64xf32> to vector<8x64xf32>
    %261 = arith.maximumf %258, %260 : vector<8x64xf32>
    %262 = vector.extract_strided_slice %261 {offsets = [0, 0], sizes = [1, 64], strides = [1, 1]} : vector<8x64xf32> to vector<1x64xf32>
    %263 = vector.extract_strided_slice %261 {offsets = [1, 0], sizes = [1, 64], strides = [1, 1]} : vector<8x64xf32> to vector<1x64xf32>
    %264 = arith.maximumf %262, %263 : vector<1x64xf32>
    %c0_229 = arith.constant 0 : index
    %c768 = arith.constant 768 : index
    %265 = vector.load %arg16[%c0_229, %c768] : memref<1x1024xf32, #tpu.memory_space<vmem>>, vector<1x64xf32>
    tpu.vector_store %arg16[%c0_229, %c768], %264 {strides = array<i32>} : memref<1x1024xf32, #tpu.memory_space<vmem>>, vector<1x64xf32>,
    %266 = vector.extract_strided_slice %261 {offsets = [2, 0], sizes = [1, 64], strides = [1, 1]} : vector<8x64xf32> to vector<1x64xf32>
    %267 = vector.extract_strided_slice %261 {offsets = [3, 0], sizes = [1, 64], strides = [1, 1]} : vector<8x64xf32> to vector<1x64xf32>
    %268 = arith.maximumf %266, %267 : vector<1x64xf32>
    %c0_230 = arith.constant 0 : index
    %c832 = arith.constant 832 : index
    %269 = vector.load %arg16[%c0_230, %c832] : memref<1x1024xf32, #tpu.memory_space<vmem>>, vector<1x64xf32>
    tpu.vector_store %arg16[%c0_230, %c832], %268 {strides = array<i32>} : memref<1x1024xf32, #tpu.memory_space<vmem>>, vector<1x64xf32>,
    %270 = vector.extract_strided_slice %261 {offsets = [4, 0], sizes = [1, 64], strides = [1, 1]} : vector<8x64xf32> to vector<1x64xf32>
    %271 = vector.extract_strided_slice %261 {offsets = [5, 0], sizes = [1, 64], strides = [1, 1]} : vector<8x64xf32> to vector<1x64xf32>
    %272 = arith.maximumf %270, %271 : vector<1x64xf32>
    %c0_231 = arith.constant 0 : index
    %c896 = arith.constant 896 : index
    %273 = vector.load %arg16[%c0_231, %c896] : memref<1x1024xf32, #tpu.memory_space<vmem>>, vector<1x64xf32>
    tpu.vector_store %arg16[%c0_231, %c896], %272 {strides = array<i32>} : memref<1x1024xf32, #tpu.memory_space<vmem>>, vector<1x64xf32>,
    %274 = vector.extract_strided_slice %261 {offsets = [6, 0], sizes = [1, 64], strides = [1, 1]} : vector<8x64xf32> to vector<1x64xf32>
    %275 = vector.extract_strided_slice %261 {offsets = [7, 0], sizes = [1, 64], strides = [1, 1]} : vector<8x64xf32> to vector<1x64xf32>
    %276 = arith.maximumf %274, %275 : vector<1x64xf32>
    %c0_232 = arith.constant 0 : index
    %c960 = arith.constant 960 : index
    %277 = vector.load %arg16[%c0_232, %c960] : memref<1x1024xf32, #tpu.memory_space<vmem>>, vector<1x64xf32>
    tpu.vector_store %arg16[%c0_232, %c960], %276 {strides = array<i32>} : memref<1x1024xf32, #tpu.memory_space<vmem>>, vector<1x64xf32>,
    %c0_233 = arith.constant 0 : index
    %c0_234 = arith.constant 0 : index
    %278 = vector.load %arg16[%c0_233, %c0_234] : memref<1x1024xf32, #tpu.memory_space<vmem>>, vector<1x1024xf32>
    %c0_235 = arith.constant 0 : index
    %c0_236 = arith.constant 0 : index
    %279 = vector.load %arg8[%c0_235, %c0_236] : memref<1024x32xf32, #tpu.memory_space<vmem>>, vector<1024x32xf32>
    %cst_237 = arith.constant dense<0.000000e+00> : vector<1x32xf32>
    %280 = tpu.matmul %278, %279, %cst_237 {dimension_numbers = #tpu.dot_dimension_numbers<[1], [0], [0], [1], [0, 0, 1, 1], [], []>} : vector<1x1024xf32>, vector<1024x32xf32>, vector<1x32xf32> -> vector<1x32xf32>
    %c0_238 = arith.constant 0 : index
    %c0_239 = arith.constant 0 : index
    %281 = vector.load %arg9[%c0_238, %c0_239] : memref<1x32xf32, #tpu.memory_space<vmem>>, vector<1x32xf32>
    %282 = arith.addf %280, %281 : vector<1x32xf32>
    %cst_240 = arith.constant 0.000000e+00 : f32
    %283 = vector.broadcast %cst_240 : f32 to vector<1x32xf32>
    %284 = arith.maximumf %282, %283 : vector<1x32xf32>
    %c0_241 = arith.constant 0 : index
    %c0_242 = arith.constant 0 : index
    %285 = vector.load %arg10[%c0_241, %c0_242] : memref<32x3xf32, #tpu.memory_space<vmem>>, vector<32x3xf32>
    %cst_243 = arith.constant dense<0.000000e+00> : vector<1x3xf32>
    %286 = tpu.matmul %284, %285, %cst_243 {dimension_numbers = #tpu.dot_dimension_numbers<[1], [0], [0], [1], [0, 0, 1, 1], [], []>} : vector<1x32xf32>, vector<32x3xf32>, vector<1x3xf32> -> vector<1x3xf32>
    %c0_244 = arith.constant 0 : index
    %c0_245 = arith.constant 0 : index
    %287 = vector.load %arg11[%c0_244, %c0_245] : memref<1x3xf32, #tpu.memory_space<vmem>>, vector<1x3xf32>
    %288 = arith.addf %286, %287 : vector<1x3xf32>
    %cst_246 = arith.constant 0.000000e+00 : f32
    %289 = vector.broadcast %cst_246 : f32 to vector<1x3xf32>
    %290 = arith.maximumf %288, %289 : vector<1x3xf32>
    %291 = math.absf %288 : vector<1x3xf32>
    %cst_247 = arith.constant 0.000000e+00 : f32
    %292 = vector.broadcast %cst_247 : f32 to vector<1x3xf32>
    %293 = arith.subf %292, %291 : vector<1x3xf32>
    %294 = math.exp %293 : vector<1x3xf32>
    %295 = math.log1p %294 : vector<1x3xf32>
    %296 = arith.addf %290, %295 : vector<1x3xf32>
    %c0_248 = arith.constant 0 : index
    %c0_249 = arith.constant 0 : index
    %c0_250 = arith.constant 0 : index
    %297 = vector.load %arg12[%c0_248, %c0_249, %c0_250] : memref<1x1x3xf32, #tpu.memory_space<vmem>>, vector<1x1x3xf32>
    %298 = vector.shape_cast %297 : vector<1x1x3xf32> to vector<1x3xf32>
    %299 = vector.shape_cast %296 : vector<1x3xf32> to vector<1x1x3xf32>
    tpu.vector_store %arg12[%c0_248, %c0_249, %c0_250], %299 {strides = array<i32>} : memref<1x1x3xf32, #tpu.memory_space<vmem>>, vector<1x1x3xf32>,
    return
  }
  func.func @transform_0(%arg0: i32) -> (i32, i32, i32, i32) {
    %c0_i32 = arith.constant 0 : i32
    %c0_i32_0 = arith.constant 0 : i32
    %c0_i32_1 = arith.constant 0 : i32
    %c0_i32_2 = arith.constant 0 : i32
    return %arg0, %c0_i32, %c0_i32_0, %c0_i32_1 : i32, i32, i32, i32
  }
  func.func @transform_1(%arg0: i32) -> (i32, i32, i32) {
    %c0_i32 = arith.constant 0 : i32
    %c0_i32_0 = arith.constant 0 : i32
    %c0_i32_1 = arith.constant 0 : i32
    %c0_i32_2 = arith.constant 0 : i32
    return %c0_i32, %c0_i32_0, %c0_i32_1 : i32, i32, i32
  }
  func.func @transform_2(%arg0: i32) -> (i32, i32) {
    %c0_i32 = arith.constant 0 : i32
    %c0_i32_0 = arith.constant 0 : i32
    %c0_i32_1 = arith.constant 0 : i32
    return %c0_i32, %c0_i32_0 : i32, i32
  }
  func.func @transform_3(%arg0: i32) -> (i32, i32, i32) {
    %c0_i32 = arith.constant 0 : i32
    %c0_i32_0 = arith.constant 0 : i32
    %c0_i32_1 = arith.constant 0 : i32
    %c0_i32_2 = arith.constant 0 : i32
    return %c0_i32, %c0_i32_0, %c0_i32_1 : i32, i32, i32
  }
  func.func @transform_4(%arg0: i32) -> (i32, i32) {
    %c0_i32 = arith.constant 0 : i32
    %c0_i32_0 = arith.constant 0 : i32
    %c0_i32_1 = arith.constant 0 : i32
    return %c0_i32, %c0_i32_0 : i32, i32
  }
  func.func @transform_5(%arg0: i32) -> (i32, i32, i32) {
    %c0_i32 = arith.constant 0 : i32
    %c0_i32_0 = arith.constant 0 : i32
    %c0_i32_1 = arith.constant 0 : i32
    %c0_i32_2 = arith.constant 0 : i32
    return %c0_i32, %c0_i32_0, %c0_i32_1 : i32, i32, i32
  }
  func.func @transform_6(%arg0: i32) -> (i32, i32) {
    %c0_i32 = arith.constant 0 : i32
    %c0_i32_0 = arith.constant 0 : i32
    %c0_i32_1 = arith.constant 0 : i32
    return %c0_i32, %c0_i32_0 : i32, i32
  }
  func.func @transform_7(%arg0: i32) -> (i32, i32) {
    %c0_i32 = arith.constant 0 : i32
    %c0_i32_0 = arith.constant 0 : i32
    %c0_i32_1 = arith.constant 0 : i32
    return %c0_i32, %c0_i32_0 : i32, i32
  }
  func.func @transform_8(%arg0: i32) -> (i32, i32) {
    %c0_i32 = arith.constant 0 : i32
    %c0_i32_0 = arith.constant 0 : i32
    %c0_i32_1 = arith.constant 0 : i32
    return %c0_i32, %c0_i32_0 : i32, i32
  }
  func.func @transform_9(%arg0: i32) -> (i32, i32) {
    %c0_i32 = arith.constant 0 : i32
    %c0_i32_0 = arith.constant 0 : i32
    %c0_i32_1 = arith.constant 0 : i32
    return %c0_i32, %c0_i32_0 : i32, i32
  }
  func.func @transform_10(%arg0: i32) -> (i32, i32) {
    %c0_i32 = arith.constant 0 : i32
    %c0_i32_0 = arith.constant 0 : i32
    %c0_i32_1 = arith.constant 0 : i32
    return %c0_i32, %c0_i32_0 : i32, i32
  }
  func.func @transform_11(%arg0: i32) -> (i32, i32, i32) {
    %c0_i32 = arith.constant 0 : i32
    %c0_i32_0 = arith.constant 0 : i32
    %c0_i32_1 = arith.constant 0 : i32
    return %arg0, %c0_i32, %c0_i32_0 : i32, i32, i32
  }
}

</mosaic_0001>

<bundles_post_ra>
// kernel: tpu_custom_call.1
= control target key start
LH: loop header
LB: loop body
LE: loop exit
PB: predicated region body
PF: predicated region fallthrough
CT: control target
= control target key end

     0   :  { %s8372_s0 = inlined_call_operand.vmem [shape: f32[2,8,8,1], index: 0, kind: input, shape index: {}]   ;;  %s8373_s1 = inlined_call_operand.vmem [shape: f32[9,1,4], index: 1, kind: input, shape index: {}]   ;;  %s8374_s2 = inlined_call_operand.vmem [shape: f32[1,4], index: 2, kind: input, shape index: {}]   ;;  %s8375_s3 = inlined_call_operand.vmem [shape: f32[9,4,16], index: 3, kind: input, shape index: {}]   ;;  %s8376_s4 = inlined_call_operand.vmem [shape: f32[1,16], index: 4, kind: input, shape index: {}]   ;;  %s8377_s5 = inlined_call_operand.vmem [shape: f32[9,16,64], index: 5, kind: input, shape index: {}]   ;;  %s8378_s6 = inlined_call_operand.vmem [shape: f32[1,64], index: 6, kind: input, shape index: {}]   ;;  %s8379_s7 = inlined_call_operand.vmem [shape: f32[1024,32], index: 7, kind: input, shape index: {}]   ;;  %s8380_s8 = inlined_call_operand.vmem [shape: f32[1,32], index: 8, kind: input, shape index: {}]   ;;  %s8381_s9 = inlined_call_operand.vmem [shape: f32[32,3], index: 9, kind: input, shape index: {}]   ;;  %s8382_s10 = inlined_call_operand.vmem [shape: f32[1,3], index: 10, kind: input, shape index: {}]   ;;  %s8383_s11 = inlined_call_operand.hbm [shape: f32[2,1,3], index: 11, kind: output, shape index: {}]  }
   0x1   :  { %8384 = sst [smem:[#allocation9_spill]] %s8372_s0 }
   0x2   :  { %16 = vsyncpa [#allocation7], 0 }
   0x3   :  { %18 = vsyncpa [#allocation7 + $0x1], 0  ;;  %s6981_s17 = smov 0   ;;  %s6983_s18 = smov 0  }
   0x4   :  { %s6985_s19 = smov 0   ;;  %s6987_s20 = smov 0  }
   0x5 LB: > { %s7002_s21 = sadd.s32 4294967295, %s6913_s20   ;;  %s5355_s22 = sadd.s32 4294967294, %s6913_s20   ;;  %s6913_s20 = sphi %s6987_s20, %s8395_s20   ;;  %s6909_s19 = sphi %s6985_s19, %s8394_s19   ;;  %s6905_s18 = sphi %s6983_s18, %s8393_s18   ;;  %s6901_s17 = sphi %s6981_s17, %s8392_s17  }
   0x6   : > { %s7006_s23 = sadd.s32 1, %s6913_s20   ;;  %s267_s24 = sadd.s32 1, %s6909_s19 }
   0x7   : > { %s264_s25 = ssub.s32 %s6913_s20, %s7006_s23  ;;  %p277_p0 = scmp.ne.s32.totalorder %s6909_s19, %s6905_s18 }
   0x8   : > { %p265_p1 = scmp.eq.s32.totalorder %s264_s25, 0  ;;  %p278_p2 = scmp.eq.s32.totalorder %s7002_s21, 1 }
   0x9   : > { %p283_p3 = scmp.ne.s32.totalorder %s6905_s18, %s6901_s17  ;;  %p284_p4 = scmp.eq.s32.totalorder %s5355_s22, 1 }
   0xa   : > { %s7017_s26 = scalar_select %p265_p1, %s6909_s19, %s267_s24  }
   0xb   : > { %p7019_p5 = por %p278_p2, %p277_p0  ;;  %p7023_p6 = por %p284_p4, %p283_p3 }
   0xc   : > { %p5358_p7 = scmp.ge.s32.totalorder %s6913_s20, 1  ;;  %p340_p8 = scmp.lt.s32.totalorder %s6913_s20, 3 }
   0xe   : > { %p341_p9 = pnand %p5358_p7, %p340_p8 }
   0xf   : > { %v5361_v0 = vld [vmem:[%s8373_s1 + $0x1] sm:$0x1] (!%p341_p9)  ;;  %vm466_vm0 = vcmask (!%p341_p9), 1040384   ;;  %vm392_vm1 = vcmask (!%p341_p9), 7168   ;;  %vm394_vm2 = vcmask (!%p341_p9), 1024   ;;  %v6915_v1 = vmov (!%p341_p9), 0.0  }
  0x10   : > { %344 = sbr.rel (%p341_p9) target bundleno = 1814 (0x716), region = 64  ;;  %6032 = vmatprep.subr.msk.mxu0 (!%p341_p9), %vm466_vm0, %v5361_v0  ;;  %393 = vst.msk [vmem:[#allocation2] sm:$0xff] (!%p341_p9), %vm392_vm1, %v6915_v1  ;;  %396 = vst.msk [vmem:[#allocation2 + $0x10] sm:$0xff] (!%p341_p9), %vm392_vm1, %v6915_v1  ;;  %v431_v2 = vld [vmem:[%s8373_s1] sm:$0x1] (!%p341_p9)  ;;  %p379_p10 = scmp.lt.s32.totalorder (!%p341_p9), %s7002_s21, 1  ;;  %6609 = vmatprep.subr.msk.mxu1 (!%p341_p9), %vm466_vm0, %v5361_v0 }
  0x11   : > { %395 = vst.msk [vmem:[#allocation2 + $0x8] sm:$0x3] (!%p341_p9), %vm394_vm2, %v6915_v1  ;;  %397 = vst.msk [vmem:[#allocation2 + $0x18] sm:$0x3] (!%p341_p9), %vm394_vm2, %v6915_v1  ;;  %6033 = vmatpush3.msk.msra.mxu0 (!%p341_p9), %vm466_vm0, %v5361_v0  ;;  %6610 = vmatpush3.msk.msra.mxu1 (!%p341_p9), %vm466_vm0, %v5361_v0  ;;  %s8387_s0 = sld [smem:[#allocation9_spill]] (!%p341_p9)  ;;  %vm1781_vm3 = vcmask (!%p341_p9), 31744  }
  0x12   : > { %398 = vst.msk [vmem:[#allocation2 + $0x20] sm:$0xff] (!%p341_p9), %vm392_vm1, %v6915_v1  ;;  %400 = vst.msk [vmem:[#allocation2 + $0x30] sm:$0xff] (!%p341_p9), %vm392_vm1, %v6915_v1  ;;  %6046 = vmatprep.subr.msk.mxu0 (!%p341_p9), %vm466_vm0, %v431_v2  ;;  %v5380_v14 = vld [vmem:[%s8373_s1 + $0x2] sm:$0x1] (!%p341_p9)  ;;  %v5390_v20 = vld [vmem:[%s8373_s1 + $0x3] sm:$0x1] (!%p341_p9) }
  0x13   : > { %399 = vst.msk [vmem:[#allocation2 + $0x28] sm:$0x3] (!%p341_p9), %vm394_vm2, %v6915_v1  ;;  %401 = vst.msk [vmem:[#allocation2 + $0x38] sm:$0x3] (!%p341_p9), %vm394_vm2, %v6915_v1  ;;  %v5400_v32 = vld [vmem:[%s8373_s1 + $0x4] sm:$0x1] (!%p341_p9) }
  0x14   : > { %402 = vst.msk [vmem:[#allocation2 + $0x40] sm:$0xff] (!%p341_p9), %vm392_vm1, %v6915_v1  ;;  %404 = vst.msk [vmem:[#allocation2 + $0x50] sm:$0xff] (!%p341_p9), %vm392_vm1, %v6915_v1  ;;  %v5410_v38 = vld [vmem:[%s8373_s1 + $0x5] sm:$0x1] (!%p341_p9)  ;;  %v5420_v40 = vld [vmem:[%s8373_s1 + $0x6] sm:$0x1] (!%p341_p9) }
  0x15   : > { %403 = vst.msk [vmem:[#allocation2 + $0x48] sm:$0x3] (!%p341_p9), %vm394_vm2, %v6915_v1  ;;  %405 = vst.msk [vmem:[#allocation2 + $0x58] sm:$0x3] (!%p341_p9), %vm394_vm2, %v6915_v1  ;;  %v5430_v42 = vld [vmem:[%s8373_s1 + $0x7] sm:$0x1] (!%p341_p9) }
  0x16   : > { %406 = vst.msk [vmem:[#allocation2 + $0x60] sm:$0xff] (!%p341_p9), %vm392_vm1, %v6915_v1  ;;  %408 = vst.msk [vmem:[#allocation2 + $0x70] sm:$0xff] (!%p341_p9), %vm392_vm1, %v6915_v1  ;;  %v5440_v44 = vld [vmem:[%s8373_s1 + $0x8] sm:$0x1] (!%p341_p9)  ;;  %vm1783_vm4 = vcmask (!%p341_p9), 25600   ;;  %vm1855_vm5 = vcmask (!%p341_p9), 1043456  }
  0x17   : > { %407 = vst.msk [vmem:[#allocation2 + $0x68] sm:$0x3] %vm394_vm2, %v6915_v1  ;;  %409 = vst.msk [vmem:[#allocation2 + $0x78] sm:$0x3] %vm394_vm2, %v6915_v1  ;;  %s380_s14 = scalar_select %p379_p10, %s7002_s21, 1  ;;  %v423_v12 = vld [vmem:[#allocation2] sm:$0xff] }
  0x18   : > { %410 = vst.msk [vmem:[#allocation2 + $0x80] sm:$0xff] %vm392_vm1, %v6915_v1  ;;  %412 = vst.msk [vmem:[#allocation2 + $0x90] sm:$0xff] %vm392_vm1, %v6915_v1  ;;  %v432_v6 = vld [vmem:[#allocation2 + $0x1] sm:$0xff]  ;;  %v5450_v57 = vld [vmem:[%s8374_s2] ss:$0 sm:$0xff]  ;;  %vm3170_vm6 = vcmask 130048  }
  0x19   : > { %411 = vst.msk [vmem:[#allocation2 + $0x88] sm:$0x3] %vm394_vm2, %v6915_v1  ;;  %413 = vst.msk [vmem:[#allocation2 + $0x98] sm:$0x3] %vm394_vm2, %v6915_v1  ;;  %s5634_s15 = sshll.u32 %s380_s14, 6  ;;  %6034 = vmatprep.mubr.msk.f32.mxu0 %vm392_vm1, %v432_v6  ;;  %v707_v29 = vld [vmem:[#allocation2 + $0x2] sm:$0xff] }
  0x1a   : > { %s383_s24 = scalar_lea.vmem %s8387_s0, %s5634_s15  ;;  %1787 = vst.msk [vmem:[#allocation3 + $0x20] sm:$0xff] %vm1781_vm3, %v6915_v1  ;;  %1782 = vst.msk [vmem:[#allocation3] sm:$0xff] %vm1781_vm3, %v6915_v1  ;;  %v5451_v48 = vld [vmem:[%s8375_s3 + $0x4] sm:$0xf]  ;;  %v1820_v54 = vld [vmem:[%s8375_s3] sm:$0xf] }
  0x1b   : > { %v384_v3 = vld [vmem:[%s383_s24] sm:$0xff]  ;;  %v385_v4 = vld [vmem:[%s383_s24 + $0x8] sm:$0xff]  ;;  %v386_v5 = vld [vmem:[%s383_s24 + $0x10] sm:$0xff]  ;;  %1788 = vst.msk [vmem:[#allocation3 + $0x28] sm:$0x3] %vm1783_vm4, %v6915_v1  ;;  %6158 = vmatprep.subr.msk.mxu1 %vm1855_vm5, %v5451_v48  ;;  %vm3172_vm7 = vcmask 123904  }
  0x1c   : > { %415 = vst.msk [vmem:[#allocation2 + $0x11] sm:$0xff] %vm392_vm1, %v384_v3  ;;  %416 = vst.msk [vmem:[#allocation2 + $0x21] sm:$0xff] %vm392_vm1, %v385_v4  ;;  %v387_v7 = vld [vmem:[%s383_s24 + $0x18] sm:$0xff]  ;;  %v388_v8 = vld [vmem:[%s383_s24 + $0x20] sm:$0xff]  ;;  %s6917_s13 = smov 64   ;;  %vm6919_vm12 = vmmov 0  }
  0x1d   : > { %417 = vst.msk [vmem:[#allocation2 + $0x31] sm:$0xff] %vm392_vm1, %v386_v5  ;;  %418 = vst.msk [vmem:[#allocation2 + $0x41] sm:$0xff] %vm392_vm1, %v387_v7  ;;  %v389_v9 = vld [vmem:[%s383_s24 + $0x28] sm:$0xff]  ;;  %v390_v10 = vld [vmem:[%s383_s24 + $0x30] sm:$0xff]  ;;  %vm5196_vm13 = vcmask 261120   ;;  %s5631_s25 = sshll.u32 %s7002_s21, 4 }
  0x1e   : > { %419 = vst.msk [vmem:[#allocation2 + $0x51] sm:$0xff] %vm392_vm1, %v388_v8  ;;  %420 = vst.msk [vmem:[#allocation2 + $0x61] sm:$0xff] %vm392_vm1, %v389_v9  ;;  %v391_v11 = vld [vmem:[%s383_s24 + $0x38] sm:$0xff]  ;;  %s377_s24 = sand.u32 1, %s6905_s18   ;;  %vm5285_vm15 = vcmask 16384   ;;  %s8330_s15 = scalar_lea.hbm %s8383_s11, %s5631_s25 }
  0x1f   : > { %421 = vst.msk [vmem:[#allocation2 + $0x71] sm:$0xff] %vm392_vm1, %v390_v10  ;;  %422 = vst.msk [vmem:[#allocation2 + $0x81] sm:$0xff] %vm392_vm1, %v391_v11  ;;  %v1315_v45 = vld [vmem:[#allocation2 + $0x90] sm:$0xff]  ;;  %s378_s29 = scalar_lea.vmem [#allocation6], %s377_s24  ;;  %s5288_s16 = scalar_lea.sflag [#allocation7], %s377_s24 }
  0x20   : > { %v1465_v46 = vld [vmem:[#allocation2 + $0x91] sm:$0xff]  ;;  %1784 = vst.msk [vmem:[#allocation3 + $0x8] sm:$0x3] %vm1783_vm4, %v6915_v1  ;;  %1786 = vst.msk [vmem:[#allocation3 + $0x18] sm:$0x3] %vm1783_vm4, %v6915_v1  ;;  %s5300_s30 = sshll.u32 %s378_s29, 4  ;;  %s8332_s30 = int_to_ptr.vmem [resolvable:$true] %s5300_s30 }
  0x21   : > { %v1615_v47 = vld [vmem:[#allocation2 + $0x92] sm:$0xff]  ;;  %1785 = vst.msk [vmem:[#allocation3 + $0x10] sm:$0xff] %vm1781_vm3, %v6915_v1  ;;  %1789 = vst.msk [vmem:[#allocation3 + $0x30] sm:$0xff] %vm1781_vm3, %v6915_v1  ;;  %s6851_s21 = scalar_lea.vmem %s8332_s30, 16  ;;  %s6920_s22 = smov [#allocation6]  }
  0x22   : > { %1790 = vst.msk [vmem:[#allocation3 + $0x38] sm:$0x3] %vm1783_vm4, %v6915_v1  ;;  %1792 = vst.msk [vmem:[#allocation3 + $0x48] sm:$0x3] %vm1783_vm4, %v6915_v1  ;;  %p6852_p11 = scmp.ne.s32.totalorder %s8332_s30, %s6851_s21 }
  0x23   : > { %v7094_v13 = vld [vmem:[#allocation2 + $0x11] sm:$0xff]  ;;  %v7104_v15 = vld [vmem:[#allocation2 + $0x21] sm:$0xff]  ;;  %1791 = vst.msk [vmem:[#allocation3 + $0x40] sm:$0xff] %vm1781_vm3, %v6915_v1  ;;  %1793 = vst.msk [vmem:[#allocation3 + $0x50] sm:$0xff] %vm1781_vm3, %v6915_v1 }
  0x24   : > { %6035 = vmatmul.mubr.msk.f32.vlgmr.msra.gmra.mrb[0].mxu0 %vm392_vm1, %v7094_v13  ;;  %v424_v16 = vld [vmem:[#allocation2 + $0x10] sm:$0xff]  ;;  %6037 = vmatprep.mubr.msk.f32.mxu1 %vm392_vm1, %v7104_v15  ;;  %v7110_v18 = vld [vmem:[#allocation2 + $0x20] sm:$0xff]  ;;  %1794 = vst.msk [vmem:[#allocation3 + $0x58] sm:$0x3] %vm1783_vm4, %v6915_v1  ;;  %1796 = vst.msk [vmem:[#allocation3 + $0x68] sm:$0x3] %vm1783_vm4, %v6915_v1  ;;  %p6853_p12 = pnand %p6852_p11, %p7019_p5 }
  0x25   : > { %6047 = vmatpush3.msk.msra.mxu0 %vm466_vm0, %v431_v2  ;;  %6048 = vmatprep.mubr.msk.f32.mxu0 %vm392_vm1, %v423_v12  ;;  %v7106_v17 = vld [vmem:[#allocation2 + $0x31] sm:$0xff]  ;;  %v7112_v19 = vld [vmem:[#allocation2 + $0x41] sm:$0xff]  ;;  %1795 = vst.msk [vmem:[#allocation3 + $0x60] sm:$0xff] %vm1781_vm3, %v6915_v1  ;;  %1797 = vst.msk [vmem:[#allocation3 + $0x70] sm:$0xff] %vm1781_vm3, %v6915_v1 }
  0x26   : > { %6060 = vmatprep.subr.msk.mxu0 %vm466_vm0, %v5380_v14  ;;  %6038 = vmatmul.mubr.msk.f32.vlgmr.msra.gmra.mrb[0].mxu1 %vm392_vm1, %v7106_v17  ;;  %v7125_v21 = vld [vmem:[#allocation2 + $0x30] sm:$0xff]  ;;  %v7129_v23 = vld [vmem:[#allocation2 + $0x40] sm:$0xff]  ;;  %1798 = vst.msk [vmem:[#allocation3 + $0x78] sm:$0x3] %vm1783_vm4, %v6915_v1  ;;  %1800 = vst.msk [vmem:[#allocation3 + $0x88] sm:$0x3] %vm1783_vm4, %v6915_v1  ;;  %p6854_p13 = pneg %p6853_p12 }
  0x27   : > { %6040 = vmatprep.mubr.msk.f32.mxu1 %vm392_vm1, %v7112_v19  ;;  %v7127_v22 = vld [vmem:[#allocation2 + $0x51] sm:$0xff]  ;;  %v7132_v24 = vld [vmem:[#allocation2 + $0x61] sm:$0xff]  ;;  %1799 = vst.msk [vmem:[#allocation3 + $0x80] sm:$0xff] %vm1781_vm3, %v6915_v1  ;;  %1801 = vst.msk [vmem:[#allocation3 + $0x90] sm:$0xff] %vm1781_vm3, %v6915_v1  ;;  %6159 = vmatpush3.msk.msra.mxu1 %vm1855_vm5, %v5451_v48 }
  0x28   : > { %v7142_v25 = vld [vmem:[#allocation2 + $0x50] sm:$0xff]  ;;  %v7146_v27 = vld [vmem:[#allocation2 + $0x60] sm:$0xff]  ;;  %1802 = vst.msk [vmem:[#allocation3 + $0x98] sm:$0x3] %vm1783_vm4, %v6915_v1  ;;  %6172 = vmatprep.subr.msk.mxu1 %vm1855_vm5, %v1820_v54 }
  0x29   : > { %v7144_v26 = vld [vmem:[#allocation2 + $0x71] sm:$0xff]  ;;  %v7159_v31 = vld [vmem:[#allocation2 + $0x22] sm:$0xff]  ;;  %3176 = vst.msk [vmem:[#allocation4 + $0x20] sm:$0xff] %vm3170_vm6, %v6915_v1  ;;  %3171 = vst.msk [vmem:[#allocation4] sm:$0xff] %vm3170_vm6, %v6915_v1 }
  0x2a   : > { %6041 = vmatmul.mubr.msk.f32.gmra.mrb[2].mxu1 %vm392_vm1, %v7127_v22  ;;  %v7154_v28 = vld [vmem:[#allocation2 + $0x70] sm:$0xff]  ;;  %v7170_v34 = vld [vmem:[#allocation2 + $0x42] sm:$0xff]  ;;  %3177 = vst.msk [vmem:[#allocation4 + $0x28] sm:$0x3] %vm3172_vm7, %v6915_v1  ;;  %3173 = vst.msk [vmem:[#allocation4 + $0x8] sm:$0x3] %vm3172_vm7, %v6915_v1 }
  0x2b   : > { %6043 = vmatprep.mubr.msk.f32.mxu1 %vm392_vm1, %v7132_v24  ;;  %v708_v30 = vld [vmem:[#allocation2 + $0x12] sm:$0xff]  ;;  %v7179_v36 = vld [vmem:[#allocation2 + $0x62] sm:$0xff]  ;;  %3174 = vst.msk [vmem:[#allocation4 + $0x10] sm:$0xff] %vm3170_vm6, %v6915_v1  ;;  %3178 = vst.msk [vmem:[#allocation4 + $0x30] sm:$0xff] %vm3170_vm6, %v6915_v1 }
  0x2c   : > { %6049 = vmatmul.mubr.msk.f32.vlgmr.msra.gmra.mrb[0].mxu0 %vm392_vm1, %v424_v16  ;;  %v7168_v33 = vld [vmem:[#allocation2 + $0x32] sm:$0xff]  ;;  %v864_v39 = vld [vmem:[#allocation2 + $0x80] sm:$0xff]  ;;  %3175 = vst.msk [vmem:[#allocation4 + $0x18] sm:$0x3] %vm3172_vm7, %v6915_v1  ;;  %3179 = vst.msk [vmem:[#allocation4 + $0x38] sm:$0x3] %vm3172_vm7, %v6915_v1 }
  0x2d   : > { %6061 = vmatpush3.msk.msra.mxu0 %vm466_vm0, %v5380_v14  ;;  %6051 = vmatprep.mubr.msk.f32.mxu0 %vm392_vm1, %v7110_v18  ;;  %v7177_v35 = vld [vmem:[#allocation2 + $0x52] sm:$0xff]  ;;  %v1014_v41 = vld [vmem:[#allocation2 + $0x81] sm:$0xff]  ;;  %3180 = vst.msk [vmem:[#allocation4 + $0x40] sm:$0xff] %vm3170_vm6, %v6915_v1  ;;  %3182 = vst.msk [vmem:[#allocation4 + $0x50] sm:$0xff] %vm3170_vm6, %v6915_v1 }
  0x2e   : > { %6074 = vmatprep.subr.msk.mxu0 %vm466_vm0, %v5390_v20  ;;  %6044 = vmatmul.mubr.msk.f32.gmra.mrb[4].mxu1 %vm392_vm1, %v7144_v26  ;;  %v7185_v37 = vld [vmem:[#allocation2 + $0x72] sm:$0xff]  ;;  %v1164_v43 = vld [vmem:[#allocation2 + $0x82] sm:$0xff]  ;;  %3181 = vst.msk [vmem:[#allocation4 + $0x48] sm:$0x3] %vm3172_vm7, %v6915_v1  ;;  %3183 = vst.msk [vmem:[#allocation4 + $0x58] sm:$0x3] %vm3172_vm7, %v6915_v1 }
  0x2f   : > { %v1821_v49 = vld [vmem:[#allocation3 + $0x1] sm:$0xff]  ;;  %3184 = vst.msk [vmem:[#allocation4 + $0x60] sm:$0xff] %vm3170_vm6, %v6915_v1  ;;  %3186 = vst.msk [vmem:[#allocation4 + $0x70] sm:$0xff] %vm3170_vm6, %v6915_v1 }
  0x30   : > { %6052 = vmatmul.mubr.msk.f32.gmra.mrb[2].mxu0 %vm392_vm1, %v7125_v21  ;;  %6160 = vmatprep.mubr.msk.f32.mxu1 %vm1781_vm3, %v1821_v49  ;;  %3185 = vst.msk [vmem:[#allocation4 + $0x68] sm:$0x3] %vm3172_vm7, %v6915_v1  ;;  %3187 = vst.msk [vmem:[#allocation4 + $0x78] sm:$0x3] %vm3172_vm7, %v6915_v1 }
  0x31   : > { %6054 = vmatprep.mubr.msk.f32.mxu0 %vm392_vm1, %v7129_v23  ;;  %3188 = vst.msk [vmem:[#allocation4 + $0x80] sm:$0xff] %vm3170_vm6, %v6915_v1  ;;  %3190 = vst.msk [vmem:[#allocation4 + $0x90] sm:$0xff] %vm3170_vm6, %v6915_v1 }
  0x32   : > { %3189 = vst.msk [vmem:[#allocation4 + $0x88] sm:$0x3] %vm3172_vm7, %v6915_v1  ;;  %3191 = vst.msk [vmem:[#allocation4 + $0x98] sm:$0x3] %vm3172_vm7, %v6915_v1 }
  0x34   : > { %6055 = vmatmul.mubr.msk.f32.gmra.mrb[4].mxu0 %vm392_vm1, %v7142_v25 }
  0x35   : > { %6057 = vmatprep.mubr.msk.f32.mxu0 %vm392_vm1, %v7146_v27 }
  0x38   : > { %6058 = vmatmul.mubr.msk.f32.gmra.mrb[6].mxu0 %vm392_vm1, %v7154_v28 }
  0x39   : > { %6062 = vmatprep.mubr.msk.f32.mxu0 %vm392_vm1, %v707_v29 }
  0x3c   : > { %6063 = vmatmul.mubr.msk.f32.vlgmr.msra.gmra.mrb[0].mxu0 %vm392_vm1, %v708_v30 }
  0x3d   : > { %6075 = vmatpush3.msk.msra.mxu0 %vm466_vm0, %v5390_v20  ;;  %6065 = vmatprep.mubr.msk.f32.mxu0 %vm392_vm1, %v7159_v31  ;;  %v5470_v20 = vld [vmem:[%s8375_s3 + $0x8] sm:$0xf] }
  0x3e   : > { %6088 = vmatprep.subr.msk.mxu0 %vm466_vm0, %v5400_v32 }
  0x40   : > { %6066 = vmatmul.mubr.msk.f32.gmra.mrb[2].mxu0 %vm392_vm1, %v7168_v33 }
  0x41   : > { %6068 = vmatprep.mubr.msk.f32.mxu0 %vm392_vm1, %v7170_v34 }
  0x44   : > { %6069 = vmatmul.mubr.msk.f32.gmra.mrb[4].mxu0 %vm392_vm1, %v7177_v35 }
  0x45   : > { %6071 = vmatprep.mubr.msk.f32.mxu0 %vm392_vm1, %v7179_v36 }
  0x48   : > { %6072 = vmatmul.mubr.msk.f32.gmra.mrb[6].mxu0 %vm392_vm1, %v7185_v37 }
  0x49   : > { %6076 = vmatprep.mubr.msk.f32.mxu0 %vm392_vm1, %v424_v16 }
  0x4c   : > { %6077 = vmatmul.mubr.msk.f32.vlgmr.msra.gmra.mrb[0].mxu0 %vm392_vm1, %v7110_v18 }
  0x4d   : > { %6089 = vmatpush3.msk.msra.mxu0 %vm466_vm0, %v5400_v32  ;;  %6079 = vmatprep.mubr.msk.f32.mxu0 %vm392_vm1, %v7125_v21  ;;  %v1812_v32 = vld [vmem:[#allocation3] sm:$0xff] }
  0x4e   : > { %6102 = vmatprep.subr.msk.mxu0 %vm466_vm0, %v5410_v38 }
  0x50   : > { %6080 = vmatmul.mubr.msk.f32.gmra.mrb[2].mxu0 %vm392_vm1, %v7129_v23 }
  0x51   : > { %6082 = vmatprep.mubr.msk.f32.mxu0 %vm392_vm1, %v7142_v25 }
  0x54   : > { %6083 = vmatmul.mubr.msk.f32.gmra.mrb[4].mxu0 %vm392_vm1, %v7146_v27 }
  0x55   : > { %6085 = vmatprep.mubr.msk.f32.mxu0 %vm392_vm1, %v7154_v28 }
  0x58   : > { %6086 = vmatmul.mubr.msk.f32.gmra.mrb[6].mxu0 %vm392_vm1, %v864_v39 }
  0x59   : > { %6090 = vmatprep.mubr.msk.f32.mxu0 %vm392_vm1, %v7094_v13 }
  0x5c   : > { %6091 = vmatmul.mubr.msk.f32.vlgmr.msra.gmra.mrb[0].mxu0 %vm392_vm1, %v7104_v15 }
  0x5d   : > { %6103 = vmatpush3.msk.msra.mxu0 %vm466_vm0, %v5410_v38  ;;  %6093 = vmatprep.mubr.msk.f32.mxu0 %vm392_vm1, %v7106_v17  ;;  %v5480_v38 = vld [vmem:[%s8375_s3 + $0xc] sm:$0xf] }
  0x5e   : > { %6116 = vmatprep.subr.msk.mxu0 %vm466_vm0, %v5420_v40 }
  0x60   : > { %6094 = vmatmul.mubr.msk.f32.gmra.mrb[2].mxu0 %vm392_vm1, %v7112_v19 }
  0x61   : > { %6096 = vmatprep.mubr.msk.f32.mxu0 %vm392_vm1, %v7127_v22 }
  0x64   : > { %6097 = vmatmul.mubr.msk.f32.gmra.mrb[4].mxu0 %vm392_vm1, %v7132_v24 }
  0x65   : > { %6099 = vmatprep.mubr.msk.f32.mxu0 %vm392_vm1, %v7144_v26 }
  0x68   : > { %6100 = vmatmul.mubr.msk.f32.gmra.mrb[6].mxu0 %vm392_vm1, %v1014_v41 }
  0x69   : > { %6104 = vmatprep.mubr.msk.f32.mxu0 %vm392_vm1, %v708_v30 }
  0x6c   : > { %6105 = vmatmul.mubr.msk.f32.vlgmr.msra.gmra.mrb[0].mxu0 %vm392_vm1, %v7159_v31 }
  0x6d   : > { %6117 = vmatpush3.msk.msra.mxu0 %vm466_vm0, %v5420_v40  ;;  %6107 = vmatprep.mubr.msk.f32.mxu0 %vm392_vm1, %v7168_v33 }
  0x6e   : > { %6130 = vmatprep.subr.msk.mxu0 %vm466_vm0, %v5430_v42 }
  0x70   : > { %6108 = vmatmul.mubr.msk.f32.gmra.mrb[2].mxu0 %vm392_vm1, %v7170_v34 }
  0x71   : > { %6110 = vmatprep.mubr.msk.f32.mxu0 %vm392_vm1, %v7177_v35 }
  0x74   : > { %6111 = vmatmul.mubr.msk.f32.gmra.mrb[4].mxu0 %vm392_vm1, %v7179_v36 }
  0x75   : > { %6113 = vmatprep.mubr.msk.f32.mxu0 %vm392_vm1, %v7185_v37 }
  0x78   : > { %6114 = vmatmul.mubr.msk.f32.gmra.mrb[6].mxu0 %vm392_vm1, %v1164_v43 }
  0x79   : > { %6118 = vmatprep.mubr.msk.f32.mxu0 %vm392_vm1, %v7110_v18 }
  0x7c   : > { %6119 = vmatmul.mubr.msk.f32.vlgmr.msra.gmra.mrb[0].mxu0 %vm392_vm1, %v7125_v21 }
  0x7d   : > { %6131 = vmatpush3.msk.msra.mxu0 %vm466_vm0, %v5430_v42  ;;  %6121 = vmatprep.mubr.msk.f32.mxu0 %vm392_vm1, %v7129_v23 }
  0x7e   : > { %6144 = vmatprep.subr.msk.mxu0 %vm466_vm0, %v5440_v44 }
  0x80   : > { %6122 = vmatmul.mubr.msk.f32.gmra.mrb[2].mxu0 %vm392_vm1, %v7142_v25 }
  0x81   : > { %6124 = vmatprep.mubr.msk.f32.mxu0 %vm392_vm1, %v7146_v27 }
  0x84   : > { %6125 = vmatmul.mubr.msk.f32.gmra.mrb[4].mxu0 %vm392_vm1, %v7154_v28 }
  0x85   : > { %6127 = vmatprep.mubr.msk.f32.mxu0 %vm392_vm1, %v864_v39 }
  0x88   : > { %6128 = vmatmul.mubr.msk.f32.gmra.mrb[6].mxu0 %vm392_vm1, %v1315_v45 }
  0x89   : > { %6132 = vmatprep.mubr.msk.f32.mxu0 %vm392_vm1, %v7104_v15 }
  0x8c   : > { %6133 = vmatmul.mubr.msk.f32.vlgmr.msra.gmra.mrb[0].mxu0 %vm392_vm1, %v7106_v17 }
  0x8d   : > { %6145 = vmatpush3.msk.msra.mxu0 %vm466_vm0, %v5440_v44  ;;  %6135 = vmatprep.mubr.msk.f32.mxu0 %vm392_vm1, %v7112_v19  ;;  %v2096_v44 = vld [vmem:[#allocation3 + $0x2] sm:$0xff] }
  0x90   : > { %6136 = vmatmul.mubr.msk.f32.gmra.mrb[2].mxu0 %vm392_vm1, %v7127_v22 }
  0x91   : > { %6138 = vmatprep.mubr.msk.f32.mxu0 %vm392_vm1, %v7132_v24 }
  0x94   : > { %6139 = vmatmul.mubr.msk.f32.gmra.mrb[4].mxu0 %vm392_vm1, %v7144_v26 }
  0x95   : > { %6141 = vmatprep.mubr.msk.f32.mxu0 %vm392_vm1, %v1014_v41 }
  0x98   : > { %6142 = vmatmul.mubr.msk.f32.gmra.mrb[6].mxu0 %vm392_vm1, %v1465_v46 }
  0x99   : > { %6146 = vmatprep.mubr.msk.f32.mxu0 %vm392_vm1, %v7159_v31 }
  0x9c   : > { %6147 = vmatmul.mubr.msk.f32.vlgmr.msra.gmra.mrb[0].mxu0 %vm392_vm1, %v7168_v33 }
  0x9d   : > { %6149 = vmatprep.mubr.msk.f32.mxu0 %vm392_vm1, %v7170_v34  ;;  %v5541_v34 = vld [vmem:[%s8377_s5 + $0x10] sm:$0xff] }
  0xa0   : > { %6150 = vmatmul.mubr.msk.f32.gmra.mrb[2].mxu0 %vm392_vm1, %v7177_v35  ;;  %v5542_v35 = vld [vmem:[%s8377_s5 + $0x18] sm:$0xff] }
  0xa1   : > { %6152 = vmatprep.mubr.msk.f32.mxu0 %vm392_vm1, %v7179_v36  ;;  %v6439_v36 = vpack.c.bf16 %v5542_v35, %v5541_v34 }
  0xa3   : > { %6440 = vmatprep.subr.bf16.mxu0 %v6439_v36 }
  0xa4   : > { %6153 = vmatmul.mubr.msk.f32.gmra.mrb[4].mxu0 %vm392_vm1, %v7185_v37 }
  0xa5   : > { %6155 = vmatprep.mubr.msk.f32.mxu0 %vm392_vm1, %v1164_v43  ;;  %6442 = vmatpush3.bf16.msra.mxu0 %v6439_v36 }
  0xa8   : > { %6156 = vmatmul.mubr.msk.f32.gmra.mrb[6].mxu0 %vm392_vm1, %v1615_v47  ;;  %v5490_v47 = vld [vmem:[%s8375_s3 + $0x10] sm:$0xf] }
  0xf9   : > { %v6039_v50 = vpop.f32.mrb[0].mxu1 }
  0xfa   : > { %v546_v51 = vpop.f32.mrb[1].mxu1 }
  0xfd   : > { %v6042_v52 = vpop.f32.mrb[2].mxu1 }
  0xfe   : > { %v556_v53 = vpop.f32.mrb[3].mxu1 }
 0x101   : > { %v6045_v55 = vpop.f32.mrb[4].mxu1 }
 0x102   : > { %v566_v56 = vpop.f32.mrb[5].mxu1 }
 0x16f   : > { %v6148_v58 = vpop.f32.mrb[0].mxu0 }
 0x170   : > { %v1766_v59 = vadd.f32 %v6148_v58, %v5450_v57  ;;  %v1711_v60 = vpop.f32.mrb[1].mxu0  ;;  %v5520_v58 = vld [vmem:[%s8375_s3 + $0x1c] sm:$0xf] }
 0x171   : > { %v1765_v61 = vadd.f32 %v5450_v57, %v1711_v60  ;;  %v5530_v60 = vld [vmem:[%s8375_s3 + $0x20] sm:$0xf] }
 0x172   : > { %v1774_v62 = vmax.f32 %v1766_v59, 0.0 }
 0x173   : > { %v1773_v63 = vmax.f32 %v1765_v61, 0.0  ;;  %v6151_v0 = vpop.f32.mrb[2].mxu0  ;;  %v2704_v61 = vld [vmem:[#allocation3 + $0x90] sm:$0xff] }
 0x174   : > { %1805 = vst.msk [vmem:[#allocation3 + $0x21] sm:$0xff] %vm1781_vm3, %v1774_v62  ;;  %v6611_v2 = vadd.f32 %v6151_v0, %v6039_v50  ;;  %v1721_v3 = vpop.f32.mrb[3].mxu0  ;;  %v2854_v62 = vld [vmem:[#allocation3 + $0x91] sm:$0xff]  ;;  %v3211_v0 = vld [vmem:[#allocation4 + $0x1] sm:$0xff] }
 0x175   : > { %1804 = vst.msk [vmem:[#allocation3 + $0x11] sm:$0xff] %vm1781_vm3, %v1773_v63  ;;  %v6612_v4 = vadd.f32 %v1721_v3, %v546_v51  ;;  %v3004_v63 = vld [vmem:[#allocation3 + $0x92] sm:$0xff]  ;;  %6288 = vmatprep.mubr.msk.f32.mxu0 %vm3170_vm6, %v3211_v0  ;;  %v3210_v3 = vld [vmem:[%s8377_s5 + $0x8] sm:$0xff] }
 0x176   : > { %v1768_v5 = vadd.f32 %v6611_v2, %v5450_v57  ;;  %v3209_v2 = vld [vmem:[%s8377_s5] sm:$0xff] }
 0x177   : > { %v1767_v6 = vadd.f32 %v6612_v4, %v5450_v57  ;;  %v6154_v7 = vpop.f32.mrb[4].mxu0  ;;  %v6443_v4 = vpack.c.bf16 %v3210_v3, %v3209_v2  ;;  %v5599_v3 = vld [vmem:[%s8377_s5 + $0x60] sm:$0xff] }
 0x178   : > { %v1776_v8 = vmax.f32 %v1768_v5, 0.0  ;;  %v6613_v9 = vadd.f32 %v6154_v7, %v6042_v52  ;;  %v1731_v10 = vpop.f32.mrb[5].mxu0  ;;  %v5540_v5 = vld [vmem:[%s8376_s4] ss:$0 sm:$0xff] }
 0x179   : > { %v1775_v11 = vmax.f32 %v1767_v6, 0.0  ;;  %v6614_v12 = vadd.f32 %v1731_v10, %v556_v53  ;;  %6444 = vmatprep.subr.bf16.mxu0 %v6443_v4 }
 0x17a   : > { %1807 = vst.msk [vmem:[#allocation3 + $0x41] sm:$0xff] %vm1781_vm3, %v1776_v8  ;;  %v1770_v13 = vadd.f32 %v6613_v9, %v5450_v57 }
 0x17b   : > { %1806 = vst.msk [vmem:[#allocation3 + $0x31] sm:$0xff] %vm1781_vm3, %v1775_v11  ;;  %v1769_v14 = vadd.f32 %v6614_v12, %v5450_v57  ;;  %v6157_v15 = vpop.f32.mrb[6].mxu0  ;;  %v7359_v23 = vld [vmem:[#allocation3 + $0x21] sm:$0xff] }
 0x17c   : > { %v1778_v16 = vmax.f32 %v1770_v13, 0.0  ;;  %v6615_v17 = vadd.f32 %v6157_v15, %v6045_v55  ;;  %v1741_v18 = vpop.f32.mrb[7].mxu0  ;;  %v7352_v19 = vld [vmem:[#allocation3 + $0x11] sm:$0xff]  ;;  %v7400_v39 = vld [vmem:[#allocation3 + $0x20] sm:$0xff] }
 0x17d   : > { %v1777_v21 = vmax.f32 %v1769_v14, 0.0  ;;  %v6616_v22 = vadd.f32 %v1741_v18, %v566_v56  ;;  %6161 = vmatmul.mubr.msk.f32.vlgmr.msra.gmra.mrb[6].mxu1 %vm1781_vm3, %v7352_v19  ;;  %v1813_v37 = vld [vmem:[#allocation3 + $0x10] sm:$0xff]  ;;  %v7431_v48 = vld [vmem:[#allocation3 + $0x22] sm:$0xff]  ;;  %v5510_v56 = vld [vmem:[%s8375_s3 + $0x18] sm:$0xf] }
 0x17e   : > { %1809 = vst.msk [vmem:[#allocation3 + $0x61] sm:$0xff] %vm1781_vm3, %v1778_v16  ;;  %v1772_v24 = vadd.f32 %v6615_v17, %v5450_v57  ;;  %6163 = vmatprep.mubr.msk.f32.mxu1 %vm1781_vm3, %v7359_v23  ;;  %6173 = vmatpush3.msk.msra.mxu1 %vm1855_vm5, %v1820_v54  ;;  %v2097_v46 = vld [vmem:[#allocation3 + $0x12] sm:$0xff] }
 0x17f   : > { %1808 = vst.msk [vmem:[#allocation3 + $0x51] sm:$0xff] %vm1781_vm3, %v1777_v21  ;;  %v1771_v25 = vadd.f32 %v6616_v22, %v5450_v57  ;;  %6186 = vmatprep.subr.msk.mxu1 %vm1855_vm5, %v5470_v20  ;;  %v5500_v54 = vld [vmem:[%s8375_s3 + $0x14] sm:$0xf]  ;;  %v5559_v21 = vld [vmem:[%s8377_s5 + $0x20] sm:$0xff]  ;;  %v5560_v22 = vld [vmem:[%s8377_s5 + $0x28] sm:$0xff] }
 0x180   : > { %v1780_v26 = vmax.f32 %v1772_v24, 0.0 }
 0x181   : > { %v1779_v27 = vmax.f32 %v1771_v25, 0.0  ;;  %v7373_v29 = vld [vmem:[#allocation3 + $0x41] sm:$0xff] }
 0x182   : > { %1811 = vst.msk [vmem:[#allocation3 + $0x81] sm:$0xff] %vm1781_vm3, %v1780_v26  ;;  %v7368_v28 = vld [vmem:[#allocation3 + $0x31] sm:$0xff]  ;;  %v7410_v41 = vld [vmem:[#allocation3 + $0x40] sm:$0xff] }
 0x183   : > { %1810 = vst.msk [vmem:[#allocation3 + $0x71] sm:$0xff] %vm1781_vm3, %v1779_v27  ;;  %6164 = vmatmul.mubr.msk.f32.gmra.mrb[8].mxu1 %vm1781_vm3, %v7368_v28  ;;  %v7406_v40 = vld [vmem:[#allocation3 + $0x30] sm:$0xff]  ;;  %v7441_v50 = vld [vmem:[#allocation3 + $0x42] sm:$0xff]  ;;  %v6447_v27 = vpack.c.bf16 %v5560_v22, %v5559_v21 }
 0x184   : > { %6166 = vmatprep.mubr.msk.f32.mxu1 %vm1781_vm3, %v7373_v29  ;;  %v7437_v49 = vld [vmem:[#allocation3 + $0x32] sm:$0xff]  ;;  %v4741_v21 = vld [vmem:[%s8379_s7 + $0x8] sm:$0xff] }
 0x185   : > { %v7381_v31 = vld [vmem:[#allocation3 + $0x61] sm:$0xff]  ;;  %v4758_v22 = vld [vmem:[%s8379_s7 + $0x90] sm:$0xff] }
 0x186   : > { %v7377_v30 = vld [vmem:[#allocation3 + $0x51] sm:$0xff]  ;;  %v7418_v43 = vld [vmem:[#allocation3 + $0x60] sm:$0xff] }
 0x187   : > { %6167 = vmatmul.mubr.msk.f32.gmra.mrb[10].mxu1 %vm1781_vm3, %v7377_v30  ;;  %v7414_v42 = vld [vmem:[#allocation3 + $0x50] sm:$0xff]  ;;  %v7449_v52 = vld [vmem:[#allocation3 + $0x62] sm:$0xff] }
 0x188   : > { %6169 = vmatprep.mubr.msk.f32.mxu1 %vm1781_vm3, %v7381_v31  ;;  %v7445_v51 = vld [vmem:[#allocation3 + $0x52] sm:$0xff] }
 0x189   : > { %v2253_v55 = vld [vmem:[#allocation3 + $0x80] sm:$0xff] }
 0x18a   : > { %v7385_v33 = vld [vmem:[#allocation3 + $0x71] sm:$0xff]  ;;  %v2403_v57 = vld [vmem:[#allocation3 + $0x81] sm:$0xff] }
 0x18b   : > { %6170 = vmatmul.mubr.msk.f32.gmra.mrb[12].mxu1 %vm1781_vm3, %v7385_v33  ;;  %v7422_v45 = vld [vmem:[#allocation3 + $0x70] sm:$0xff]  ;;  %v2553_v59 = vld [vmem:[#allocation3 + $0x82] sm:$0xff] }
 0x18c   : > { %6174 = vmatprep.mubr.msk.f32.mxu1 %vm1781_vm3, %v1812_v32  ;;  %v7453_v53 = vld [vmem:[#allocation3 + $0x72] sm:$0xff] }
 0x18f   : > { %6175 = vmatmul.mubr.msk.f32.vlgmr.msra.gmra.mrb[6].mxu1 %vm1781_vm3, %v1813_v37 }
 0x190   : > { %6187 = vmatpush3.msk.msra.mxu1 %vm1855_vm5, %v5470_v20  ;;  %6177 = vmatprep.mubr.msk.f32.mxu1 %vm1781_vm3, %v7400_v39 }
 0x191   : > { %6200 = vmatprep.subr.msk.mxu1 %vm1855_vm5, %v5480_v38 }
 0x193   : > { %6178 = vmatmul.mubr.msk.f32.gmra.mrb[8].mxu1 %vm1781_vm3, %v7406_v40 }
 0x194   : > { %6180 = vmatprep.mubr.msk.f32.mxu1 %vm1781_vm3, %v7410_v41 }
 0x197   : > { %6181 = vmatmul.mubr.msk.f32.gmra.mrb[10].mxu1 %vm1781_vm3, %v7414_v42 }
 0x198   : > { %6183 = vmatprep.mubr.msk.f32.mxu1 %vm1781_vm3, %v7418_v43 }
 0x19b   : > { %6184 = vmatmul.mubr.msk.f32.gmra.mrb[12].mxu1 %vm1781_vm3, %v7422_v45 }
 0x19c   : > { %6188 = vmatprep.mubr.msk.f32.mxu1 %vm1781_vm3, %v2096_v44 }
 0x19f   : > { %6189 = vmatmul.mubr.msk.f32.vlgmr.msra.gmra.mrb[6].mxu1 %vm1781_vm3, %v2097_v46 }
 0x1a0   : > { %6201 = vmatpush3.msk.msra.mxu1 %vm1855_vm5, %v5480_v38  ;;  %6191 = vmatprep.mubr.msk.f32.mxu1 %vm1781_vm3, %v7431_v48 }
 0x1a1   : > { %6214 = vmatprep.subr.msk.mxu1 %vm1855_vm5, %v5490_v47 }
 0x1a3   : > { %6192 = vmatmul.mubr.msk.f32.gmra.mrb[8].mxu1 %vm1781_vm3, %v7437_v49 }
 0x1a4   : > { %6194 = vmatprep.mubr.msk.f32.mxu1 %vm1781_vm3, %v7441_v50 }
 0x1a7   : > { %6195 = vmatmul.mubr.msk.f32.gmra.mrb[10].mxu1 %vm1781_vm3, %v7445_v51 }
 0x1a8   : > { %6197 = vmatprep.mubr.msk.f32.mxu1 %vm1781_vm3, %v7449_v52 }
 0x1ab   : > { %6198 = vmatmul.mubr.msk.f32.gmra.mrb[12].mxu1 %vm1781_vm3, %v7453_v53 }
 0x1ac   : > { %6202 = vmatprep.mubr.msk.f32.mxu1 %vm1781_vm3, %v1813_v37 }
 0x1af   : > { %6203 = vmatmul.mubr.msk.f32.vlgmr.msra.gmra.mrb[6].mxu1 %vm1781_vm3, %v7400_v39 }
 0x1b0   : > { %6215 = vmatpush3.msk.msra.mxu1 %vm1855_vm5, %v5490_v47  ;;  %6205 = vmatprep.mubr.msk.f32.mxu1 %vm1781_vm3, %v7406_v40 }
 0x1b1   : > { %6228 = vmatprep.subr.msk.mxu1 %vm1855_vm5, %v5500_v54 }
 0x1b3   : > { %6206 = vmatmul.mubr.msk.f32.gmra.mrb[8].mxu1 %vm1781_vm3, %v7410_v41 }
 0x1b4   : > { %6208 = vmatprep.mubr.msk.f32.mxu1 %vm1781_vm3, %v7414_v42 }
 0x1b7   : > { %6209 = vmatmul.mubr.msk.f32.gmra.mrb[10].mxu1 %vm1781_vm3, %v7418_v43 }
 0x1b8   : > { %6211 = vmatprep.mubr.msk.f32.mxu1 %vm1781_vm3, %v7422_v45 }
 0x1bb   : > { %6212 = vmatmul.mubr.msk.f32.gmra.mrb[12].mxu1 %vm1781_vm3, %v2253_v55 }
 0x1bc   : > { %6216 = vmatprep.mubr.msk.f32.mxu1 %vm1781_vm3, %v7352_v19 }
 0x1bf   : > { %6217 = vmatmul.mubr.msk.f32.vlgmr.msra.gmra.mrb[6].mxu1 %vm1781_vm3, %v7359_v23 }
 0x1c0   : > { %6229 = vmatpush3.msk.msra.mxu1 %vm1855_vm5, %v5500_v54  ;;  %6219 = vmatprep.mubr.msk.f32.mxu1 %vm1781_vm3, %v7368_v28 }
 0x1c1   : > { %6242 = vmatprep.subr.msk.mxu1 %vm1855_vm5, %v5510_v56 }
 0x1c3   : > { %6220 = vmatmul.mubr.msk.f32.gmra.mrb[8].mxu1 %vm1781_vm3, %v7373_v29 }
 0x1c4   : > { %6222 = vmatprep.mubr.msk.f32.mxu1 %vm1781_vm3, %v7377_v30 }
 0x1c7   : > { %6223 = vmatmul.mubr.msk.f32.gmra.mrb[10].mxu1 %vm1781_vm3, %v7381_v31 }
 0x1c8   : > { %6225 = vmatprep.mubr.msk.f32.mxu1 %vm1781_vm3, %v7385_v33 }
 0x1cb   : > { %6226 = vmatmul.mubr.msk.f32.gmra.mrb[12].mxu1 %vm1781_vm3, %v2403_v57 }
 0x1cc   : > { %6230 = vmatprep.mubr.msk.f32.mxu1 %vm1781_vm3, %v2097_v46 }
 0x1cf   : > { %6231 = vmatmul.mubr.msk.f32.vlgmr.msra.gmra.mrb[6].mxu1 %vm1781_vm3, %v7431_v48 }
 0x1d0   : > { %6243 = vmatpush3.msk.msra.mxu1 %vm1855_vm5, %v5510_v56  ;;  %6233 = vmatprep.mubr.msk.f32.mxu1 %vm1781_vm3, %v7437_v49 }
 0x1d1   : > { %6256 = vmatprep.subr.msk.mxu1 %vm1855_vm5, %v5520_v58 }
 0x1d3   : > { %6234 = vmatmul.mubr.msk.f32.gmra.mrb[8].mxu1 %vm1781_vm3, %v7441_v50 }
 0x1d4   : > { %6236 = vmatprep.mubr.msk.f32.mxu1 %vm1781_vm3, %v7445_v51 }
 0x1d7   : > { %6237 = vmatmul.mubr.msk.f32.gmra.mrb[10].mxu1 %vm1781_vm3, %v7449_v52 }
 0x1d8   : > { %6239 = vmatprep.mubr.msk.f32.mxu1 %vm1781_vm3, %v7453_v53 }
 0x1db   : > { %6240 = vmatmul.mubr.msk.f32.gmra.mrb[12].mxu1 %vm1781_vm3, %v2553_v59 }
 0x1dc   : > { %6244 = vmatprep.mubr.msk.f32.mxu1 %vm1781_vm3, %v7400_v39  ;;  %v3201_v39 = vld [vmem:[#allocation4] sm:$0xff] }
 0x1df   : > { %6245 = vmatmul.mubr.msk.f32.vlgmr.msra.gmra.mrb[6].mxu1 %vm1781_vm3, %v7406_v40 }
 0x1e0   : > { %6257 = vmatpush3.msk.msra.mxu1 %vm1855_vm5, %v5520_v58  ;;  %6247 = vmatprep.mubr.msk.f32.mxu1 %vm1781_vm3, %v7410_v41  ;;  %v5569_v41 = vld [vmem:[%s8377_s5 + $0x30] sm:$0xff] }
 0x1e1   : > { %6270 = vmatprep.subr.msk.mxu1 %vm1855_vm5, %v5530_v60 }
 0x1e3   : > { %6248 = vmatmul.mubr.msk.f32.gmra.mrb[8].mxu1 %vm1781_vm3, %v7414_v42  ;;  %v5570_v42 = vld [vmem:[%s8377_s5 + $0x38] sm:$0xff] }
 0x1e4   : > { %6250 = vmatprep.mubr.msk.f32.mxu1 %vm1781_vm3, %v7418_v43  ;;  %v6451_v43 = vpack.c.bf16 %v5570_v42, %v5569_v41 }
 0x1e7   : > { %6251 = vmatmul.mubr.msk.f32.gmra.mrb[10].mxu1 %vm1781_vm3, %v7422_v45 }
 0x1e8   : > { %6253 = vmatprep.mubr.msk.f32.mxu1 %vm1781_vm3, %v2253_v55 }
 0x1eb   : > { %6254 = vmatmul.mubr.msk.f32.gmra.mrb[12].mxu1 %vm1781_vm3, %v2704_v61 }
 0x1ec   : > { %6258 = vmatprep.mubr.msk.f32.mxu1 %vm1781_vm3, %v7359_v23 }
 0x1ef   : > { %6259 = vmatmul.mubr.msk.f32.vlgmr.msra.gmra.mrb[6].mxu1 %vm1781_vm3, %v7368_v28 }
 0x1f0   : > { %6271 = vmatpush3.msk.msra.mxu1 %vm1855_vm5, %v5530_v60  ;;  %6261 = vmatprep.mubr.msk.f32.mxu1 %vm1781_vm3, %v7373_v29 }
 0x1f3   : > { %6262 = vmatmul.mubr.msk.f32.gmra.mrb[8].mxu1 %vm1781_vm3, %v7377_v30 }
 0x1f4   : > { %6264 = vmatprep.mubr.msk.f32.mxu1 %vm1781_vm3, %v7381_v31 }
 0x1f7   : > { %6265 = vmatmul.mubr.msk.f32.gmra.mrb[10].mxu1 %vm1781_vm3, %v7385_v33 }
 0x1f8   : > { %6267 = vmatprep.mubr.msk.f32.mxu1 %vm1781_vm3, %v2403_v57 }
 0x1fb   : > { %6268 = vmatmul.mubr.msk.f32.gmra.mrb[12].mxu1 %vm1781_vm3, %v2854_v62  ;;  %v5589_v62 = vld [vmem:[%s8377_s5 + $0x50] sm:$0xff] }
 0x1fc   : > { %6272 = vmatprep.mubr.msk.f32.mxu1 %vm1781_vm3, %v7431_v48 }
 0x1ff   : > { %6273 = vmatmul.mubr.msk.f32.vlgmr.msra.gmra.mrb[6].mxu1 %vm1781_vm3, %v7437_v49 }
 0x200   : > { %6275 = vmatprep.mubr.msk.f32.mxu1 %vm1781_vm3, %v7441_v50  ;;  %v3480_v50 = vld [vmem:[#allocation4 + $0x2] sm:$0xff] }
 0x203   : > { %6276 = vmatmul.mubr.msk.f32.gmra.mrb[8].mxu1 %vm1781_vm3, %v7445_v51 }
 0x204   : > { %6278 = vmatprep.mubr.msk.f32.mxu1 %vm1781_vm3, %v7449_v52  ;;  %v5579_v52 = vld [vmem:[%s8377_s5 + $0x40] sm:$0xff] }
 0x207   : > { %6279 = vmatmul.mubr.msk.f32.gmra.mrb[10].mxu1 %vm1781_vm3, %v7453_v53  ;;  %v5580_v53 = vld [vmem:[%s8377_s5 + $0x48] sm:$0xff] }
 0x208   : > { %6281 = vmatprep.mubr.msk.f32.mxu1 %vm1781_vm3, %v2553_v59  ;;  %v6455_v54 = vpack.c.bf16 %v5580_v53, %v5579_v52 }
 0x20b   : > { %6282 = vmatmul.mubr.msk.f32.gmra.mrb[12].mxu1 %vm1781_vm3, %v3004_v63  ;;  %v5590_v63 = vld [vmem:[%s8377_s5 + $0x58] sm:$0xff] }
 0x20c   : > { %v6459_v0 = vpack.c.bf16 %v5590_v63, %v5589_v62 }
 0x2d2   : > { %v6274_v6 = vpop.f32.mrb[6].mxu1 }
 0x2d3   : > { %v3155_v7 = vadd.f32 %v6274_v6, %v5540_v5  ;;  %v3100_v8 = vpop.f32.mrb[7].mxu1 }
 0x2d4   : > { %v3154_v9 = vadd.f32 %v5540_v5, %v3100_v8  ;;  %v5610_v8 = vld [vmem:[%s8377_s5 + $0x78] sm:$0xff] }
 0x2d5   : > { %v3163_v10 = vmax.f32 %v3155_v7, 0.0  ;;  %v5609_v7 = vld [vmem:[%s8377_s5 + $0x70] sm:$0xff] }
 0x2d6   : > { %v3162_v11 = vmax.f32 %v3154_v9, 0.0  ;;  %v6277_v12 = vpop.f32.mrb[8].mxu1  ;;  %v6467_v9 = vpack.c.bf16 %v5610_v8, %v5609_v7 }
 0x2d7   : > { %3194 = vst.msk [vmem:[#allocation4 + $0x21] sm:$0xff] %vm3170_vm6, %v3163_v10  ;;  %v3157_v13 = vadd.f32 %v6277_v12, %v5540_v5  ;;  %v3110_v14 = vpop.f32.mrb[9].mxu1  ;;  %v5620_v12 = vld [vmem:[%s8377_s5 + $0x88] sm:$0xff] }
 0x2d8   : > { %3193 = vst.msk [vmem:[#allocation4 + $0x11] sm:$0xff] %vm3170_vm6, %v3162_v11  ;;  %v3156_v15 = vadd.f32 %v5540_v5, %v3110_v14  ;;  %v5619_v11 = vld [vmem:[%s8377_s5 + $0x80] sm:$0xff]  ;;  %v4080_v14 = vld [vmem:[#allocation4 + $0x90] sm:$0xff] }
 0x2d9   : > { %v3165_v16 = vmax.f32 %v3157_v13, 0.0  ;;  %v6471_v13 = vpack.c.bf16 %v5620_v12, %v5619_v11 }
 0x2da   : > { %v3164_v17 = vmax.f32 %v3156_v15, 0.0  ;;  %v6280_v18 = vpop.f32.mrb[10].mxu1  ;;  %v4228_v15 = vld [vmem:[#allocation4 + $0x91] sm:$0xff] }
 0x2db   : > { %3196 = vst.msk [vmem:[#allocation4 + $0x41] sm:$0xff] %vm3170_vm6, %v3165_v16  ;;  %v3159_v19 = vadd.f32 %v6280_v18, %v5540_v5  ;;  %v3120_v20 = vpop.f32.mrb[11].mxu1  ;;  %v4376_v16 = vld [vmem:[#allocation4 + $0x92] sm:$0xff]  ;;  %v4757_v18 = vld [vmem:[%s8379_s7 + $0x88] sm:$0xff] }
 0x2dc   : > { %3195 = vst.msk [vmem:[#allocation4 + $0x31] sm:$0xff] %vm3170_vm6, %v3164_v17  ;;  %v3158_v23 = vadd.f32 %v5540_v5, %v3120_v20  ;;  %v4756_v17 = vld [vmem:[%s8379_s7 + $0x80] sm:$0xff] }
 0x2dd   : > { %v3167_v24 = vmax.f32 %v3159_v19, 0.0  ;;  %v4740_v19 = vld [vmem:[%s8379_s7] sm:$0xff]  ;;  %v6475_v20 = vpack.c.bf16 %v4757_v18, %v4756_v17 }
 0x2de   : > { %v3166_v25 = vmax.f32 %v3158_v23, 0.0  ;;  %v6283_v26 = vpop.f32.mrb[12].mxu1  ;;  %v7629_v32 = vld [vmem:[#allocation4 + $0x21] sm:$0xff]  ;;  %v4759_v23 = vld [vmem:[%s8379_s7 + $0x98] sm:$0xff] }
 0x2df   : > { %3198 = vst.msk [vmem:[#allocation4 + $0x61] sm:$0xff] %vm3170_vm6, %v3167_v24  ;;  %v3161_v28 = vadd.f32 %v6283_v26, %v5540_v5  ;;  %v3130_v29 = vpop.f32.mrb[13].mxu1  ;;  %v7624_v30 = vld [vmem:[#allocation4 + $0x11] sm:$0xff]  ;;  %v7663_v45 = vld [vmem:[#allocation4 + $0x20] sm:$0xff]  ;;  %v6477_v24 = vpack.c.bf16 %v4741_v21, %v4740_v19  ;;  %6476 = vmatprep.subr.bf16.mxu1 %v6475_v20  ;;  %v4749_v21 = vld [vmem:[%s8379_s7 + $0x48] sm:$0xff] }
 0x2e0   : > { %3197 = vst.msk [vmem:[#allocation4 + $0x51] sm:$0xff] %vm3170_vm6, %v3166_v25  ;;  %v3160_v31 = vadd.f32 %v5540_v5, %v3130_v29  ;;  %6289 = vmatmul.mubr.msk.f32.vlgmr.msra.gmra.mrb[8].mxu0 %vm3170_vm6, %v7624_v30  ;;  %v3202_v44 = vld [vmem:[#allocation4 + $0x10] sm:$0xff]  ;;  %v7695_v56 = vld [vmem:[#allocation4 + $0x22] sm:$0xff]  ;;  %v6479_v25 = vpack.c.bf16 %v4759_v23, %v4758_v22  ;;  %v5629_v29 = vld [vmem:[%s8378_s6] ss:$0 sm:$0xff] }
 0x2e1   : > { %v3169_v33 = vmax.f32 %v3161_v28, 0.0  ;;  %6446 = vmatpush3.bf16.msra.mxu0 %v6443_v4  ;;  %6291 = vmatprep.mubr.msk.f32.mxu0 %vm3170_vm6, %v7629_v32  ;;  %v3481_v55 = vld [vmem:[#allocation4 + $0x12] sm:$0xff]  ;;  %v5600_v4 = vld [vmem:[%s8377_s5 + $0x68] sm:$0xff]  ;;  %v4748_v20 = vld [vmem:[%s8379_s7 + $0x40] sm:$0xff] }
 0x2e2   : > { %v3168_v34 = vmax.f32 %v3160_v31, 0.0  ;;  %6448 = vmatprep.subr.bf16.mxu0 %v6447_v27  ;;  %v7639_v36 = vld [vmem:[#allocation4 + $0x41] sm:$0xff]  ;;  %v6463_v5 = vpack.c.bf16 %v5600_v4, %v5599_v3  ;;  %v4742_v26 = vld [vmem:[%s8379_s7 + $0x10] sm:$0xff]  ;;  %6478 = vmatpush3.bf16.msra.mxu1 %v6477_v24  ;;  %v4545_v31 = vlaneseq  ;;  %v4747_v4 = vld [vmem:[%s8379_s7 + $0x38] sm:$0xff] }
 0x2e3   : > { %3200 = vst.msk [vmem:[#allocation4 + $0x81] sm:$0xff] %vm3170_vm6, %v3169_v33  ;;  %v7634_v35 = vld [vmem:[#allocation4 + $0x31] sm:$0xff]  ;;  %v7671_v47 = vld [vmem:[#allocation4 + $0x40] sm:$0xff]  ;;  %6480 = vmatprep.subr.bf16.mxu1 %v6479_v25  ;;  %v6493_v25 = vpack.c.bf16 %v4749_v21, %v4748_v20 }
 0x2e4   : > { %3199 = vst.msk [vmem:[#allocation4 + $0x71] sm:$0xff] %vm3170_vm6, %v3168_v34  ;;  %6292 = vmatmul.mubr.msk.f32.gmra.mrb[10].mxu0 %vm3170_vm6, %v7634_v35  ;;  %v7667_v46 = vld [vmem:[#allocation4 + $0x30] sm:$0xff]  ;;  %v7703_v58 = vld [vmem:[#allocation4 + $0x42] sm:$0xff]  ;;  %v7856_v41 = vshrl.u32 %v4545_v31, 7  ;;  %vm7874_vm8 = vcmp.lt.s32.totalorder %v4545_v31, 64  ;;  %vm4569_vm9 = vcmp.ge.s32.totalorder %v4545_v31, 64 }
 0x2e5   : > { %6294 = vmatprep.mubr.msk.f32.mxu0 %vm3170_vm6, %v7639_v36  ;;  %v7699_v57 = vld [vmem:[#allocation4 + $0x32] sm:$0xff]  ;;  %vm4570_vm10 = vcmp.lt.s32.totalorder %v4545_v31, 128 }
 0x2e6   : > { %v7647_v38 = vld [vmem:[#allocation4 + $0x61] sm:$0xff]  ;;  %v4746_v3 = vld [vmem:[%s8379_s7 + $0x30] sm:$0xff]  ;;  %vm7986_vm11 = vmand %vm4569_vm9, %vm4570_vm10 }
 0x2e7   : > { %v7643_v37 = vld [vmem:[#allocation4 + $0x51] sm:$0xff]  ;;  %v7679_v49 = vld [vmem:[#allocation4 + $0x60] sm:$0xff] }
 0x2e8   : > { %6295 = vmatmul.mubr.msk.f32.gmra.mrb[12].mxu0 %vm3170_vm6, %v7643_v37  ;;  %v7675_v48 = vld [vmem:[#allocation4 + $0x50] sm:$0xff]  ;;  %v7711_v60 = vld [vmem:[#allocation4 + $0x62] sm:$0xff] }
 0x2e9   : > { %6297 = vmatprep.mubr.msk.f32.mxu0 %vm3170_vm6, %v7647_v38  ;;  %v7707_v59 = vld [vmem:[#allocation4 + $0x52] sm:$0xff] }
 0x2ea   : > { %v3635_v2 = vld [vmem:[#allocation4 + $0x80] sm:$0xff] }
 0x2eb   : > { %v7651_v40 = vld [vmem:[#allocation4 + $0x71] sm:$0xff]  ;;  %v3783_v6 = vld [vmem:[#allocation4 + $0x81] sm:$0xff] }
 0x2ec   : > { %6298 = vmatmul.mubr.msk.f32.gmra.mrb[14].mxu0 %vm3170_vm6, %v7651_v40  ;;  %v7683_v51 = vld [vmem:[#allocation4 + $0x70] sm:$0xff]  ;;  %v3931_v10 = vld [vmem:[#allocation4 + $0x82] sm:$0xff] }
 0x2ed   : > { %6304 = vmatprep.mubr.msk.f32.mxu0 %vm3170_vm6, %v3201_v39  ;;  %v7715_v61 = vld [vmem:[#allocation4 + $0x72] sm:$0xff] }
 0x2f0   : > { %6305 = vmatmul.mubr.msk.f32.vlgmr.msra.gmra.mrb[8].mxu0 %vm3170_vm6, %v3202_v44 }
 0x2f1   : > { %6450 = vmatpush3.bf16.msra.mxu0 %v6447_v27  ;;  %6307 = vmatprep.mubr.msk.f32.mxu0 %vm3170_vm6, %v7663_v45  ;;  %v4743_v27 = vld [vmem:[%s8379_s7 + $0x18] sm:$0xff] }
 0x2f2   : > { %6452 = vmatprep.subr.bf16.mxu0 %v6451_v43  ;;  %v6481_v28 = vpack.c.bf16 %v4743_v27, %v4742_v26 }
 0x2f4   : > { %6308 = vmatmul.mubr.msk.f32.gmra.mrb[10].mxu0 %vm3170_vm6, %v7667_v46  ;;  %6482 = vmatpush3.bf16.msra.mxu1 %v6481_v28 }
 0x2f5   : > { %6310 = vmatprep.mubr.msk.f32.mxu0 %vm3170_vm6, %v7671_v47 }
 0x2f8   : > { %6311 = vmatmul.mubr.msk.f32.gmra.mrb[12].mxu0 %vm3170_vm6, %v7675_v48 }
 0x2f9   : > { %6313 = vmatprep.mubr.msk.f32.mxu0 %vm3170_vm6, %v7679_v49 }
 0x2fc   : > { %6314 = vmatmul.mubr.msk.f32.gmra.mrb[14].mxu0 %vm3170_vm6, %v7683_v51 }
 0x2fd   : > { %6320 = vmatprep.mubr.msk.f32.mxu0 %vm3170_vm6, %v3480_v50  ;;  %v4745_v50 = vld [vmem:[%s8379_s7 + $0x28] sm:$0xff] }
 0x300   : > { %6321 = vmatmul.mubr.msk.f32.vlgmr.msra.gmra.mrb[8].mxu0 %vm3170_vm6, %v3481_v55 }
 0x301   : > { %6454 = vmatpush3.bf16.msra.mxu0 %v6451_v43  ;;  %6323 = vmatprep.mubr.msk.f32.mxu0 %vm3170_vm6, %v7695_v56 }
 0x302   : > { %6456 = vmatprep.subr.bf16.mxu0 %v6455_v54 }
 0x304   : > { %6324 = vmatmul.mubr.msk.f32.gmra.mrb[10].mxu0 %vm3170_vm6, %v7699_v57 }
 0x305   : > { %6326 = vmatprep.mubr.msk.f32.mxu0 %vm3170_vm6, %v7703_v58 }
 0x308   : > { %6327 = vmatmul.mubr.msk.f32.gmra.mrb[12].mxu0 %vm3170_vm6, %v7707_v59 }
 0x309   : > { %6329 = vmatprep.mubr.msk.f32.mxu0 %vm3170_vm6, %v7711_v60 }
 0x30c   : > { %6330 = vmatmul.mubr.msk.f32.gmra.mrb[14].mxu0 %vm3170_vm6, %v7715_v61 }
 0x30d   : > { %6336 = vmatprep.mubr.msk.f32.mxu0 %vm3170_vm6, %v3202_v44  ;;  %v4760_v44 = vld [vmem:[%s8379_s7 + $0xa0] sm:$0xff] }
 0x310   : > { %6337 = vmatmul.mubr.msk.f32.vlgmr.msra.gmra.mrb[8].mxu0 %vm3170_vm6, %v7663_v45 }
 0x311   : > { %6458 = vmatpush3.bf16.msra.mxu0 %v6455_v54  ;;  %6339 = vmatprep.mubr.msk.f32.mxu0 %vm3170_vm6, %v7667_v46 }
 0x312   : > { %6460 = vmatprep.subr.bf16.mxu0 %v6459_v0 }
 0x314   : > { %6340 = vmatmul.mubr.msk.f32.gmra.mrb[10].mxu0 %vm3170_vm6, %v7671_v47 }
 0x315   : > { %6342 = vmatprep.mubr.msk.f32.mxu0 %vm3170_vm6, %v7675_v48 }
 0x318   : > { %6343 = vmatmul.mubr.msk.f32.gmra.mrb[12].mxu0 %vm3170_vm6, %v7679_v49 }
 0x319   : > { %6345 = vmatprep.mubr.msk.f32.mxu0 %vm3170_vm6, %v7683_v51 }
 0x31c   : > { %6346 = vmatmul.mubr.msk.f32.gmra.mrb[14].mxu0 %vm3170_vm6, %v3635_v2 }
 0x31d   : > { %6352 = vmatprep.mubr.msk.f32.mxu0 %vm3170_vm6, %v7624_v30 }
 0x320   : > { %6353 = vmatmul.mubr.msk.f32.vlgmr.msra.gmra.mrb[8].mxu0 %vm3170_vm6, %v7629_v32 }
 0x321   : > { %6462 = vmatpush3.bf16.msra.mxu0 %v6459_v0  ;;  %6355 = vmatprep.mubr.msk.f32.mxu0 %vm3170_vm6, %v7634_v35 }
 0x322   : > { %6464 = vmatprep.subr.bf16.mxu0 %v6463_v5 }
 0x324   : > { %6356 = vmatmul.mubr.msk.f32.gmra.mrb[10].mxu0 %vm3170_vm6, %v7639_v36 }
 0x325   : > { %6358 = vmatprep.mubr.msk.f32.mxu0 %vm3170_vm6, %v7643_v37 }
 0x328   : > { %6359 = vmatmul.mubr.msk.f32.gmra.mrb[12].mxu0 %vm3170_vm6, %v7647_v38 }
 0x329   : > { %6361 = vmatprep.mubr.msk.f32.mxu0 %vm3170_vm6, %v7651_v40 }
 0x32c   : > { %6362 = vmatmul.mubr.msk.f32.gmra.mrb[14].mxu0 %vm3170_vm6, %v3783_v6 }
 0x32d   : > { %6368 = vmatprep.mubr.msk.f32.mxu0 %vm3170_vm6, %v3481_v55 }
 0x330   : > { %6369 = vmatmul.mubr.msk.f32.vlgmr.msra.gmra.mrb[8].mxu0 %vm3170_vm6, %v7695_v56 }
 0x331   : > { %6466 = vmatpush3.bf16.msra.mxu0 %v6463_v5  ;;  %6371 = vmatprep.mubr.msk.f32.mxu0 %vm3170_vm6, %v7699_v57 }
 0x332   : > { %6468 = vmatprep.subr.bf16.mxu0 %v6467_v9 }
 0x334   : > { %6372 = vmatmul.mubr.msk.f32.gmra.mrb[10].mxu0 %vm3170_vm6, %v7703_v58 }
 0x335   : > { %6374 = vmatprep.mubr.msk.f32.mxu0 %vm3170_vm6, %v7707_v59 }
 0x338   : > { %6375 = vmatmul.mubr.msk.f32.gmra.mrb[12].mxu0 %vm3170_vm6, %v7711_v60 }
 0x339   : > { %6377 = vmatprep.mubr.msk.f32.mxu0 %vm3170_vm6, %v7715_v61 }
 0x33c   : > { %6378 = vmatmul.mubr.msk.f32.gmra.mrb[14].mxu0 %vm3170_vm6, %v3931_v10 }
 0x33d   : > { %6384 = vmatprep.mubr.msk.f32.mxu0 %vm3170_vm6, %v7663_v45  ;;  %v4761_v45 = vld [vmem:[%s8379_s7 + $0xa8] sm:$0xff] }
 0x340   : > { %6385 = vmatmul.mubr.msk.f32.vlgmr.msra.gmra.mrb[8].mxu0 %vm3170_vm6, %v7667_v46  ;;  %v4744_v46 = vld [vmem:[%s8379_s7 + $0x20] sm:$0xff] }
 0x341   : > { %6470 = vmatpush3.bf16.msra.mxu0 %v6467_v9  ;;  %6387 = vmatprep.mubr.msk.f32.mxu0 %vm3170_vm6, %v7671_v47  ;;  %v6485_v52 = vpack.c.bf16 %v4745_v50, %v4744_v46  ;;  %v4768_v50 = vld [vmem:[%s8379_s7 + $0xe0] sm:$0xff] }
 0x342   : > { %6472 = vmatprep.subr.bf16.mxu0 %v6471_v13 }
 0x344   : > { %6388 = vmatmul.mubr.msk.f32.gmra.mrb[10].mxu0 %vm3170_vm6, %v7675_v48 }
 0x345   : > { %6390 = vmatprep.mubr.msk.f32.mxu0 %vm3170_vm6, %v7679_v49  ;;  %v6483_v49 = vpack.c.bf16 %v4761_v45, %v4760_v44 }
 0x347   : > { %6484 = vmatprep.subr.bf16.mxu1 %v6483_v49 }
 0x348   : > { %6391 = vmatmul.mubr.msk.f32.gmra.mrb[12].mxu0 %vm3170_vm6, %v7683_v51  ;;  %6486 = vmatpush3.bf16.msra.mxu1 %v6485_v52 }
 0x349   : > { %6393 = vmatprep.mubr.msk.f32.mxu0 %vm3170_vm6, %v3635_v2 }
 0x34c   : > { %6394 = vmatmul.mubr.msk.f32.gmra.mrb[14].mxu0 %vm3170_vm6, %v4080_v14  ;;  %v4764_v14 = vld [vmem:[%s8379_s7 + $0xc0] sm:$0xff] }
 0x34d   : > { %6400 = vmatprep.mubr.msk.f32.mxu0 %vm3170_vm6, %v7629_v32  ;;  %v6916_v32 = vmov 1966171168  }
 0x34e   : > { %v4552_v33 = vunpack.c.l.s4 %v6916_v32 }
 0x350   : > { %6401 = vmatmul.mubr.msk.f32.vlgmr.msra.gmra.mrb[8].mxu0 %vm3170_vm6, %v7634_v35 }
 0x351   : > { %6474 = vmatpush3.bf16.msra.mxu0 %v6471_v13  ;;  %6403 = vmatprep.mubr.msk.f32.mxu0 %vm3170_vm6, %v7639_v36 }
 0x354   : > { %6404 = vmatmul.mubr.msk.f32.gmra.mrb[10].mxu0 %vm3170_vm6, %v7643_v37 }
 0x355   : > { %6406 = vmatprep.mubr.msk.f32.mxu0 %vm3170_vm6, %v7647_v38 }
 0x358   : > { %6407 = vmatmul.mubr.msk.f32.gmra.mrb[12].mxu0 %vm3170_vm6, %v7651_v40  ;;  %v4553_v40 = vunpack.c.0.s8 %v4552_v33  ;;  %v4766_v33 = vld [vmem:[%s8379_s7 + $0xd0] sm:$0xff] }
 0x359   : > { %6409 = vmatprep.mubr.msk.f32.mxu0 %vm3170_vm6, %v3783_v6  ;;  %v6489_v6 = vpack.c.bf16 %v4747_v4, %v4746_v3  ;;  %v4754_v4 = vld [vmem:[%s8379_s7 + $0x70] sm:$0xff] }
 0x35c   : > { %6410 = vmatmul.mubr.msk.f32.gmra.mrb[14].mxu0 %vm3170_vm6, %v4228_v15  ;;  %v4765_v15 = vld [vmem:[%s8379_s7 + $0xc8] sm:$0xff] }
 0x35d   : > { %6416 = vmatprep.mubr.msk.f32.mxu0 %vm3170_vm6, %v7695_v56  ;;  %v7871_v56 = vsub.s32 %v4553_v40, %v7856_v41  ;;  %v6491_v24 = vpack.c.bf16 %v4765_v15, %v4764_v14  ;;  %v4788_v14 = vld [vmem:[%s8379_s7 + $0x180] sm:$0xff]  ;;  %v4789_v15 = vld [vmem:[%s8379_s7 + $0x188] sm:$0xff] }
 0x360   : > { %6417 = vmatmul.mubr.msk.f32.vlgmr.msra.gmra.mrb[8].mxu0 %vm3170_vm6, %v7699_v57 }
 0x361   : > { %6419 = vmatprep.mubr.msk.f32.mxu0 %vm3170_vm6, %v7703_v58 }
 0x364   : > { %6420 = vmatmul.mubr.msk.f32.gmra.mrb[10].mxu0 %vm3170_vm6, %v7707_v59 }
 0x365   : > { %6422 = vmatprep.mubr.msk.f32.mxu0 %vm3170_vm6, %v7711_v60  ;;  %v4762_v60 = vld [vmem:[%s8379_s7 + $0xb0] sm:$0xff] }
 0x368   : > { %6423 = vmatmul.mubr.msk.f32.gmra.mrb[12].mxu0 %vm3170_vm6, %v7715_v61  ;;  %v4763_v61 = vld [vmem:[%s8379_s7 + $0xb8] sm:$0xff] }
 0x369   : > { %6425 = vmatprep.mubr.msk.f32.mxu0 %vm3170_vm6, %v3931_v10  ;;  %v6487_v2 = vpack.c.bf16 %v4763_v61, %v4762_v60 }
 0x36b   : > { %6488 = vmatprep.subr.bf16.mxu1 %v6487_v2 }
 0x36c   : > { %6426 = vmatmul.mubr.msk.f32.gmra.mrb[14].mxu0 %vm3170_vm6, %v4376_v16  ;;  %6490 = vmatpush3.bf16.msra.mxu1 %v6489_v6 }
 0x36d   : > { %6492 = vmatprep.subr.bf16.mxu1 %v6491_v24  ;;  %v4876_v24 = vsub.s32 1, %v7856_v41 }
 0x370   : > { %6494 = vmatpush3.bf16.msra.mxu1 %v6493_v25  ;;  %v4872_v25 = vsub.s32 0, %v7856_v41 }
 0x433   : > { %v6418_v30 = vpop.f32.mrb[8].mxu0 }
 0x434   : > { %v4525_v34 = vadd.f32 %v6418_v30, %v5629_v29  ;;  %v4470_v35 = vpop.f32.mrb[9].mxu0 }
 0x435   : > { %v4524_v36 = vadd.f32 %v5629_v29, %v4470_v35 }
 0x436   : > { %v4533_v37 = vmax.f32 %v4525_v34, 0.0  ;;  %v4767_v34 = vld [vmem:[%s8379_s7 + $0xd8] sm:$0xff] }
 0x437   : > { %v4532_v38 = vmax.f32 %v4524_v36, 0.0  ;;  %v6421_v39 = vpop.f32.mrb[10].mxu0 }
 0x438   : > { %v4527_v42 = vadd.f32 %v6421_v39, %v5629_v29  ;;  %v4480_v43 = vpop.f32.mrb[11].mxu0  ;;  %v4751_v39 = vld [vmem:[%s8379_s7 + $0x58] sm:$0xff] }
 0x439   : > { %v4540_v47 = vmax.f32 %v4532_v38, %v4533_v37  ;;  %v4526_v48 = vadd.f32 %v5629_v29, %v4480_v43  ;;  %v4750_v38 = vld [vmem:[%s8379_s7 + $0x50] sm:$0xff]  ;;  %v6495_v43 = vpack.c.bf16 %v4767_v34, %v4766_v33 }
 0x43a   : > { %v4535_v51 = vmax.f32 %v4527_v42, 0.0  ;;  %v6497_v44 = vpack.c.bf16 %v4751_v39, %v4750_v38  ;;  %v4775_v38 = vld [vmem:[%s8379_s7 + $0x118] sm:$0xff] }
 0x43b   : > { %v4542_v53 = vrot.slane %v4540_v47, 1  ;;  %v4534_v54 = vmax.f32 %v4526_v48, 0.0  ;;  %v6424_v55 = vpop.f32.mrb[12].mxu0  ;;  %6496 = vmatprep.subr.bf16.mxu1 %v6495_v43 }
 0x43c   : > { %v4529_v57 = vadd.f32 %v6424_v55, %v5629_v29  ;;  %v4490_v58 = vpop.f32.mrb[13].mxu0  ;;  %v4752_v55 = vld [vmem:[%s8379_s7 + $0x60] sm:$0xff]  ;;  %6498 = vmatpush3.bf16.msra.mxu1 %v6497_v44 }
 0x43d   : > { %v4544_v62 = vmax.f32 %v4540_v47, %v4542_v53  ;;  %v4595_v63 = vmax.f32 %v4534_v54, %v4535_v51  ;;  %v4528_v0 = vadd.f32 %v5629_v29, %v4490_v58  ;;  %v4769_v51 = vld [vmem:[%s8379_s7 + $0xe8] sm:$0xff]  ;;  %v4770_v58 = vld [vmem:[%s8379_s7 + $0xf0] sm:$0xff] }
 0x43e   : > { %v4537_v5 = vmax.f32 %v4529_v57, 0.0  ;;  %v4753_v57 = vld [vmem:[%s8379_s7 + $0x68] sm:$0xff]  ;;  %v6499_v60 = vpack.c.bf16 %v4769_v51, %v4768_v50  ;;  %v4778_v51 = vld [vmem:[%s8379_s7 + $0x130] sm:$0xff] }
 0x43f   : > { %v4573_v7 = vcombine.high %v4544_v62, %v4544_v62  ;;  %v4597_v8 = vrot.slane %v4595_v63, 1  ;;  %v4536_v9 = vmax.f32 %v4528_v0, 0.0  ;;  %v6427_v10 = vpop.f32.mrb[14].mxu0  ;;  %v4557_v11 = vrot.slane %v4544_v62, %v7871_v56  ;;  %4549 = vst.msk [vmem:[#allocation5] sm:$0x1] %vm7874_vm8, %v4544_v62  ;;  %v4771_v62 = vld [vmem:[%s8379_s7 + $0xf8] sm:$0xff] }
 0x440   : > { %v4531_v12 = vadd.f32 %v6427_v10, %v5629_v29  ;;  %v4500_v13 = vpop.f32.mrb[15].mxu0  ;;  %v6501_v61 = vpack.c.bf16 %v4753_v57, %v4752_v55  ;;  %6500 = vmatprep.subr.bf16.mxu1 %v6499_v60  ;;  %v4781_v60 = vld [vmem:[%s8379_s7 + $0x148] sm:$0xff] }
 0x441   : > { %v4599_v16 = vmax.f32 %v4595_v63, %v4597_v8  ;;  %v4643_v17 = vmax.f32 %v4536_v9, %v4537_v5  ;;  %v4530_v18 = vadd.f32 %v5629_v29, %v4500_v13  ;;  %v4564_v19 = vrot.slane %v4557_v11, %v7871_v56  ;;  %v4755_v5 = vld [vmem:[%s8379_s7 + $0x78] sm:$0xff] }
 0x442   : > { %v4539_v22 = vmax.f32 %v4531_v12, 0.0  ;;  %v4580_v23 = vrot.slane %v4573_v7, %v7871_v56  ;;  %v6503_v7 = vpack.c.bf16 %v4771_v62, %v4770_v58  ;;  %6502 = vmatpush3.bf16.msra.mxu1 %v6501_v61  ;;  %v6505_v10 = vpack.c.bf16 %v4755_v5, %v4754_v4  ;;  %v4780_v58 = vld [vmem:[%s8379_s7 + $0x140] sm:$0xff]  ;;  %v4798_v61 = vld [vmem:[%s8379_s7 + $0x1d0] sm:$0xff]  ;;  %v4799_v62 = vld [vmem:[%s8379_s7 + $0x1d8] sm:$0xff] }
 0x443   : > { %v4621_v26 = vcombine.high %v4599_v16, %v4599_v16  ;;  %v4645_v27 = vrot.slane %v4643_v17, 1  ;;  %v4538_v28 = vmax.f32 %v4530_v18, 0.0  ;;  %v4565_v30 = vcombine.high %v4564_v19, %v4564_v19  ;;  %4600 = vst.msk [vmem:[#allocation5 + $0x2] sm:$0x1] %vm7874_vm8, %v4599_v16  ;;  %v4800_v4 = vld [vmem:[%s8379_s7 + $0x1e0] sm:$0xff]  ;;  %v4801_v5 = vld [vmem:[%s8379_s7 + $0x1e8] sm:$0xff] }
 0x444   : > { %v4587_v29 = vrot.slane %v4580_v23, %v7871_v56  ;;  %v4608_v32 = vrot.slane %v4599_v16, %v7871_v56  ;;  %6504 = vmatprep.subr.bf16.mxu1 %v6503_v7  ;;  %v6507_v16 = vpack.c.bf16 %v4789_v15, %v4788_v14  ;;  %v6531_v7 = vpack.c.bf16 %v4801_v5, %v4800_v4  ;;  %v4786_v14 = vld [vmem:[%s8379_s7 + $0x170] sm:$0xff]  ;;  %v4787_v15 = vld [vmem:[%s8379_s7 + $0x178] sm:$0xff] }
 0x445   : > { %v4647_v35 = vmax.f32 %v4643_v17, %v4645_v27  ;;  %v4691_v36 = vmax.f32 %v4538_v28, %v4539_v22  ;;  %4566 = vrot.lane.b32.xlu0 %v4565_v30, %s6917_s13  ;;  %v4628_v37 = vrot.slane %v4621_v26, %v7871_v56  ;;  %v4772_v26 = vld [vmem:[%s8379_s7 + $0x100] sm:$0xff]  ;;  %v4773_v27 = vld [vmem:[%s8379_s7 + $0x108] sm:$0xff]  ;;  %v4884_v28 = vsub.s32 3, %v7856_v41  ;;  %v4790_v30 = vld [vmem:[%s8379_s7 + $0x190] sm:$0xff] }
 0x446   : > { %v4590_v40 = vcombine.high %v4587_v29, %v4587_v29  ;;  %v4615_v42 = vrot.slane %v4608_v32, %v7871_v56  ;;  %4589 = vst.msk [vmem:[#allocation5 + $0x1] sm:$0x1] %vm7874_vm8, %v4587_v29  ;;  %6506 = vmatpush3.bf16.msra.mxu1 %v6505_v10  ;;  %v4791_v29 = vld [vmem:[%s8379_s7 + $0x198] sm:$0xff]  ;;  %v4802_v10 = vld [vmem:[%s8379_s7 + $0x1f0] sm:$0xff]  ;;  %v6537_v17 = vpack.c.bf16 %v4787_v15, %v4786_v14  ;;  %v4900_v14 = vsub.s32 7, %v7856_v41 }
 0x447   : > { %v4669_v45 = vcombine.high %v4647_v35, %v4647_v35  ;;  %v4693_v46 = vrot.slane %v4691_v36, 1  ;;  %v4635_v47 = vrot.slane %v4628_v37, %v7871_v56  ;;  %v4656_v48 = vrot.slane %v4647_v35, %v7871_v56  ;;  %4648 = vst.msk [vmem:[#allocation5 + $0x4] sm:$0x1] %vm7874_vm8, %v4647_v35  ;;  %6508 = vmatprep.subr.bf16.mxu1 %v6507_v16  ;;  %v4774_v37 = vld [vmem:[%s8379_s7 + $0x110] sm:$0xff]  ;;  %v4820_v16 = vld [vmem:[%s8379_s7 + $0x280] sm:$0xff] }
 0x448   : > { %v4616_v49 = vcombine.high %v4615_v42, %v4615_v42  ;;  %v6509_v35 = vpack.c.bf16 %v4773_v27, %v4772_v26  ;;  %v4793_v42 = vld [vmem:[%s8379_s7 + $0x1a8] sm:$0xff]  ;;  %v6513_v43 = vpack.c.bf16 %v4775_v38, %v4774_v37  ;;  %v4806_v26 = vld [vmem:[%s8379_s7 + $0x210] sm:$0xff]  ;;  %v4807_v27 = vld [vmem:[%s8379_s7 + $0x218] sm:$0xff] }
 0x449   : > { %v4695_v52 = vmax.f32 %v4691_v36, %v4693_v46  ;;  %4591 = vrot.lane.b32.xlu0 %v4590_v40, %s6917_s13  ;;  %v4663_v53 = vrot.slane %v4656_v48, %v7871_v56  ;;  %v4676_v54 = vrot.slane %v4669_v45, %v7871_v56  ;;  %4637 = vst.msk [vmem:[#allocation5 + $0x3] sm:$0x1] %vm7874_vm8, %v4635_v47  ;;  %v4792_v40 = vld [vmem:[%s8379_s7 + $0x1a0] sm:$0xff]  ;;  %v4777_v46 = vld [vmem:[%s8379_s7 + $0x128] sm:$0xff]  ;;  %v4795_v48 = vld [vmem:[%s8379_s7 + $0x1b8] sm:$0xff] }
 0x44a   : > { %4617 = vrot.lane.b32.xlu1 %v4616_v49, %s6917_s13  ;;  %v4638_v6 = vcombine.high %v4635_v47, %v4635_v47  ;;  %v6511_v36 = vpack.c.bf16 %v4791_v29, %v4790_v30  ;;  %v6515_v44 = vpack.c.bf16 %v4793_v42, %v4792_v40  ;;  %v4776_v45 = vld [vmem:[%s8379_s7 + $0x120] sm:$0xff]  ;;  %v4794_v47 = vld [vmem:[%s8379_s7 + $0x1b0] sm:$0xff]  ;;  %v4825_v29 = vld [vmem:[%s8379_s7 + $0x2a8] sm:$0xff] }
 0x44b   : > { %v4717_v63 = vcombine.high %v4695_v52, %v4695_v52  ;;  %v4664_v0 = vcombine.high %v4663_v53, %v4663_v53  ;;  %v4683_v2 = vrot.slane %v4676_v54, %v7871_v56  ;;  %v4704_v3 = vrot.slane %v4695_v52, %v7871_v56  ;;  %4696 = vst.msk [vmem:[#allocation5 + $0x6] sm:$0x1] %vm7874_vm8, %v4695_v52  ;;  %v4779_v52 = vld [vmem:[%s8379_s7 + $0x138] sm:$0xff]  ;;  %v4796_v53 = vld [vmem:[%s8379_s7 + $0x1c0] sm:$0xff]  ;;  %v4797_v54 = vld [vmem:[%s8379_s7 + $0x1c8] sm:$0xff] }
 0x44c   : > { %v6517_v49 = vpack.c.bf16 %v4777_v46, %v4776_v45  ;;  %v6519_v50 = vpack.c.bf16 %v4795_v48, %v4794_v47  ;;  %v6521_v55 = vpack.c.bf16 %v4779_v52, %v4778_v51  ;;  %v6523_v57 = vpack.c.bf16 %v4797_v54, %v4796_v53  ;;  %v4824_v30 = vld [vmem:[%s8379_s7 + $0x2a0] sm:$0xff]  ;;  %v4826_v37 = vld [vmem:[%s8379_s7 + $0x2b0] sm:$0xff]  ;;  %v4827_v38 = vld [vmem:[%s8379_s7 + $0x2b8] sm:$0xff] }
 0x44d   : > { %4665 = vrot.lane.b32.xlu0 %v4664_v0, %s6917_s13  ;;  %v4711_v8 = vrot.slane %v4704_v3, %v7871_v56  ;;  %v4724_v9 = vrot.slane %v4717_v63, %v7871_v56  ;;  %4685 = vst.msk [vmem:[#allocation5 + $0x5] sm:$0x1] %vm7874_vm8, %v4683_v2  ;;  %v4686_v13 = vcombine.high %v4683_v2, %v4683_v2  ;;  %v4782_v2 = vld [vmem:[%s8379_s7 + $0x150] sm:$0xff]  ;;  %v4783_v3 = vld [vmem:[%s8379_s7 + $0x158] sm:$0xff]  ;;  %v4829_v45 = vld [vmem:[%s8379_s7 + $0x2c8] sm:$0xff] }
 0x44e   : > { %4639 = vrot.lane.b32.xlu1 %v4638_v6, %s6917_s13  ;;  %v6525_v63 = vpack.c.bf16 %v4781_v60, %v4780_v58  ;;  %v6527_v0 = vpack.c.bf16 %v4799_v62, %v4798_v61  ;;  %v6529_v6 = vpack.c.bf16 %v4783_v3, %v4782_v2  ;;  %v6551_v40 = vpack.c.bf16 %v4827_v38, %v4826_v37  ;;  %v4810_v42 = vld [vmem:[%s8379_s7 + $0x230] sm:$0xff]  ;;  %v4812_v48 = vld [vmem:[%s8379_s7 + $0x240] sm:$0xff]  ;;  %v4831_v51 = vld [vmem:[%s8379_s7 + $0x2d8] sm:$0xff] }
 0x44f   : > { %v4712_v11 = vcombine.high %v4711_v8, %v4711_v8  ;;  %v4731_v12 = vrot.slane %v4724_v9, %v7871_v56  ;;  %v4784_v8 = vld [vmem:[%s8379_s7 + $0x160] sm:$0xff]  ;;  %v4785_v9 = vld [vmem:[%s8379_s7 + $0x168] sm:$0xff]  ;;  %v4814_v54 = vld [vmem:[%s8379_s7 + $0x250] sm:$0xff] }
 0x450   : > { %v4833_v58 = vld [vmem:[%s8379_s7 + $0x2e8] sm:$0xff]  ;;  %v4816_v62 = vld [vmem:[%s8379_s7 + $0x260] sm:$0xff]  ;;  %v4835_v2 = vld [vmem:[%s8379_s7 + $0x2f8] sm:$0xff] }
 0x451   : > { %4713 = vrot.lane.b32.xlu0 %v4712_v11, %s6917_s13  ;;  %4733 = vst.msk [vmem:[#allocation5 + $0x7] sm:$0x1] %vm7874_vm8, %v4731_v12  ;;  %v4734_v56 = vcombine.high %v4731_v12, %v4731_v12  ;;  %v4803_v11 = vld [vmem:[%s8379_s7 + $0x1f8] sm:$0xff]  ;;  %v6533_v12 = vpack.c.bf16 %v4785_v9, %v4784_v8  ;;  %v4818_v5 = vld [vmem:[%s8379_s7 + $0x270] sm:$0xff]  ;;  %v4853_v8 = vld [vmem:[%s8379_s7 + $0x388] sm:$0xff] }
 0x452   : > { %4687 = vrot.lane.b32.xlu1 %v4686_v13, %s6917_s13  ;;  %v6535_v13 = vpack.c.bf16 %v4803_v11, %v4802_v10  ;;  %v4888_v10 = vsub.s32 4, %v7856_v41  ;;  %v4854_v15 = vld [vmem:[%s8379_s7 + $0x390] sm:$0xff]  ;;  %v4844_v38 = vld [vmem:[%s8379_s7 + $0x340] sm:$0xff] }
 0x456   : > { %4735 = vrot.lane.b32.xlu1 %v4734_v56, %s6917_s13  ;;  %v4821_v56 = vld [vmem:[%s8379_s7 + $0x288] sm:$0xff]  ;;  %s6855_s13 = sshll.u32 %s6920_s22, 4  ;;  %s6856_s13 = int_to_ptr.vmem [resolvable:$false] %s6855_s13 }
 0x457   : > { %s6857_s0 = scalar_lea.vmem %s6856_s13, 32  ;;  %p6858_p0 = scmp.lt.s32.totalorder %s8332_s30, %s6856_s13 }
 0x458   : > { %p6859_p1 = scmp.lt.s32.totalorder %s6857_s0, %s6851_s21 }
 0x45a   : > { %p6860_p2 = por %p6859_p1, %p6858_p0 }
 0x45c   : > { %p6861_p3 = pnand %p6860_p2, %p6854_p13 }
 0x4b7   : > { %v4567_v18 = vpop.permute.xlu0 %4566 }
 0x4b8   : > { %4572 = vst.msk [vmem:[#allocation5] sm:$0x1] %vm7986_vm11, %v4567_v18  ;;  %v4880_v18 = vsub.s32 2, %v7856_v41 }
 0x4bb   : > { %v4592_v59 = vpop.permute.xlu0 %4591 }
 0x4bc   : > { %4594 = vst.msk [vmem:[#allocation5 + $0x1] sm:$0x1] %vm7986_vm11, %v4592_v59  ;;  %v4618_v19 = vpop.permute.xlu1 %4617  ;;  %v6539_v59 = vpack.c.bf16 %v4821_v56, %v4820_v16  ;;  %v4855_v16 = vld [vmem:[%s8379_s7 + $0x398] sm:$0xff] }
 0x4bd   : > { %4620 = vst.msk [vmem:[#allocation5 + $0x2] sm:$0x1] %vm7986_vm11, %v4618_v19  ;;  %v4804_v19 = vld [vmem:[%s8379_s7 + $0x200] sm:$0xff] }
 0x4bf   : > { %v4666_v20 = vpop.permute.xlu0 %4665 }
 0x4c0   : > { %v4640_v21 = vpop.permute.xlu1 %4639  ;;  %4668 = vst.msk [vmem:[#allocation5 + $0x4] sm:$0x1] %vm7986_vm11, %v4666_v20  ;;  %v4805_v20 = vld [vmem:[%s8379_s7 + $0x208] sm:$0xff] }
 0x4c1   : > { %4642 = vst.msk [vmem:[#allocation5 + $0x3] sm:$0x1] %vm7986_vm11, %v4640_v21  ;;  %v4892_v21 = vsub.s32 5, %v7856_v41 }
 0x4c3   : > { %v4714_v31 = vpop.permute.xlu0 %4713 }
 0x4c4   : > { %v4688_v22 = vpop.permute.xlu1 %4687  ;;  %4716 = vst.msk [vmem:[#allocation5 + $0x6] sm:$0x1] %vm7986_vm11, %v4714_v31  ;;  %v4822_v31 = vld [vmem:[%s8379_s7 + $0x290] sm:$0xff] }
 0x4c5   : > { %4690 = vst.msk [vmem:[#allocation5 + $0x5] sm:$0x1] %vm7986_vm11, %v4688_v22  ;;  %v4823_v22 = vld [vmem:[%s8379_s7 + $0x298] sm:$0xff] }
 0x4c8   : > { %v4736_v23 = vpop.permute.xlu1 %4735 }
 0x4c9   : > { %4738 = vst.msk [vmem:[#allocation5 + $0x7] sm:$0x1] %vm7986_vm11, %v4736_v23  ;;  %v6541_v23 = vpack.c.bf16 %v4805_v20, %v4804_v19  ;;  %v4839_v19 = vld [vmem:[%s8379_s7 + $0x318] sm:$0xff] }
 0x4d0   : > { %v8021_v32 = vld [vmem:[#allocation5] sm:$0xff] }
 0x4d1   : > { %v4877_v33 = vrot.slane %v8021_v32, %v4876_v24  ;;  %v4873_v34 = vrot.slane %v8021_v32, %v4872_v25  ;;  %v4885_v39 = vrot.slane %v8021_v32, %v4884_v28  ;;  %v4881_v24 = vrot.slane %v8021_v32, %v4880_v18 }
 0x4d2   : > { %v6543_v25 = vpack.c.bf16 %v4823_v22, %v4822_v31  ;;  %v4893_v28 = vrot.slane %v8021_v32, %v4892_v21  ;;  %v6575_v18 = vpack.c.bf16 %v4855_v16, %v4854_v15  ;;  %v4901_v20 = vrot.slane %v8021_v32, %v4900_v14  ;;  %v4856_v21 = vld [vmem:[%s8379_s7 + $0x3a0] sm:$0xff]  ;;  %v4857_v31 = vld [vmem:[%s8379_s7 + $0x3a8] sm:$0xff] }
 0x4d3   : > { %4974 = vmatprep.mubr.f32.mxu1 %v4877_v33  ;;  %v6545_v33 = vpack.c.bf16 %v4807_v27, %v4806_v26  ;;  %v4858_v26 = vld [vmem:[%s8379_s7 + $0x3b0] sm:$0xff]  ;;  %v4859_v27 = vld [vmem:[%s8379_s7 + $0x3b8] sm:$0xff] }
 0x4d4   : > { %4975 = vmatmul.mubr.f32.vlgmr.msra.gmra.mrb[14].mxu1 %v4873_v34  ;;  %v6547_v34 = vpack.c.bf16 %v4825_v29, %v4824_v30  ;;  %v6583_v30 = vpack.c.bf16 %v4859_v27, %v4858_v26  ;;  %v4842_v29 = vld [vmem:[%s8379_s7 + $0x330] sm:$0xff] }
 0x4d5   : > { %6510 = vmatpush3.bf16.msra.mxu1 %v6509_v35  ;;  %5044 = vmatprep.mubr.f32.mxu1 %v4885_v39  ;;  %v4808_v35 = vld [vmem:[%s8379_s7 + $0x220] sm:$0xff] }
 0x4d6   : > { %6512 = vmatprep.subr.bf16.mxu1 %v6511_v36  ;;  %v4809_v36 = vld [vmem:[%s8379_s7 + $0x228] sm:$0xff] }
 0x4d7   : > { %v6549_v39 = vpack.c.bf16 %v4809_v36, %v4808_v35  ;;  %v4861_v35 = vld [vmem:[%s8379_s7 + $0x3c8] sm:$0xff] }
 0x4d9   : > { %6514 = vmatpush3.bf16.msra.mxu1 %v6513_v43  ;;  %v4811_v43 = vld [vmem:[%s8379_s7 + $0x238] sm:$0xff] }
 0x4da   : > { %6516 = vmatprep.subr.bf16.mxu1 %v6515_v44  ;;  %v4828_v44 = vld [vmem:[%s8379_s7 + $0x2c0] sm:$0xff]  ;;  %v6553_v46 = vpack.c.bf16 %v4811_v43, %v4810_v42  ;;  %v4863_v42 = vld [vmem:[%s8379_s7 + $0x3d8] sm:$0xff] }
 0x4db   : > { %v6555_v47 = vpack.c.bf16 %v4829_v45, %v4828_v44  ;;  %v4846_v45 = vld [vmem:[%s8379_s7 + $0x350] sm:$0xff] }
 0x4dd   : > { %6518 = vmatpush3.bf16.msra.mxu1 %v6517_v49  ;;  %v4813_v49 = vld [vmem:[%s8379_s7 + $0x248] sm:$0xff] }
 0x4de   : > { %6520 = vmatprep.subr.bf16.mxu1 %v6519_v50  ;;  %v4830_v50 = vld [vmem:[%s8379_s7 + $0x2d0] sm:$0xff]  ;;  %v6557_v52 = vpack.c.bf16 %v4813_v49, %v4812_v48  ;;  %v4865_v48 = vld [vmem:[%s8379_s7 + $0x3e8] sm:$0xff] }
 0x4df   : > { %v6559_v53 = vpack.c.bf16 %v4831_v51, %v4830_v50  ;;  %v4848_v51 = vld [vmem:[%s8379_s7 + $0x360] sm:$0xff] }
 0x4e1   : > { %6522 = vmatpush3.bf16.msra.mxu1 %v6521_v55  ;;  %v4815_v55 = vld [vmem:[%s8379_s7 + $0x258] sm:$0xff] }
 0x4e2   : > { %6524 = vmatprep.subr.bf16.mxu1 %v6523_v57  ;;  %v4832_v57 = vld [vmem:[%s8379_s7 + $0x2e0] sm:$0xff]  ;;  %v6561_v60 = vpack.c.bf16 %v4815_v55, %v4814_v54  ;;  %v4867_v54 = vld [vmem:[%s8379_s7 + $0x3f8] sm:$0xff] }
 0x4e3   : > { %v6563_v61 = vpack.c.bf16 %v4833_v58, %v4832_v57  ;;  %v4850_v58 = vld [vmem:[%s8379_s7 + $0x370] sm:$0xff] }
 0x4e5   : > { %6526 = vmatpush3.bf16.msra.mxu1 %v6525_v63  ;;  %v4817_v63 = vld [vmem:[%s8379_s7 + $0x268] sm:$0xff] }
 0x4e6   : > { %6528 = vmatprep.subr.bf16.mxu1 %v6527_v0  ;;  %v4834_v0 = vld [vmem:[%s8379_s7 + $0x2f0] sm:$0xff]  ;;  %v6565_v3 = vpack.c.bf16 %v4817_v63, %v4816_v62  ;;  %v4896_v62 = vsub.s32 6, %v7856_v41 }
 0x4e7   : > { %v6567_v4 = vpack.c.bf16 %v4835_v2, %v4834_v0  ;;  %v5191_v0 = vld [vmem:[%s8381_s9] sm:$0xff]  ;;  %v5192_v2 = vld [vmem:[%s8381_s9 + $0x8] sm:$0xff]  ;;  %v5193_v41 = vld [vmem:[%s8381_s9 + $0x10] sm:$0xff] }
 0x4e8   : > { %v4897_v63 = vrot.slane %v8021_v32, %v4896_v62 }
 0x4e9   : > { %6530 = vmatpush3.bf16.msra.mxu1 %v6529_v6  ;;  %v4819_v6 = vld [vmem:[%s8379_s7 + $0x278] sm:$0xff] }
 0x4ea   : > { %6532 = vmatprep.subr.bf16.mxu1 %v6531_v7  ;;  %v4852_v7 = vld [vmem:[%s8379_s7 + $0x380] sm:$0xff]  ;;  %v6569_v9 = vpack.c.bf16 %v4819_v6, %v4818_v5 }
 0x4eb   : > { %v6571_v11 = vpack.c.bf16 %v4853_v8, %v4852_v7 }
 0x4ed   : > { %6534 = vmatpush3.bf16.msra.mxu1 %v6533_v12  ;;  %v4836_v12 = vld [vmem:[%s8379_s7 + $0x300] sm:$0xff] }
 0x4ee   : > { %6536 = vmatprep.subr.bf16.mxu1 %v6535_v13  ;;  %v4837_v13 = vld [vmem:[%s8379_s7 + $0x308] sm:$0xff] }
 0x4ef   : > { %v6573_v56 = vpack.c.bf16 %v4837_v13, %v4836_v12 }
 0x4f1   : > { %6538 = vmatpush3.bf16.msra.mxu1 %v6537_v17  ;;  %v4889_v17 = vrot.slane %v8021_v32, %v4888_v10  ;;  %v5194_v32 = vld [vmem:[%s8381_s9 + $0x18] sm:$0xff] }
 0x4f2   : > { %6540 = vmatprep.subr.bf16.mxu1 %v6539_v59  ;;  %v4838_v59 = vld [vmem:[%s8379_s7 + $0x310] sm:$0xff]  ;;  %v6607_v5 = vpack.c.bf16 %v5194_v32, %v5193_v41 }
 0x4f3   : > { %v6577_v22 = vpack.c.bf16 %v4839_v19, %v4838_v59 }
 0x4f4   : > { %5045 = vmatmul.mubr.f32.vlgmr.msra.gmra.mrb[16].mxu1 %v4881_v24  ;;  %v4840_v24 = vld [vmem:[%s8379_s7 + $0x320] sm:$0xff] }
 0x4f5   : > { %6542 = vmatpush3.bf16.msra.mxu1 %v6541_v23  ;;  %5114 = vmatprep.mubr.f32.mxu1 %v4893_v28  ;;  %v6579_v23 = vpack.c.bf16 %v4857_v31, %v4856_v21  ;;  %v5195_v21 = vld [vmem:[%s8382_s10] sm:$0x1] }
 0x4f6   : > { %6544 = vmatprep.subr.bf16.mxu1 %v6543_v25  ;;  %v4841_v25 = vld [vmem:[%s8379_s7 + $0x328] sm:$0xff] }
 0x4f7   : > { %v6581_v28 = vpack.c.bf16 %v4841_v25, %v4840_v24 }
 0x4f9   : > { %6546 = vmatpush3.bf16.msra.mxu1 %v6545_v33  ;;  %v4843_v33 = vld [vmem:[%s8379_s7 + $0x338] sm:$0xff] }
 0x4fa   : > { %6548 = vmatprep.subr.bf16.mxu1 %v6547_v34  ;;  %v4860_v34 = vld [vmem:[%s8379_s7 + $0x3c0] sm:$0xff]  ;;  %v6585_v36 = vpack.c.bf16 %v4843_v33, %v4842_v29 }
 0x4fb   : > { %v6587_v37 = vpack.c.bf16 %v4861_v35, %v4860_v34 }
 0x4fd   : > { %6550 = vmatpush3.bf16.msra.mxu1 %v6549_v39  ;;  %v4845_v39 = vld [vmem:[%s8379_s7 + $0x348] sm:$0xff] }
 0x4fe   : > { %6552 = vmatprep.subr.bf16.mxu1 %v6551_v40  ;;  %v4862_v40 = vld [vmem:[%s8379_s7 + $0x3d0] sm:$0xff]  ;;  %v6589_v43 = vpack.c.bf16 %v4845_v39, %v4844_v38 }
 0x4ff   : > { %v6591_v44 = vpack.c.bf16 %v4863_v42, %v4862_v40 }
 0x501   : > { %6554 = vmatpush3.bf16.msra.mxu1 %v6553_v46  ;;  %v4847_v46 = vld [vmem:[%s8379_s7 + $0x358] sm:$0xff] }
 0x502   : > { %6556 = vmatprep.subr.bf16.mxu1 %v6555_v47  ;;  %v4864_v47 = vld [vmem:[%s8379_s7 + $0x3e0] sm:$0xff]  ;;  %v6593_v49 = vpack.c.bf16 %v4847_v46, %v4846_v45 }
 0x503   : > { %v6595_v50 = vpack.c.bf16 %v4865_v48, %v4864_v47 }
 0x505   : > { %6558 = vmatpush3.bf16.msra.mxu1 %v6557_v52  ;;  %v4849_v52 = vld [vmem:[%s8379_s7 + $0x368] sm:$0xff] }
 0x506   : > { %6560 = vmatprep.subr.bf16.mxu1 %v6559_v53  ;;  %v4866_v53 = vld [vmem:[%s8379_s7 + $0x3f0] sm:$0xff]  ;;  %v6597_v55 = vpack.c.bf16 %v4849_v52, %v4848_v51 }
 0x507   : > { %v6599_v57 = vpack.c.bf16 %v4867_v54, %v4866_v53 }
 0x509   : > { %6562 = vmatpush3.bf16.msra.mxu1 %v6561_v60  ;;  %v4851_v60 = vld [vmem:[%s8379_s7 + $0x378] sm:$0xff] }
 0x50a   : > { %6564 = vmatprep.subr.bf16.mxu1 %v6563_v61  ;;  %v6601_v61 = vpack.c.bf16 %v4851_v60, %v4850_v58 }
 0x50d   : > { %6566 = vmatpush3.bf16.msra.mxu1 %v6565_v3  ;;  %v6604_v3 = vpack.c.bf16 %v5192_v2, %v5191_v0 }
 0x50e   : > { %6568 = vmatprep.subr.bf16.mxu1 %v6567_v4  ;;  %v6918_v4 = vmov 0.0|0.0  }
 0x511   : > { %6570 = vmatpush3.bf16.msra.mxu1 %v6569_v9  ;;  %v4868_v9 = vld [vmem:[%s8380_s8] sm:$0x1] }
 0x512   : > { %6572 = vmatprep.subr.bf16.mxu1 %v6571_v11 }
 0x514   : > { %5115 = vmatmul.mubr.f32.vlgmr.msra.gmra.mrb[18].mxu1 %v4889_v17 }
 0x515   : > { %6574 = vmatpush3.bf16.msra.mxu1 %v6573_v56  ;;  %5184 = vmatprep.mubr.f32.mxu1 %v4901_v20 }
 0x516   : > { %6576 = vmatprep.subr.bf16.mxu1 %v6575_v18 }
 0x519   : > { %6578 = vmatpush3.bf16.msra.mxu1 %v6577_v22 }
 0x51a   : > { %6580 = vmatprep.subr.bf16.mxu1 %v6579_v23 }
 0x51d   : > { %6582 = vmatpush3.bf16.msra.mxu1 %v6581_v28 }
 0x51e   : > { %6584 = vmatprep.subr.bf16.mxu1 %v6583_v30 }
 0x521   : > { %6586 = vmatpush3.bf16.msra.mxu1 %v6585_v36 }
 0x522   : > { %6588 = vmatprep.subr.bf16.mxu1 %v6587_v37 }
 0x525   : > { %6590 = vmatpush3.bf16.msra.mxu1 %v6589_v43 }
 0x526   : > { %6592 = vmatprep.subr.bf16.mxu1 %v6591_v44 }
 0x529   : > { %6594 = vmatpush3.bf16.msra.mxu1 %v6593_v49 }
 0x52a   : > { %6596 = vmatprep.subr.bf16.mxu1 %v6595_v50 }
 0x52d   : > { %6598 = vmatpush3.bf16.msra.mxu1 %v6597_v55 }
 0x52e   : > { %6600 = vmatprep.subr.bf16.mxu1 %v6599_v57 }
 0x531   : > { %6602 = vmatpush3.bf16.msra.mxu1 %v6601_v61 }
 0x532   : > { %6603 = vmatprep.subr.bf16.mxu1 %v6918_v4 }
 0x534   : > { %5185 = vmatmul.mubr.f32.vlgmr.msra.gmra.mrb[20].mxu1 %v4897_v63 }
 0x535   : > { %6605 = vmatpush3.bf16.msra.mxu1 %v6604_v3  ;;  %6436 = vmatprep.mubr.msk.f32.mxu1 %vm6919_vm12, %v6915_v1 }
 0x536   : > { %6606 = vmatprep.subr.bf16.mxu1 %v6918_v4 }
 0x539   : > { %6608 = vmatpush3.bf16.msra.mxu1 %v6607_v5 }
 0x5a7   : > { %v5919_v6 = vpop.f32.mrb[14].mxu1 }
 0x5a8   : > { %v5920_v7 = vpop.f32.mrb[15].mxu1 }
 0x5a9   : > { %v5921_v8 = vadd.f32 %v5920_v7, %v5919_v6 }
 0x5ab   : > { %v4977_v12 = vadd.f32 %v5921_v8, %v4868_v9 }
 0x5c7   : > { %v5954_v10 = vpop.f32.mrb[16].mxu1 }
 0x5c8   : > { %v5955_v11 = vpop.f32.mrb[17].mxu1 }
 0x5c9   : > { %v5956_v13 = vadd.f32 %v5955_v11, %v5954_v10 }
 0x5cb   : > { %v5047_v14 = vadd.f32 %v5956_v13, %v4977_v12 }
 0x5e7   : > { %v5989_v15 = vpop.f32.mrb[18].mxu1 }
 0x5e8   : > { %v5990_v16 = vpop.f32.mrb[19].mxu1 }
 0x5e9   : > { %v5991_v56 = vadd.f32 %v5990_v16, %v5989_v15 }
 0x5eb   : > { %v5117_v17 = vadd.f32 %v5991_v56, %v5047_v14 }
 0x607   : > { %v6024_v18 = vpop.f32.mrb[20].mxu1 }
 0x608   : > { %v6025_v59 = vpop.f32.mrb[21].mxu1 }
 0x609   : > { %v6026_v19 = vadd.f32 %v6025_v59, %v6024_v18 }
 0x60b   : > { %v5187_v1 = vadd.f32 %v6026_v19, %v5117_v17 }
 0x60d   : > { %v5190_v20 = vmax.f32 %v5187_v1, 0.0 }
 0x60f   : > { %6437 = vmatmul.mubr.msk.f32.vlgmr.msra.gmra.mrb[22].mxu1 %vm5196_vm13, %v5190_v20 }
 0x6e2   : > { %v5266_v31 = vpop.f32.mrb[22].mxu1 }
 0x6e3   : > { %v5267_v22 = vadd.f32 %v5266_v31, %v5195_v21  ;;  %v6438_v23 = vpop.f32.mrb[23].mxu1 }
 0x6e5   : > { %v5271_v24 = vand.u32 2147483647, %v5267_v22  ;;  %v5270_v37 = vmax.f32 %v5267_v22, 0.0 }
 0x6e7   : > { %v5272_v25 = vsub.f32 0.0, %v5271_v24 }
 0x6e9   : > { %v5273_v26 = vmul.f32 1.442695, %v5272_v25 }
 0x6eb   : > { %6847 = vpow2.f32 %v5273_v26 }
 0x6f5   : > { %v6848_v27 = vpop.eup %6847 }
 0x6f6   : > { %v5275_v28 = vadd.f32 1.0, %v6848_v27  ;;  %v5278_v30 = vmul.f32 -0.5, %v6848_v27  ;;  %v5281_v33 = vand.u32 2147483647, %v6848_v27 }
 0x6f8   : > { %6849 = vlog2.f32 %v5275_v28  ;;  %v5279_v29 = vadd.f32 1.0, %v5278_v30  ;;  %vm5282_vm14 = vcmp.lt.f32.partialorder %v5281_v33, 0.0004427343 }
 0x6fa   : > { %v5280_v36 = vmul.f32 %v6848_v27, %v5279_v29 }
 0x702   : > { %v6850_v34 = vpop.eup %6849 }
 0x703   : > { %v5277_v35 = vmul.f32 0.6931472, %v6850_v34 }
 0x705   : > { %v5283_v38 = vsel %vm5282_vm14, %v5280_v36, %v5277_v35 }
 0x706   : > { %v5284_v39 = vadd.f32 %v5283_v38, %v5270_v37 }
 0x708   : > { %5286 = vst.msk [vmem:[%s378_s29] sm:$0x1] %vm5285_vm15, %v5284_v39 }
 0x709   : > { %6864 = shalt.err (!%p6861_p3)
}
 0x70a   : > { %s6865_s24 = scalar_lea.hbm %s8330_s15, 16  ;;  %s6869_s12 = scalar_lea.hbm %s8383_s11, 32 }
 0x70b   : > { %p6866_p4 = scmp.ne.s32.totalorder %s8330_s15, %s6865_s24  ;;  %p6870_p9 = scmp.lt.u32.totalorder %s8330_s15, %s8383_s11 }
 0x70c   : > { %p6871_p10 = scmp.lt.u32.totalorder %s6869_s12, %s6865_s24  ;;  %p6873_p12 = scmp.lt.u32.totalorder %s6865_s24, %s8330_s15 }
 0x70d   : > { %p6867_p7 = pnand %p6866_p4, %p7019_p5 }
 0x70e   : > { %p6872_p11 = por %p6871_p10, %p6870_p9 }
 0x70f   : > { %p6868_p8 = pneg %p6867_p7 }
 0x710   : > { %p6874_p13 = por %p6873_p12, %p6872_p11 }
 0x712   : > { %p6875_p0 = pnand %p6874_p13, %p6868_p8 }
 0x714   : > { %6878 = shalt.err (!%p6875_p0)
}
 0x715   : > { %6803 = dma.vmem_to_hbm [thread:$0]  (%p7019_p5), %s8332_s30, 16, %s8330_s15, %s5288_s16  }
 0x716 PF: > { %p6809_p1 = scmp.ge.s32.totalorder %s6913_s20, 2  ;;  %s5312_s21 = sand.u32 1, %s6901_s17  }
 0x717   : > { %s5313_s13 = scalar_lea.sflag [#allocation7], %s5312_s21 }
 0x718   : > { %p6806_p2 = pnand %p6809_p1, %p7023_p6 }
 0x71a   : > { %6896 = dma.done.wait (!%p6806_p2), %s5313_s13, 16  }
 0x71b   : > { %6898 = vsyncadd (!%p6806_p2), %s5313_s13, 4294967280  ;;  %p21_p3 = scmp.ge.s32.totalorder %s7006_s23, 4   ;;  %s8392_s17 = smov %s6905_s18 }
 0x71c   : > { %s8393_s18 = smov %s6909_s19  ;;  %s8394_s19 = smov %s7017_s26 }
 0x71d   : > { %s8395_s20 = smov %s7006_s23  ;;  %23 = sbr.rel (!%p21_p3) target bundleno = 5 (0x5), region = 129 }
 0x724   :  { %5317 = vsyncpa [#allocation7], 1 }
 0x725   :  { %5319 = vsyncpa [#allocation7 + $0x1], 1 }

</bundles_post_ra>
